<compile_context>
chip_gen: v7x
topology: tpu7x:2x2x1
jax: 0.10.0
libtpu: 0.0.40
codegen_flags: <defaults>
</compile_context>

<pallas_src>
import functools
import math

import jax
import jax.numpy as jnp
from jax.experimental import pallas as pl
from jax.experimental.pallas import tpu as pltpu

D_IN = 4096
D_HID = 1152
D_OUT = 1152

_GELU_C = math.sqrt(2.0 / math.pi)


def _ffn_kernel(x_ref, w1_ref, b1_ref, w2_ref, b2_ref, o_ref, acc_ref):
    """Grid = (M tiles, K tiles); K (reduction of the first matmul) is last.

    acc_ref accumulates x @ W1 over K tiles in f32.  At the last K step we add
    the bias, apply tanh-GELU, run the second (small) matmul on the MXU and
    write the (tm, D_OUT) output tile.
    """
    k = pl.program_id(1)

    @pl.when(k == 0)
    def _():
        acc_ref[...] = jnp.zeros_like(acc_ref)

    # bf16 x bf16 -> f32 on the MXU.
    acc_ref[...] += jnp.dot(
        x_ref[...], w1_ref[...], preferred_element_type=jnp.float32
    )

    @pl.when(k == pl.num_programs(1) - 1)
    def _():
        h = acc_ref[...] + b1_ref[...]
        # GELU, approximate='tanh': 0.5*x*(1 + tanh(sqrt(2/pi)*(x + 0.044715*x^3)))
        g = 0.5 * h * (1.0 + jnp.tanh(_GELU_C * (h + 0.044715 * h * h * h)))
        out = (
            jnp.dot(
                g.astype(w2_ref.dtype), w2_ref[...],
                preferred_element_type=jnp.float32,
            )
            + b2_ref[...]
        )
        o_ref[...] = out.astype(o_ref.dtype)


@functools.partial(jax.jit, static_argnames=("tm", "tk"))
def text_embedder_pallas(context, w1, b1, w2, b2, *, tm=256, tk=1024):
    """context: (B, L, 4096) f32 -> (B, L, 1152) f32.

    Weights and activations are streamed as bf16 (f32 accumulation).
    tm=256/tk=1024 suits v6e/v7x; tm=128, tk=2048 is a good v5e choice.
    """
    B, L, K = context.shape
    assert K == D_IN
    assert K % tk == 0, "tk must divide 4096"

    M = B * L
    # Row tile: tm for realistic inputs; for tiny test shapes just round M up to
    # a sublane multiple instead of paying for a full 256-row pad.
    tm_eff = tm if M >= tm else max(8, ((M + 7) // 8) * 8)
    M_pad = ((M + tm_eff - 1) // tm_eff) * tm_eff

    x = context.reshape(M, K).astype(jnp.bfloat16)
    if M_pad != M:
        x = jnp.pad(x, ((0, M_pad - M), (0, 0)))

    w1_bf = w1.astype(jnp.bfloat16)
    w2_bf = w2.astype(jnp.bfloat16)
    b1_2d = b1.reshape(1, D_HID).astype(jnp.float32)
    b2_2d = b2.reshape(1, D_OUT).astype(jnp.float32)

    grid = (M_pad // tm_eff, K // tk)

    out = pl.pallas_call(
        _ffn_kernel,
        out_shape=jax.ShapeDtypeStruct((M_pad, D_OUT), jnp.float32),
        grid_spec=pltpu.PrefetchScalarGridSpec(
            num_scalar_prefetch=0,
            grid=grid,
            in_specs=[
                pl.BlockSpec((tm_eff, tk), lambda i, k: (i, k)),     # x tile
                pl.BlockSpec((tk, D_HID), lambda i, k: (k, 0)),      # W1 K-tile
                pl.BlockSpec((1, D_HID), lambda i, k: (0, 0)),       # b1 (const)
                pl.BlockSpec((D_HID, D_OUT), lambda i, k: (0, 0)),   # W2 (const)
                pl.BlockSpec((1, D_OUT), lambda i, k: (0, 0)),       # b2 (const)
            ],
            out_specs=pl.BlockSpec((tm_eff, D_OUT), lambda i, k: (i, 0)),
            scratch_shapes=[pltpu.VMEM((tm_eff, D_HID), jnp.float32)],
        ),
        compiler_params=pltpu.CompilerParams(
            dimension_semantics=("parallel", "arbitrary"),
            vmem_limit_bytes=48 << 20,  # fits v7x's 64 MiB/TC as well as v5e/v6e
        ),
    )(x, w1_bf, b1_2d, w2_bf, b2_2d)

    if M_pad != M:
        out = out[:M]
    return out.reshape(B, L, D_OUT)


def _init_params(key):
    """Deterministic init mimicking nn.Linear default (uniform +/- 1/sqrt(fan_in))."""
    k1, k2, k3, k4 = jax.random.split(key, 4)
    bound1 = 1.0 / math.sqrt(D_IN)
    bound2 = 1.0 / math.sqrt(D_HID)
    # Stored as (in, out) so the kernel does x @ W (equivalent to PyTorch x @ W.T).
    w1 = jax.random.uniform(k1, (D_IN, D_HID), jnp.float32, -bound1, bound1)
    b1 = jax.random.uniform(k2, (D_HID,), jnp.float32, -bound1, bound1)
    w2 = jax.random.uniform(k3, (D_HID, D_OUT), jnp.float32, -bound2, bound2)
    b2 = jax.random.uniform(k4, (D_OUT,), jnp.float32, -bound2, bound2)
    return w1, b1, w2, b2


def _reference(context, w1, b1, w2, b2, cast=None):
    """Pure-JAX reference. cast=jnp.bfloat16 mirrors the kernel's bf16 streaming."""
    def c(a):
        return a.astype(cast).astype(jnp.float32) if cast is not None else a

    h = c(context) @ c(w1) + b1
    g = 0.5 * h * (1.0 + jnp.tanh(_GELU_C * (h + 0.044715 * h ** 3)))
    return c(g) @ c(w2) + b2


if __name__ == "__main__":
    key = jax.random.PRNGKey(0)
    k_ctx, k_params = jax.random.split(key)

    B, L = 2, 8  # small batch/seq; feature dims (4096, 1152) fixed by the module
    context = jax.random.normal(k_ctx, (B, L, D_IN), jnp.float32)
    w1, b1, w2, b2 = _init_params(k_params)

    out = text_embedder_pallas(context, w1, b1, w2, b2)
    out = jax.block_until_ready(out)
    assert out.shape == (B, L, D_OUT)

    # Reference with matching bf16-stream numerics (f32 accumulation): tight check.
    ref_bf16 = _reference(context, w1, b1, w2, b2, cast=jnp.bfloat16)
    assert jnp.allclose(out, ref_bf16, atol=2e-3, rtol=2e-3), "mismatch vs bf16 reference"

    # Exact f32 module reference: looser tolerance due to bf16 weight streaming.
    ref_f32 = _reference(context, w1, b1, w2, b2, cast=None)
    assert jnp.allclose(out, ref_f32, atol=5e-2, rtol=5e-2), "mismatch vs f32 reference"

    print("KERNEL_OK")
</pallas_src>

<mosaic_0001>
module attributes {stable_mosaic.version = 11 : i64} {
  func.func @_ffn_kernel(%arg0: i32, %arg1: i32, %arg2: memref<16x1024xbf16, #tpu.memory_space<vmem>>, %arg3: memref<1024x1152xbf16, #tpu.memory_space<vmem>>, %arg4: memref<1x1152xf32, #tpu.memory_space<vmem>>, %arg5: memref<1152x1152xbf16, #tpu.memory_space<vmem>>, %arg6: memref<1x1152xf32, #tpu.memory_space<vmem>>, %arg7: memref<16x1152xf32, #tpu.memory_space<vmem>>, %arg8: memref<16x1152xf32, #tpu.memory_space<vmem>>) attributes {dimension_semantics = [#tpu.dimension_semantics<parallel>, #tpu.dimension_semantics<arbitrary>], iteration_bounds = array<i64: 1, 4>, scalar_prefetch = 0 : i64, scratch_operands = 1 : i64, tpu.core_type = #tpu.core_type<tc>, window_params = [{transform_indices = @transform_0, window_bounds = array<i64: 16, 1024>}, {transform_indices = @transform_1, window_bounds = array<i64: 1024, 1152>}, {pipeline_mode = #tpu.pipeline_mode<synchronous>, transform_indices = @transform_2, window_bounds = array<i64: 1, 1152>}, {pipeline_mode = #tpu.pipeline_mode<synchronous>, transform_indices = @transform_3, window_bounds = array<i64: 1152, 1152>}, {pipeline_mode = #tpu.pipeline_mode<synchronous>, transform_indices = @transform_4, window_bounds = array<i64: 1, 1152>}, {transform_indices = @transform_5, window_bounds = array<i64: 16, 1152>}]} {
    %c0_i32 = arith.constant 0 : i32
    %0 = arith.cmpi eq, %arg1, %c0_i32 : i32
    %1 = arith.extui %0 : i1 to i32
    %c0_i32_0 = arith.constant 0 : i32
    %2 = arith.cmpi ne, %1, %c0_i32_0 : i32
    scf.if %2 {
      %cst_9 = arith.constant 0.000000e+00 : f32
      %12 = vector.broadcast %cst_9 : f32 to vector<16x1152xf32>
      %c0_10 = arith.constant 0 : index
      %c0_11 = arith.constant 0 : index
      %13 = vector.load %arg8[%c0_10, %c0_11] : memref<16x1152xf32, #tpu.memory_space<vmem>>, vector<16x1152xf32>
      tpu.vector_store %arg8[%c0_10, %c0_11], %12 {strides = array<i32>} : memref<16x1152xf32, #tpu.memory_space<vmem>>, vector<16x1152xf32>,
    } else {
    }
    %c0 = arith.constant 0 : index
    %c0_1 = arith.constant 0 : index
    %3 = vector.load %arg8[%c0, %c0_1] : memref<16x1152xf32, #tpu.memory_space<vmem>>, vector<16x1152xf32>
    %c0_2 = arith.constant 0 : index
    %c0_3 = arith.constant 0 : index
    %4 = vector.load %arg2[%c0_2, %c0_3] : memref<16x1024xbf16, #tpu.memory_space<vmem>>, vector<16x1024xbf16>
    %c0_4 = arith.constant 0 : index
    %c0_5 = arith.constant 0 : index
    %5 = vector.load %arg3[%c0_4, %c0_5] : memref<1024x1152xbf16, #tpu.memory_space<vmem>>, vector<1024x1152xbf16>
    %cst = arith.constant dense<0.000000e+00> : vector<16x1152xf32>
    %6 = tpu.matmul %4, %5, %cst {dimension_numbers = #tpu.dot_dimension_numbers<[1], [0], [0], [1], [0, 0, 1, 1], [], []>} : vector<16x1024xbf16>, vector<1024x1152xbf16>, vector<16x1152xf32> -> vector<16x1152xf32>
    %7 = arith.addf %3, %6 : vector<16x1152xf32>
    %c0_6 = arith.constant 0 : index
    %c0_7 = arith.constant 0 : index
    %8 = vector.load %arg8[%c0_6, %c0_7] : memref<16x1152xf32, #tpu.memory_space<vmem>>, vector<16x1152xf32>
    tpu.vector_store %arg8[%c0_6, %c0_7], %7 {strides = array<i32>} : memref<16x1152xf32, #tpu.memory_space<vmem>>, vector<16x1152xf32>,
    %c3_i32 = arith.constant 3 : i32
    %9 = arith.cmpi eq, %arg1, %c3_i32 : i32
    %10 = arith.extui %9 : i1 to i32
    %c0_i32_8 = arith.constant 0 : i32
    %11 = arith.cmpi ne, %10, %c0_i32_8 : i32
    scf.if %11 {
      %c0_9 = arith.constant 0 : index
      %c0_10 = arith.constant 0 : index
      %12 = vector.load %arg8[%c0_9, %c0_10] : memref<16x1152xf32, #tpu.memory_space<vmem>>, vector<16x1152xf32>
      %c0_11 = arith.constant 0 : index
      %c0_12 = arith.constant 0 : index
      %13 = vector.load %arg4[%c0_11, %c0_12] : memref<1x1152xf32, #tpu.memory_space<vmem>>, vector<1x1152xf32>
      %14 = vector.broadcast %13 : vector<1x1152xf32> to vector<16x1152xf32>
      %15 = arith.addf %12, %14 : vector<16x1152xf32>
      %cst_13 = arith.constant 5.000000e-01 : f32
      %16 = vector.broadcast %cst_13 : f32 to vector<16x1152xf32>
      %17 = arith.mulf %16, %15 : vector<16x1152xf32>
      %cst_14 = arith.constant 4.471500e-02 : f32
      %18 = vector.broadcast %cst_14 : f32 to vector<16x1152xf32>
      %19 = arith.mulf %18, %15 : vector<16x1152xf32>
      %20 = arith.mulf %19, %15 : vector<16x1152xf32>
      %21 = arith.mulf %20, %15 : vector<16x1152xf32>
      %22 = arith.addf %15, %21 : vector<16x1152xf32>
      %cst_15 = arith.constant 0.797884583 : f32
      %23 = vector.broadcast %cst_15 : f32 to vector<16x1152xf32>
      %24 = arith.mulf %23, %22 : vector<16x1152xf32>
      %25 = math.tanh %24 : vector<16x1152xf32>
      %cst_16 = arith.constant 1.000000e+00 : f32
      %26 = vector.broadcast %cst_16 : f32 to vector<16x1152xf32>
      %27 = arith.addf %26, %25 : vector<16x1152xf32>
      %28 = arith.mulf %17, %27 : vector<16x1152xf32>
      %29 = arith.truncf %28 : vector<16x1152xf32> to vector<16x1152xbf16>
      %c0_17 = arith.constant 0 : index
      %c0_18 = arith.constant 0 : index
      %30 = vector.load %arg5[%c0_17, %c0_18] : memref<1152x1152xbf16, #tpu.memory_space<vmem>>, vector<1152x1152xbf16>
      %cst_19 = arith.constant dense<0.000000e+00> : vector<16x1152xf32>
      %31 = tpu.matmul %29, %30, %cst_19 {dimension_numbers = #tpu.dot_dimension_numbers<[1], [0], [0], [1], [0, 0, 1, 1], [], []>} : vector<16x1152xbf16>, vector<1152x1152xbf16>, vector<16x1152xf32> -> vector<16x1152xf32>
      %c0_20 = arith.constant 0 : index
      %c0_21 = arith.constant 0 : index
      %32 = vector.load %arg6[%c0_20, %c0_21] : memref<1x1152xf32, #tpu.memory_space<vmem>>, vector<1x1152xf32>
      %33 = vector.broadcast %32 : vector<1x1152xf32> to vector<16x1152xf32>
      %34 = arith.addf %31, %33 : vector<16x1152xf32>
      %c0_22 = arith.constant 0 : index
      %c0_23 = arith.constant 0 : index
      %35 = vector.load %arg7[%c0_22, %c0_23] : memref<16x1152xf32, #tpu.memory_space<vmem>>, vector<16x1152xf32>
      tpu.vector_store %arg7[%c0_22, %c0_23], %34 {strides = array<i32>} : memref<16x1152xf32, #tpu.memory_space<vmem>>, vector<16x1152xf32>,
    } else {
    }
    return
  }
  func.func @transform_0(%arg0: i32, %arg1: i32) -> (i32, i32) {
    %c0_i32 = arith.constant 0 : i32
    return %arg0, %arg1 : i32, i32
  }
  func.func @transform_1(%arg0: i32, %arg1: i32) -> (i32, i32) {
    %c0_i32 = arith.constant 0 : i32
    %c0_i32_0 = arith.constant 0 : i32
    return %arg1, %c0_i32 : i32, i32
  }
  func.func @transform_2(%arg0: i32, %arg1: i32) -> (i32, i32) {
    %c0_i32 = arith.constant 0 : i32
    %c0_i32_0 = arith.constant 0 : i32
    %c0_i32_1 = arith.constant 0 : i32
    return %c0_i32, %c0_i32_0 : i32, i32
  }
  func.func @transform_3(%arg0: i32, %arg1: i32) -> (i32, i32) {
    %c0_i32 = arith.constant 0 : i32
    %c0_i32_0 = arith.constant 0 : i32
    %c0_i32_1 = arith.constant 0 : i32
    return %c0_i32, %c0_i32_0 : i32, i32
  }
  func.func @transform_4(%arg0: i32, %arg1: i32) -> (i32, i32) {
    %c0_i32 = arith.constant 0 : i32
    %c0_i32_0 = arith.constant 0 : i32
    %c0_i32_1 = arith.constant 0 : i32
    return %c0_i32, %c0_i32_0 : i32, i32
  }
  func.func @transform_5(%arg0: i32, %arg1: i32) -> (i32, i32) {
    %c0_i32 = arith.constant 0 : i32
    %c0_i32_0 = arith.constant 0 : i32
    return %arg0, %c0_i32 : i32, i32
  }
}

</mosaic_0001>

<bundles_post_ra>
// kernel: text_embedder_pallas.1
= control target key start
LH: loop header
LB: loop body
LE: loop exit
PB: predicated region body
PF: predicated region fallthrough
CT: control target
= control target key end

     0   :  { %10 = vsyncpa [#allocation5], 0  ;;  %s13914_s18 = smov 0   ;;  %s13916_s19 = smov 0   ;;  %s16894_s0 = inlined_call_operand.vmem [shape: bf16[16,4096], index: 0, kind: input, shape index: {}]   ;;  %s16895_s1 = inlined_call_operand.vmem [shape: bf16[4096,1152], index: 1, kind: input, shape index: {}]   ;;  %s16896_s2 = inlined_call_operand.vmem [shape: f32[1,1152], index: 2, kind: input, shape index: {}]   ;;  %s16897_s3 = inlined_call_operand.vmem [shape: bf16[1152,1152], index: 3, kind: input, shape index: {}]   ;;  %s16898_s4 = inlined_call_operand.vmem [shape: f32[1,1152], index: 4, kind: input, shape index: {}]   ;;  %s16899_s5 = inlined_call_operand.hbm [shape: f32[16,1152], index: 5, kind: output, shape index: {}]  }
   0x1   :  { %s13918_s20 = smov 0   ;;  %s13920_s21 = smov 0  }
   0x2   :  { %s13922_s22 = smov 0  }
   0x3 LB: > { %s10364_s23 = sadd.s32 4294967295, %s13875_s22   ;;  %s25_s24 = sadd.s32 1, %s13871_s21  ;;  %s13875_s22 = sphi %s13922_s22, %s16_s22   ;;  %s13871_s21 = sphi %s13920_s21, %s16904_s21   ;;  %s13867_s20 = sphi %s13918_s20, %s16903_s20   ;;  %s13863_s19 = sphi %s13916_s19, %s16902_s19   ;;  %s13859_s18 = sphi %s13914_s18, %s16901_s18  }
   0x4   : > { %p26_p0 = scmp.ge.s32.totalorder %s25_s24, 4  ;;  %p44_p1 = scmp.ne.s32.totalorder %s13863_s19, %s13859_s18 }
   0x5   : > { %p45_p2 = scmp.eq.s32.totalorder %s13875_s22, 0  ;;  %s37_s26 = sadd.s32 1, %s13863_s19 }
   0x6   : > { %s16906_s24 = smov (%p26_p0, %s25_s24), 0  ;;  %p10366_p5 = scmp.ge.s32.totalorder %s13875_s22, 4 }
   0x7   : > { %p46_p3 = por %p45_p2, %p44_p1  ;;  %s33_s25 = ssub.s32 %s13871_s21, %s16906_s24 }
   0x8   : > { %p35_p4 = scmp.eq.s32.totalorder %s33_s25, 0  ;;  %194 = sbr.rel (%p10366_p5) target bundleno = 23 (0x17), region = 28 }
   0xa   : > { %s13950_s27 = scalar_select %p35_p4, %s13863_s19, %s37_s26  }
   0xf   : > { %197 = sbr.rel (!%p46_p3) target bundleno = 23 (0x17), region = 32  ;;  %s199_s28 = sand.u32 (%p46_p3), 1, %s13863_s19  }
  0x10   : > { %s11614_s29 = sshll.u32 (%p46_p3), %s13871_s21, 5  ;;  %s10367_s30 = sshll.u32 (%p46_p3), %s199_s28, 6 }
  0x11   : > { %s207_s8 = scalar_lea.vmem (%p46_p3), %s16894_s0, %s11614_s29  ;;  %s201_s9 = scalar_lea.vmem (%p46_p3), [#allocation3], %s10367_s30 }
  0x12   : > { %v220_v0 = vld [vmem:[%s207_s8] sm:$0xff] (%p46_p3)  ;;  %v222_v1 = vld [vmem:[%s207_s8 + $0x8] sm:$0xff] (%p46_p3)  ;;  %v224_v2 = vld [vmem:[%s207_s8 + $0x10] sm:$0xff] (%p46_p3) }
  0x13   : > { %221 = vst [vmem:[%s201_s9] sm:$0xff] (%p46_p3), %v220_v0  ;;  %223 = vst [vmem:[%s201_s9 + $0x8] sm:$0xff] (%p46_p3), %v222_v1  ;;  %v226_v3 = vld [vmem:[%s207_s8 + $0x18] sm:$0xff] (%p46_p3)  ;;  %v228_v4 = vld [vmem:[%s207_s8 + $0x80] sm:$0xff] (%p46_p3) }
  0x14   : > { %225 = vst [vmem:[%s201_s9 + $0x10] sm:$0xff] (%p46_p3), %v224_v2  ;;  %v230_v5 = vld [vmem:[%s207_s8 + $0x88] sm:$0xff] (%p46_p3)  ;;  %227 = vst [vmem:[%s201_s9 + $0x18] sm:$0xff] (%p46_p3), %v226_v3  ;;  %v232_v6 = vld [vmem:[%s207_s8 + $0x90] sm:$0xff] (%p46_p3) }
  0x15   : > { %229 = vst [vmem:[%s201_s9 + $0x20] sm:$0xff] (%p46_p3), %v228_v4  ;;  %231 = vst [vmem:[%s201_s9 + $0x28] sm:$0xff] (%p46_p3), %v230_v5  ;;  %v234_v7 = vld [vmem:[%s207_s8 + $0x98] sm:$0xff] (%p46_p3) }
  0x16   : > { %233 = vst [vmem:[%s201_s9 + $0x30] sm:$0xff] %v232_v6  ;;  %235 = vst [vmem:[%s201_s9 + $0x38] sm:$0xff] %v234_v7 }
  0x17 PF: > { %p10370_p6 = scmp.ge.s32.totalorder %s13875_s22, 1  ;;  %p250_p7 = scmp.lt.s32.totalorder %s13875_s22, 5 }
  0x19   : > { %p251_p8 = pnand %p10370_p6, %p250_p7 }
  0x1a   : > { %s257_s10 = sand.u32 (!%p251_p8), 1, %s13859_s18   ;;  %s10372_s11 = sshll.u32 (!%p251_p8), %s13867_s20, 7 }
  0x1b   : > { %254 = sbr.rel (%p251_p8) target bundleno = 1726 (0x6be), region = 59  ;;  %s10371_s12 = sshll.u32 (!%p251_p8), %s257_s10, 6 }
  0x1c   : > { %p288_p9 = scmp.lt.s32.totalorder (!%p251_p8), %s10372_s11, 511  ;;  %s13967_s17 = scalar_lea.vmem (!%p251_p8), [#allocation3], %s10371_s12 }
  0x1d   : > { %p10374_p10 = scmp.ne.s32.totalorder (!%p251_p8), %s13867_s20, 0 }
  0x22   : > { %s16908_s11 = smov (!%p288_p9, %s10372_s11), 511  ;;  %299 = sbr.rel (%p10374_p10) target bundleno = 45 (0x2d), region = 67 }
  0x23   : > { %s11948_s13 = smul.u32 36, %s16908_s11  ;;  %v13877_v8 = vmov (!%p10374_p10), 0.0  }
  0x24   : > { %300 = vst [vmem:[#allocation2] sm:$0xff] (!%p10374_p10), %v13877_v8  ;;  %301 = vst [vmem:[#allocation2 + $0x8] sm:$0xff] (!%p10374_p10), %v13877_v8 }
  0x25   : > { %s13965_s16 = scalar_lea.vmem %s16895_s1, %s11948_s13  ;;  %302 = vst [vmem:[#allocation2 + $0x10] sm:$0xff] (!%p10374_p10), %v13877_v8  ;;  %303 = vst [vmem:[#allocation2 + $0x18] sm:$0xff] (!%p10374_p10), %v13877_v8 }
  0x26   : > { %304 = vst [vmem:[#allocation2 + $0x20] sm:$0xff] (!%p10374_p10), %v13877_v8  ;;  %305 = vst [vmem:[#allocation2 + $0x28] sm:$0xff] (!%p10374_p10), %v13877_v8 }
  0x27   : > { %306 = vst [vmem:[#allocation2 + $0x30] sm:$0xff] (!%p10374_p10), %v13877_v8  ;;  %307 = vst [vmem:[#allocation2 + $0x38] sm:$0xff] (!%p10374_p10), %v13877_v8 }
  0x28   : > { %308 = vst [vmem:[#allocation2 + $0x40] sm:$0xff] (!%p10374_p10), %v13877_v8  ;;  %309 = vst [vmem:[#allocation2 + $0x48] sm:$0xff] (!%p10374_p10), %v13877_v8 }
  0x29   : > { %310 = vst [vmem:[#allocation2 + $0x50] sm:$0xff] %v13877_v8  ;;  %311 = vst [vmem:[#allocation2 + $0x58] sm:$0xff] %v13877_v8 }
  0x2a   : > { %312 = vst [vmem:[#allocation2 + $0x60] sm:$0xff] %v13877_v8  ;;  %313 = vst [vmem:[#allocation2 + $0x68] sm:$0xff] %v13877_v8 }
  0x2b   : > { %314 = vst [vmem:[#allocation2 + $0x70] sm:$0xff] %v13877_v8  ;;  %315 = vst [vmem:[#allocation2 + $0x78] sm:$0xff] %v13877_v8 }
  0x2c   : > { %316 = vst [vmem:[#allocation2 + $0x80] sm:$0xff] %v13877_v8  ;;  %317 = vst [vmem:[#allocation2 + $0x88] sm:$0xff] %v13877_v8 }
  0x2d PF: > { %v12002_v9 = vld [vmem:[%s13965_s16 + $0x4] ss:$36 sps:$4 sm:$0xff]   ;;  %v12004_v10 = vld [vmem:[%s13965_s16 + $0xc] ss:$36 sps:$4 sm:$0xff]   ;;  %v12010_v14 = vld [vmem:[%s13965_s16 + $0x54] ss:$36 sps:$4 sm:$0xff]  }
  0x2e   : > { %3968 = vmatprep.subr.bf16.mxu0 %v12002_v9  ;;  %v12006_v11 = vld [vmem:[%s13965_s16] ss:$36 sps:$4 sm:$0xff]   ;;  %v12007_v12 = vld [vmem:[%s13965_s16 + $0x8] ss:$36 sps:$4 sm:$0xff]   ;;  %4140 = vmatprep.subr.bf16.mxu1 %v12004_v10  ;;  %v12013_v16 = vld [vmem:[%s13965_s16 + $0x50] ss:$36 sps:$4 sm:$0xff]  }
  0x2f   : > { %v12008_v13 = vld [vmem:[%s13965_s16 + $0x4c] ss:$36 sps:$4 sm:$0xff]   ;;  %3969 = vmatpush1.bf16.msra.mxu0 %v12006_v11  ;;  %4141 = vmatpush1.bf16.msra.mxu1 %v12007_v12  ;;  %v12014_v17 = vld [vmem:[%s13965_s16 + $0x94] ss:$36 sps:$4 sm:$0xff]   ;;  %v12016_v18 = vld [vmem:[%s13965_s16 + $0x9c] ss:$36 sps:$4 sm:$0xff]  }
  0x30   : > { %v12012_v15 = vld [vmem:[%s13965_s16 + $0x48] ss:$36 sps:$4 sm:$0xff]   ;;  %3970 = vmatprep.subr.bf16.mxu0 %v12008_v13  ;;  %4142 = vmatprep.subr.bf16.mxu1 %v12010_v14  ;;  %v12018_v19 = vld [vmem:[%s13965_s16 + $0x90] ss:$36 sps:$4 sm:$0xff]   ;;  %v12019_v20 = vld [vmem:[%s13965_s16 + $0x98] ss:$36 sps:$4 sm:$0xff]  }
  0x31   : > { %v12020_v21 = vld [vmem:[%s13965_s16 + $0xdc] ss:$36 sps:$4 sm:$0xff]   ;;  %v12022_v22 = vld [vmem:[%s13965_s16 + $0xe4] ss:$36 sps:$4 sm:$0xff]   ;;  %v12028_v26 = vld [vmem:[%s13965_s16 + $0x12c] ss:$36 sps:$4 sm:$0xff]  }
  0x32   : > { %v12024_v23 = vld [vmem:[%s13965_s16 + $0xd8] ss:$36 sps:$4 sm:$0xff]   ;;  %v12025_v24 = vld [vmem:[%s13965_s16 + $0xe0] ss:$36 sps:$4 sm:$0xff]   ;;  %v12031_v28 = vld [vmem:[%s13965_s16 + $0x128] ss:$36 sps:$4 sm:$0xff]  }
  0x33   : > { %3971 = vmatpush1.bf16.msra.mxu0 %v12012_v15  ;;  %4143 = vmatpush1.bf16.msra.mxu1 %v12013_v16  ;;  %v12026_v25 = vld [vmem:[%s13965_s16 + $0x124] ss:$36 sps:$4 sm:$0xff]   ;;  %v12032_v29 = vld [vmem:[%s13965_s16 + $0x16c] ss:$36 sps:$4 sm:$0xff]   ;;  %v12034_v30 = vld [vmem:[%s13965_s16 + $0x174] ss:$36 sps:$4 sm:$0xff]  }
  0x34   : > { %3972 = vmatprep.subr.bf16.mxu0 %v12014_v17  ;;  %4144 = vmatprep.subr.bf16.mxu1 %v12016_v18  ;;  %v12030_v27 = vld [vmem:[%s13965_s16 + $0x120] ss:$36 sps:$4 sm:$0xff]   ;;  %v12036_v31 = vld [vmem:[%s13965_s16 + $0x168] ss:$36 sps:$4 sm:$0xff]   ;;  %v12037_v32 = vld [vmem:[%s13965_s16 + $0x170] ss:$36 sps:$4 sm:$0xff]  }
  0x35   : > { %v12038_v33 = vld [vmem:[%s13965_s16 + $0x1b4] ss:$36 sps:$4 sm:$0xff]   ;;  %v12040_v34 = vld [vmem:[%s13965_s16 + $0x1bc] ss:$36 sps:$4 sm:$0xff]   ;;  %v12046_v38 = vld [vmem:[%s13965_s16 + $0x204] ss:$36 sps:$4 sm:$0xff]  }
  0x36   : > { %v12042_v35 = vld [vmem:[%s13965_s16 + $0x1b0] ss:$36 sps:$4 sm:$0xff]   ;;  %v12043_v36 = vld [vmem:[%s13965_s16 + $0x1b8] ss:$36 sps:$4 sm:$0xff]   ;;  %v12049_v40 = vld [vmem:[%s13965_s16 + $0x200] ss:$36 sps:$4 sm:$0xff]  }
  0x37   : > { %3973 = vmatpush1.bf16.msra.mxu0 %v12018_v19  ;;  %4145 = vmatpush1.bf16.msra.mxu1 %v12019_v20  ;;  %v12044_v37 = vld [vmem:[%s13965_s16 + $0x1fc] ss:$36 sps:$4 sm:$0xff]   ;;  %v12050_v41 = vld [vmem:[%s13965_s16 + $0x244] ss:$36 sps:$4 sm:$0xff]   ;;  %v12052_v42 = vld [vmem:[%s13965_s16 + $0x24c] ss:$36 sps:$4 sm:$0xff]  }
  0x38   : > { %3974 = vmatprep.subr.bf16.mxu0 %v12020_v21  ;;  %4146 = vmatprep.subr.bf16.mxu1 %v12022_v22  ;;  %v12048_v39 = vld [vmem:[%s13965_s16 + $0x1f8] ss:$36 sps:$4 sm:$0xff]   ;;  %v12054_v43 = vld [vmem:[%s13965_s16 + $0x240] ss:$36 sps:$4 sm:$0xff]   ;;  %v12055_v44 = vld [vmem:[%s13965_s16 + $0x248] ss:$36 sps:$4 sm:$0xff]  }
  0x39   : > { %v12056_v45 = vld [vmem:[%s13965_s16 + $0x28c] ss:$36 sps:$4 sm:$0xff]   ;;  %v12058_v46 = vld [vmem:[%s13965_s16 + $0x294] ss:$36 sps:$4 sm:$0xff]   ;;  %v12064_v50 = vld [vmem:[%s13965_s16 + $0x2dc] ss:$36 sps:$4 sm:$0xff]  }
  0x3a   : > { %v12060_v47 = vld [vmem:[%s13965_s16 + $0x288] ss:$36 sps:$4 sm:$0xff]   ;;  %v12061_v48 = vld [vmem:[%s13965_s16 + $0x290] ss:$36 sps:$4 sm:$0xff]   ;;  %v12067_v52 = vld [vmem:[%s13965_s16 + $0x2d8] ss:$36 sps:$4 sm:$0xff]  }
  0x3b   : > { %3975 = vmatpush1.bf16.msra.mxu0 %v12024_v23  ;;  %4147 = vmatpush1.bf16.msra.mxu1 %v12025_v24  ;;  %v12062_v49 = vld [vmem:[%s13965_s16 + $0x2d4] ss:$36 sps:$4 sm:$0xff]   ;;  %v12068_v53 = vld [vmem:[%s13965_s16 + $0x31c] ss:$36 sps:$4 sm:$0xff]   ;;  %v12070_v54 = vld [vmem:[%s13965_s16 + $0x324] ss:$36 sps:$4 sm:$0xff]  }
  0x3c   : > { %3976 = vmatprep.subr.bf16.mxu0 %v12026_v25  ;;  %4148 = vmatprep.subr.bf16.mxu1 %v12028_v26  ;;  %v12066_v51 = vld [vmem:[%s13965_s16 + $0x2d0] ss:$36 sps:$4 sm:$0xff]   ;;  %v12072_v57 = vld [vmem:[%s13965_s16 + $0x318] ss:$36 sps:$4 sm:$0xff]   ;;  %v12073_v58 = vld [vmem:[%s13965_s16 + $0x320] ss:$36 sps:$4 sm:$0xff]  }
  0x3d   : > { %v336_v55 = vld [vmem:[%s13967_s17] sm:$0xff]  ;;  %v12074_v60 = vld [vmem:[%s13965_s16 + $0x364] ss:$36 sps:$4 sm:$0xff]   ;;  %v12088_v5 = vld [vmem:[%s13965_s16 + $0x3fc] ss:$36 sps:$4 sm:$0xff]   ;;  %p10959_p11 = scmp.ne.s32.totalorder %s13867_s20, 3 }
  0x3e   : > { %v340_v56 = vld [vmem:[%s13967_s17 + $0x20] sm:$0xff]  ;;  %v12078_v62 = vld [vmem:[%s13965_s16 + $0x360] ss:$36 sps:$4 sm:$0xff]   ;;  %v12079_v63 = vld [vmem:[%s13965_s16 + $0x368] ss:$36 sps:$4 sm:$0xff]   ;;  %vm13880_vm0 = vmmov (!%p10959_p11), 0  }
  0x3f   : > { %3977 = vmatpush1.bf16.msra.mxu0 %v12030_v27  ;;  %4149 = vmatpush1.bf16.msra.mxu1 %v12031_v28  ;;  %v14020_v59 = vcombine.high %v336_v55, %v340_v56  ;;  %v12076_v61 = vld [vmem:[%s13965_s16 + $0x36c] ss:$36 sps:$4 sm:$0xff]   ;;  %v12082_v1 = vld [vmem:[%s13965_s16 + $0x3b4] ss:$36 sps:$4 sm:$0xff]   ;;  %v12092_v8 = vld [vmem:[%s13965_s16 + $0x43c] ss:$36 sps:$4 sm:$0xff]   ;;  %v14042_v14 = vcombine.low %v336_v55, %v340_v56 }
  0x40   : > { %3978 = vmatprep.subr.bf16.mxu0 %v12032_v29  ;;  %4150 = vmatprep.subr.bf16.mxu1 %v12034_v30  ;;  %v12080_v0 = vld [vmem:[%s13965_s16 + $0x3ac] ss:$36 sps:$4 sm:$0xff]   ;;  %v12086_v4 = vld [vmem:[%s13965_s16 + $0x3f4] ss:$36 sps:$4 sm:$0xff]   ;;  %v12094_v9 = vld [vmem:[%s13965_s16 + $0x444] ss:$36 sps:$4 sm:$0xff]  }
  0x41   : > { %4000 = vmatprep.mubr.bf16.mxu0 %v14020_v59  ;;  %4172 = vmatprep.mubr.bf16.mxu1 %v14020_v59  ;;  %v12084_v2 = vld [vmem:[%s13965_s16 + $0x3a8] ss:$36 sps:$4 sm:$0xff]   ;;  %v12085_v3 = vld [vmem:[%s13965_s16 + $0x3b0] ss:$36 sps:$4 sm:$0xff]   ;;  %v12091_v7 = vld [vmem:[%s13965_s16 + $0x3f8] ss:$36 sps:$4 sm:$0xff]  }
  0x42   : > { %v12090_v6 = vld [vmem:[%s13965_s16 + $0x3f0] ss:$36 sps:$4 sm:$0xff]   ;;  %v12096_v10 = vld [vmem:[%s13965_s16 + $0x438] ss:$36 sps:$4 sm:$0xff]   ;;  %v12097_v11 = vld [vmem:[%s13965_s16 + $0x440] ss:$36 sps:$4 sm:$0xff]  }
  0x43   : > { %3979 = vmatpush1.bf16.msra.mxu0 %v12036_v31  ;;  %4151 = vmatpush1.bf16.msra.mxu1 %v12037_v32  ;;  %v12100_v12 = vld [vmem:[%s13965_s16 + $0x484] ss:$36 sps:$4 sm:$0xff]   ;;  %v12103_v13 = vld [vmem:[%s13965_s16 + $0x48c] ss:$36 sps:$4 sm:$0xff]   ;;  %v12109_v18 = vld [vmem:[%s13965_s16 + $0x4d4] ss:$36 sps:$4 sm:$0xff]  }
  0x44   : > { %3980 = vmatprep.subr.bf16.mxu0 %v12038_v33  ;;  %4152 = vmatprep.subr.bf16.mxu1 %v12040_v34  ;;  %v12098_v15 = vld [vmem:[%s13965_s16 + $0x480] ss:$36 sps:$4 sm:$0xff]   ;;  %v12101_v16 = vld [vmem:[%s13965_s16 + $0x488] ss:$36 sps:$4 sm:$0xff]   ;;  %v12107_v20 = vld [vmem:[%s13965_s16 + $0x4d0] ss:$36 sps:$4 sm:$0xff]  }
  0x45   : > { %v12106_v17 = vld [vmem:[%s13965_s16 + $0x4cc] ss:$36 sps:$4 sm:$0xff]   ;;  %v12112_v21 = vld [vmem:[%s13965_s16 + $0x514] ss:$36 sps:$4 sm:$0xff]   ;;  %v12115_v22 = vld [vmem:[%s13965_s16 + $0x51c] ss:$36 sps:$4 sm:$0xff]  }
  0x46   : > { %v12104_v19 = vld [vmem:[%s13965_s16 + $0x4c8] ss:$36 sps:$4 sm:$0xff]   ;;  %v12110_v23 = vld [vmem:[%s13965_s16 + $0x510] ss:$36 sps:$4 sm:$0xff]   ;;  %v12113_v24 = vld [vmem:[%s13965_s16 + $0x518] ss:$36 sps:$4 sm:$0xff]  }
  0x47   : > { %3981 = vmatpush1.bf16.msra.mxu0 %v12042_v35  ;;  %4153 = vmatpush1.bf16.msra.mxu1 %v12043_v36  ;;  %v12118_v25 = vld [vmem:[%s13965_s16 + $0x55c] ss:$36 sps:$4 sm:$0xff]   ;;  %v12121_v26 = vld [vmem:[%s13965_s16 + $0x564] ss:$36 sps:$4 sm:$0xff]   ;;  %v12127_v30 = vld [vmem:[%s13965_s16 + $0x5ac] ss:$36 sps:$4 sm:$0xff]  }
  0x48   : > { %3982 = vmatprep.subr.bf16.mxu0 %v12044_v37  ;;  %4154 = vmatprep.subr.bf16.mxu1 %v12046_v38  ;;  %v12116_v27 = vld [vmem:[%s13965_s16 + $0x558] ss:$36 sps:$4 sm:$0xff]   ;;  %v12119_v28 = vld [vmem:[%s13965_s16 + $0x560] ss:$36 sps:$4 sm:$0xff]   ;;  %v12125_v32 = vld [vmem:[%s13965_s16 + $0x5a8] ss:$36 sps:$4 sm:$0xff]  }
  0x49   : > { %v12124_v29 = vld [vmem:[%s13965_s16 + $0x5a4] ss:$36 sps:$4 sm:$0xff]   ;;  %v12130_v33 = vld [vmem:[%s13965_s16 + $0x5ec] ss:$36 sps:$4 sm:$0xff]   ;;  %v12133_v34 = vld [vmem:[%s13965_s16 + $0x5f4] ss:$36 sps:$4 sm:$0xff]  }
  0x4a   : > { %v12122_v31 = vld [vmem:[%s13965_s16 + $0x5a0] ss:$36 sps:$4 sm:$0xff]   ;;  %v12128_v35 = vld [vmem:[%s13965_s16 + $0x5e8] ss:$36 sps:$4 sm:$0xff]   ;;  %v12131_v36 = vld [vmem:[%s13965_s16 + $0x5f0] ss:$36 sps:$4 sm:$0xff]  }
  0x4b   : > { %3983 = vmatpush1.bf16.msra.mxu0 %v12048_v39  ;;  %4155 = vmatpush1.bf16.msra.mxu1 %v12049_v40  ;;  %v12136_v37 = vld [vmem:[%s13965_s16 + $0x634] ss:$36 sps:$4 sm:$0xff]   ;;  %v12139_v38 = vld [vmem:[%s13965_s16 + $0x63c] ss:$36 sps:$4 sm:$0xff]  }
  0x4c   : > { %3984 = vmatprep.subr.bf16.mxu0 %v12050_v41  ;;  %4156 = vmatprep.subr.bf16.mxu1 %v12052_v42  ;;  %v14071_v39 = vld [vmem:[%s13967_s17 + $0x8] sm:$0xff]  ;;  %v12134_v41 = vld [vmem:[%s13965_s16 + $0x630] ss:$36 sps:$4 sm:$0xff]  }
  0x4d   : > { %v14074_v40 = vld [vmem:[%s13967_s17 + $0x28] sm:$0xff]  ;;  %v12155_v55 = vld [vmem:[%s13965_s16 + $0x710] ss:$36 sps:$4 sm:$0xff]  }
  0x4e   : > { %v12137_v42 = vld [vmem:[%s13965_s16 + $0x638] ss:$36 sps:$4 sm:$0xff]  }
  0x4f   : > { %3985 = vmatpush1.bf16.msra.mxu0 %v12054_v43  ;;  %4157 = vmatpush1.bf16.msra.mxu1 %v12055_v44  ;;  %v14080_v43 = vcombine.high %v14071_v39, %v14074_v40  ;;  %v12142_v44 = vld [vmem:[%s13965_s16 + $0x67c] ss:$36 sps:$4 sm:$0xff]   ;;  %v12160_v56 = vld [vmem:[%s13965_s16 + $0x754] ss:$36 sps:$4 sm:$0xff]  }
  0x50   : > { %3986 = vmatprep.subr.bf16.mxu0 %v12056_v45  ;;  %4158 = vmatprep.subr.bf16.mxu1 %v12058_v46  ;;  %v12145_v45 = vld [vmem:[%s13965_s16 + $0x684] ss:$36 sps:$4 sm:$0xff]   ;;  %v12140_v46 = vld [vmem:[%s13965_s16 + $0x678] ss:$36 sps:$4 sm:$0xff]  }
  0x53   : > { %3987 = vmatpush1.bf16.msra.mxu0 %v12060_v47  ;;  %4159 = vmatpush1.bf16.msra.mxu1 %v12061_v48  ;;  %v12143_v47 = vld [vmem:[%s13965_s16 + $0x680] ss:$36 sps:$4 sm:$0xff]  }
  0x54   : > { %3988 = vmatprep.subr.bf16.mxu0 %v12062_v49  ;;  %4160 = vmatprep.subr.bf16.mxu1 %v12064_v50  ;;  %v12148_v48 = vld [vmem:[%s13965_s16 + $0x6c4] ss:$36 sps:$4 sm:$0xff]   ;;  %v12151_v49 = vld [vmem:[%s13965_s16 + $0x6cc] ss:$36 sps:$4 sm:$0xff]  }
  0x55   : > { %v12146_v50 = vld [vmem:[%s13965_s16 + $0x6c0] ss:$36 sps:$4 sm:$0xff]  }
  0x57   : > { %3989 = vmatpush1.bf16.msra.mxu0 %v12066_v51  ;;  %4161 = vmatpush1.bf16.msra.mxu1 %v12067_v52  ;;  %v12149_v51 = vld [vmem:[%s13965_s16 + $0x6c8] ss:$36 sps:$4 sm:$0xff]  }
  0x58   : > { %3990 = vmatprep.subr.bf16.mxu0 %v12068_v53  ;;  %4162 = vmatprep.subr.bf16.mxu1 %v12070_v54  ;;  %v12154_v52 = vld [vmem:[%s13965_s16 + $0x70c] ss:$36 sps:$4 sm:$0xff]   ;;  %v12157_v53 = vld [vmem:[%s13965_s16 + $0x714] ss:$36 sps:$4 sm:$0xff]  }
  0x59   : > { %v12152_v54 = vld [vmem:[%s13965_s16 + $0x708] ss:$36 sps:$4 sm:$0xff]  }
  0x5b   : > { %3991 = vmatpush1.bf16.msra.mxu0 %v12072_v57  ;;  %4163 = vmatpush1.bf16.msra.mxu1 %v12073_v58  ;;  %v12163_v57 = vld [vmem:[%s13965_s16 + $0x75c] ss:$36 sps:$4 sm:$0xff]   ;;  %v12158_v58 = vld [vmem:[%s13965_s16 + $0x750] ss:$36 sps:$4 sm:$0xff]  }
  0x5c   : > { %3992 = vmatprep.subr.bf16.mxu0 %v12074_v60  ;;  %4164 = vmatprep.subr.bf16.mxu1 %v12076_v61  ;;  %v12161_v60 = vld [vmem:[%s13965_s16 + $0x758] ss:$36 sps:$4 sm:$0xff]  }
  0x5d   : > { %v12166_v61 = vld [vmem:[%s13965_s16 + $0x79c] ss:$36 sps:$4 sm:$0xff]  }
  0x5f   : > { %3993 = vmatpush1.bf16.msra.mxu0 %v12078_v62  ;;  %4165 = vmatpush1.bf16.msra.mxu1 %v12079_v63  ;;  %v12169_v62 = vld [vmem:[%s13965_s16 + $0x7a4] ss:$36 sps:$4 sm:$0xff]   ;;  %v12164_v63 = vld [vmem:[%s13965_s16 + $0x798] ss:$36 sps:$4 sm:$0xff]  }
  0x60   : > { %3994 = vmatprep.subr.bf16.mxu0 %v12080_v0  ;;  %4166 = vmatprep.subr.bf16.mxu1 %v12082_v1  ;;  %v12167_v0 = vld [vmem:[%s13965_s16 + $0x7a0] ss:$36 sps:$4 sm:$0xff]  }
  0x61   : > { %v12172_v1 = vld [vmem:[%s13965_s16 + $0x7e4] ss:$36 sps:$4 sm:$0xff]  }
  0x63   : > { %3995 = vmatpush1.bf16.msra.mxu0 %v12084_v2  ;;  %4167 = vmatpush1.bf16.msra.mxu1 %v12085_v3  ;;  %v12175_v2 = vld [vmem:[%s13965_s16 + $0x7ec] ss:$36 sps:$4 sm:$0xff]   ;;  %v12170_v3 = vld [vmem:[%s13965_s16 + $0x7e0] ss:$36 sps:$4 sm:$0xff]  }
  0x64   : > { %3996 = vmatprep.subr.bf16.mxu0 %v12086_v4  ;;  %4168 = vmatprep.subr.bf16.mxu1 %v12088_v5  ;;  %v12173_v4 = vld [vmem:[%s13965_s16 + $0x7e8] ss:$36 sps:$4 sm:$0xff]  }
  0x65   : > { %v12178_v5 = vld [vmem:[%s13965_s16 + $0x82c] ss:$36 sps:$4 sm:$0xff]  }
  0x67   : > { %3997 = vmatpush1.bf16.msra.mxu0 %v12090_v6  ;;  %4169 = vmatpush1.bf16.msra.mxu1 %v12091_v7  ;;  %v12181_v6 = vld [vmem:[%s13965_s16 + $0x834] ss:$36 sps:$4 sm:$0xff]   ;;  %v12176_v7 = vld [vmem:[%s13965_s16 + $0x828] ss:$36 sps:$4 sm:$0xff]  }
  0x68   : > { %3998 = vmatprep.subr.bf16.mxu0 %v12092_v8  ;;  %4170 = vmatprep.subr.bf16.mxu1 %v12094_v9  ;;  %v12179_v8 = vld [vmem:[%s13965_s16 + $0x830] ss:$36 sps:$4 sm:$0xff]  }
  0x69   : > { %v12184_v9 = vld [vmem:[%s13965_s16 + $0x874] ss:$36 sps:$4 sm:$0xff]  }
  0x6b   : > { %3999 = vmatpush1.bf16.msra.mxu0 %v12096_v10  ;;  %4171 = vmatpush1.bf16.msra.mxu1 %v12097_v11  ;;  %v12187_v10 = vld [vmem:[%s13965_s16 + $0x87c] ss:$36 sps:$4 sm:$0xff]   ;;  %v12182_v11 = vld [vmem:[%s13965_s16 + $0x870] ss:$36 sps:$4 sm:$0xff]  }
  0x6c   : > { %4011 = vmatprep.subr.bf16.mxu0 %v12100_v12  ;;  %4183 = vmatprep.subr.bf16.mxu1 %v12103_v13  ;;  %v12185_v12 = vld [vmem:[%s13965_s16 + $0x878] ss:$36 sps:$4 sm:$0xff]  }
  0x6d   : > { %v12190_v13 = vld [vmem:[%s13965_s16 + $0x8bc] ss:$36 sps:$4 sm:$0xff]  }
  0x6e   : > { %4001 = vmatmul.mubr.bf16.vlgmr.msra.gmra.mrb[0].mxu0 %v14042_v14  ;;  %4173 = vmatmul.mubr.bf16.vlgmr.msra.gmra.mrb[0].mxu1 %v14042_v14 }
  0x6f   : > { %4012 = vmatpush1.bf16.msra.mxu0 %v12098_v15  ;;  %4184 = vmatpush1.bf16.msra.mxu1 %v12101_v16  ;;  %v12193_v15 = vld [vmem:[%s13965_s16 + $0x8c4] ss:$36 sps:$4 sm:$0xff]   ;;  %v12188_v16 = vld [vmem:[%s13965_s16 + $0x8b8] ss:$36 sps:$4 sm:$0xff]  }
  0x70   : > { %4013 = vmatprep.subr.bf16.mxu0 %v12106_v17  ;;  %4185 = vmatprep.subr.bf16.mxu1 %v12109_v18  ;;  %v12191_v17 = vld [vmem:[%s13965_s16 + $0x8c0] ss:$36 sps:$4 sm:$0xff]  }
  0x71   : > { %4043 = vmatprep.mubr.bf16.mxu0 %v14080_v43  ;;  %4215 = vmatprep.mubr.bf16.mxu1 %v14080_v43  ;;  %v12196_v18 = vld [vmem:[%s13965_s16 + $0x904] ss:$36 sps:$4 sm:$0xff]  }
  0x73   : > { %4014 = vmatpush1.bf16.msra.mxu0 %v12104_v19  ;;  %4186 = vmatpush1.bf16.msra.mxu1 %v12107_v20  ;;  %v12199_v19 = vld [vmem:[%s13965_s16 + $0x90c] ss:$36 sps:$4 sm:$0xff]   ;;  %v12194_v20 = vld [vmem:[%s13965_s16 + $0x900] ss:$36 sps:$4 sm:$0xff]  }
  0x74   : > { %4015 = vmatprep.subr.bf16.mxu0 %v12112_v21  ;;  %4187 = vmatprep.subr.bf16.mxu1 %v12115_v22  ;;  %v12197_v21 = vld [vmem:[%s13965_s16 + $0x908] ss:$36 sps:$4 sm:$0xff]   ;;  %v14126_v22 = vcombine.low %v14071_v39, %v14074_v40  ;;  %v12218_v40 = vld [vmem:[%s13965_s16 + $0xa20] ss:$36 sps:$4 sm:$0xff]  }
  0x75   : > { %v12223_v39 = vld [vmem:[%s13965_s16 + $0xa2c] ss:$36 sps:$4 sm:$0xff]  }
  0x77   : > { %4016 = vmatpush1.bf16.msra.mxu0 %v12110_v23  ;;  %4188 = vmatpush1.bf16.msra.mxu1 %v12113_v24  ;;  %v12202_v23 = vld [vmem:[%s13965_s16 + $0x94c] ss:$36 sps:$4 sm:$0xff]   ;;  %v12205_v24 = vld [vmem:[%s13965_s16 + $0x954] ss:$36 sps:$4 sm:$0xff]  }
  0x78   : > { %4017 = vmatprep.subr.bf16.mxu0 %v12118_v25  ;;  %4189 = vmatprep.subr.bf16.mxu1 %v12121_v26  ;;  %v14131_v25 = vld [vmem:[%s13967_s17 + $0x10] sm:$0xff] }
  0x79   : > { %v14134_v26 = vld [vmem:[%s13967_s17 + $0x30] sm:$0xff] }
  0x7b   : > { %4018 = vmatpush1.bf16.msra.mxu0 %v12116_v27  ;;  %4190 = vmatpush1.bf16.msra.mxu1 %v12119_v28  ;;  %v14138_v27 = vcombine.high %v14131_v25, %v14134_v26  ;;  %v12200_v28 = vld [vmem:[%s13965_s16 + $0x948] ss:$36 sps:$4 sm:$0xff]  }
  0x7c   : > { %4019 = vmatprep.subr.bf16.mxu0 %v12124_v29  ;;  %4191 = vmatprep.subr.bf16.mxu1 %v12127_v30  ;;  %v12203_v29 = vld [vmem:[%s13965_s16 + $0x950] ss:$36 sps:$4 sm:$0xff]  }
  0x7d   : > { %v12208_v30 = vld [vmem:[%s13965_s16 + $0x994] ss:$36 sps:$4 sm:$0xff]  }
  0x7f   : > { %4020 = vmatpush1.bf16.msra.mxu0 %v12122_v31  ;;  %4192 = vmatpush1.bf16.msra.mxu1 %v12125_v32  ;;  %v12211_v31 = vld [vmem:[%s13965_s16 + $0x99c] ss:$36 sps:$4 sm:$0xff]   ;;  %v12206_v32 = vld [vmem:[%s13965_s16 + $0x990] ss:$36 sps:$4 sm:$0xff]  }
  0x80   : > { %4021 = vmatprep.subr.bf16.mxu0 %v12130_v33  ;;  %4193 = vmatprep.subr.bf16.mxu1 %v12133_v34  ;;  %v12209_v33 = vld [vmem:[%s13965_s16 + $0x998] ss:$36 sps:$4 sm:$0xff]  }
  0x81   : > { %v12214_v34 = vld [vmem:[%s13965_s16 + $0x9dc] ss:$36 sps:$4 sm:$0xff]  }
  0x83   : > { %4022 = vmatpush1.bf16.msra.mxu0 %v12128_v35  ;;  %4194 = vmatpush1.bf16.msra.mxu1 %v12131_v36  ;;  %v12217_v35 = vld [vmem:[%s13965_s16 + $0x9e4] ss:$36 sps:$4 sm:$0xff]   ;;  %v12212_v36 = vld [vmem:[%s13965_s16 + $0x9d8] ss:$36 sps:$4 sm:$0xff]  }
  0x84   : > { %4023 = vmatprep.subr.bf16.mxu0 %v12136_v37  ;;  %4195 = vmatprep.subr.bf16.mxu1 %v12139_v38  ;;  %v12215_v37 = vld [vmem:[%s13965_s16 + $0x9e0] ss:$36 sps:$4 sm:$0xff]  }
  0x85   : > { %v12220_v38 = vld [vmem:[%s13965_s16 + $0xa24] ss:$36 sps:$4 sm:$0xff]  }
  0x87   : > { %4024 = vmatpush1.bf16.msra.mxu0 %v12134_v41  ;;  %4196 = vmatpush1.bf16.msra.mxu1 %v12137_v42  ;;  %v12221_v41 = vld [vmem:[%s13965_s16 + $0xa28] ss:$36 sps:$4 sm:$0xff]  }
  0x88   : > { %4025 = vmatprep.subr.bf16.mxu0 %v12142_v44  ;;  %4197 = vmatprep.subr.bf16.mxu1 %v12145_v45  ;;  %v12226_v42 = vld [vmem:[%s13965_s16 + $0xa6c] ss:$36 sps:$4 sm:$0xff]   ;;  %v12229_v44 = vld [vmem:[%s13965_s16 + $0xa74] ss:$36 sps:$4 sm:$0xff]  }
  0x89   : > { %v12224_v45 = vld [vmem:[%s13965_s16 + $0xa68] ss:$36 sps:$4 sm:$0xff]  }
  0x8b   : > { %4026 = vmatpush1.bf16.msra.mxu0 %v12140_v46  ;;  %4198 = vmatpush1.bf16.msra.mxu1 %v12143_v47  ;;  %v12227_v46 = vld [vmem:[%s13965_s16 + $0xa70] ss:$36 sps:$4 sm:$0xff]  }
  0x8c   : > { %4027 = vmatprep.subr.bf16.mxu0 %v12148_v48  ;;  %4199 = vmatprep.subr.bf16.mxu1 %v12151_v49  ;;  %v12232_v47 = vld [vmem:[%s13965_s16 + $0xab4] ss:$36 sps:$4 sm:$0xff]   ;;  %v12235_v48 = vld [vmem:[%s13965_s16 + $0xabc] ss:$36 sps:$4 sm:$0xff]  }
  0x8d   : > { %v12230_v49 = vld [vmem:[%s13965_s16 + $0xab0] ss:$36 sps:$4 sm:$0xff]  }
  0x8f   : > { %4028 = vmatpush1.bf16.msra.mxu0 %v12146_v50  ;;  %4200 = vmatpush1.bf16.msra.mxu1 %v12149_v51  ;;  %v12233_v50 = vld [vmem:[%s13965_s16 + $0xab8] ss:$36 sps:$4 sm:$0xff]  }
  0x90   : > { %4029 = vmatprep.subr.bf16.mxu0 %v12154_v52  ;;  %4201 = vmatprep.subr.bf16.mxu1 %v12157_v53  ;;  %v12238_v51 = vld [vmem:[%s13965_s16 + $0xafc] ss:$36 sps:$4 sm:$0xff]   ;;  %v12241_v52 = vld [vmem:[%s13965_s16 + $0xb04] ss:$36 sps:$4 sm:$0xff]  }
  0x91   : > { %v12236_v53 = vld [vmem:[%s13965_s16 + $0xaf8] ss:$36 sps:$4 sm:$0xff]  }
  0x93   : > { %4030 = vmatpush1.bf16.msra.mxu0 %v12152_v54  ;;  %4202 = vmatpush1.bf16.msra.mxu1 %v12155_v55  ;;  %v12239_v54 = vld [vmem:[%s13965_s16 + $0xb00] ss:$36 sps:$4 sm:$0xff]  }
  0x94   : > { %4031 = vmatprep.subr.bf16.mxu0 %v12160_v56  ;;  %4203 = vmatprep.subr.bf16.mxu1 %v12163_v57  ;;  %v12244_v55 = vld [vmem:[%s13965_s16 + $0xb44] ss:$36 sps:$4 sm:$0xff]   ;;  %v12247_v56 = vld [vmem:[%s13965_s16 + $0xb4c] ss:$36 sps:$4 sm:$0xff]  }
  0x95   : > { %v12242_v57 = vld [vmem:[%s13965_s16 + $0xb40] ss:$36 sps:$4 sm:$0xff]  }
  0x97   : > { %4032 = vmatpush1.bf16.msra.mxu0 %v12158_v58  ;;  %4204 = vmatpush1.bf16.msra.mxu1 %v12161_v60  ;;  %v12245_v58 = vld [vmem:[%s13965_s16 + $0xb48] ss:$36 sps:$4 sm:$0xff]  }
  0x98   : > { %4033 = vmatprep.subr.bf16.mxu0 %v12166_v61  ;;  %4205 = vmatprep.subr.bf16.mxu1 %v12169_v62  ;;  %v12250_v60 = vld [vmem:[%s13965_s16 + $0xb8c] ss:$36 sps:$4 sm:$0xff]   ;;  %v12253_v61 = vld [vmem:[%s13965_s16 + $0xb94] ss:$36 sps:$4 sm:$0xff]  }
  0x99   : > { %v12248_v62 = vld [vmem:[%s13965_s16 + $0xb88] ss:$36 sps:$4 sm:$0xff]  }
  0x9b   : > { %4034 = vmatpush1.bf16.msra.mxu0 %v12164_v63  ;;  %4206 = vmatpush1.bf16.msra.mxu1 %v12167_v0  ;;  %v12251_v63 = vld [vmem:[%s13965_s16 + $0xb90] ss:$36 sps:$4 sm:$0xff]  }
  0x9c   : > { %4035 = vmatprep.subr.bf16.mxu0 %v12172_v1  ;;  %4207 = vmatprep.subr.bf16.mxu1 %v12175_v2  ;;  %v12256_v0 = vld [vmem:[%s13965_s16 + $0xbd4] ss:$36 sps:$4 sm:$0xff]   ;;  %v12259_v1 = vld [vmem:[%s13965_s16 + $0xbdc] ss:$36 sps:$4 sm:$0xff]  }
  0x9d   : > { %v12254_v2 = vld [vmem:[%s13965_s16 + $0xbd0] ss:$36 sps:$4 sm:$0xff]  }
  0x9f   : > { %4036 = vmatpush1.bf16.msra.mxu0 %v12170_v3  ;;  %4208 = vmatpush1.bf16.msra.mxu1 %v12173_v4  ;;  %v12257_v3 = vld [vmem:[%s13965_s16 + $0xbd8] ss:$36 sps:$4 sm:$0xff]  }
  0xa0   : > { %4037 = vmatprep.subr.bf16.mxu0 %v12178_v5  ;;  %4209 = vmatprep.subr.bf16.mxu1 %v12181_v6  ;;  %v12262_v4 = vld [vmem:[%s13965_s16 + $0xc1c] ss:$36 sps:$4 sm:$0xff]   ;;  %v12265_v5 = vld [vmem:[%s13965_s16 + $0xc24] ss:$36 sps:$4 sm:$0xff]  }
  0xa1   : > { %v12260_v6 = vld [vmem:[%s13965_s16 + $0xc18] ss:$36 sps:$4 sm:$0xff]  }
  0xa3   : > { %4038 = vmatpush1.bf16.msra.mxu0 %v12176_v7  ;;  %4210 = vmatpush1.bf16.msra.mxu1 %v12179_v8  ;;  %v12263_v7 = vld [vmem:[%s13965_s16 + $0xc20] ss:$36 sps:$4 sm:$0xff]  }
  0xa4   : > { %4039 = vmatprep.subr.bf16.mxu0 %v12184_v9  ;;  %4211 = vmatprep.subr.bf16.mxu1 %v12187_v10  ;;  %v12268_v8 = vld [vmem:[%s13965_s16 + $0xc64] ss:$36 sps:$4 sm:$0xff]   ;;  %v12271_v9 = vld [vmem:[%s13965_s16 + $0xc6c] ss:$36 sps:$4 sm:$0xff]  }
  0xa5   : > { %v12266_v10 = vld [vmem:[%s13965_s16 + $0xc60] ss:$36 sps:$4 sm:$0xff]  }
  0xa7   : > { %4040 = vmatpush1.bf16.msra.mxu0 %v12182_v11  ;;  %4212 = vmatpush1.bf16.msra.mxu1 %v12185_v12  ;;  %v12269_v11 = vld [vmem:[%s13965_s16 + $0xc68] ss:$36 sps:$4 sm:$0xff]  }
  0xa8   : > { %4041 = vmatprep.subr.bf16.mxu0 %v12190_v13  ;;  %4213 = vmatprep.subr.bf16.mxu1 %v12193_v15  ;;  %v12274_v12 = vld [vmem:[%s13965_s16 + $0xcac] ss:$36 sps:$4 sm:$0xff]   ;;  %v12277_v13 = vld [vmem:[%s13965_s16 + $0xcb4] ss:$36 sps:$4 sm:$0xff]  }
  0xa9   : > { %v12272_v15 = vld [vmem:[%s13965_s16 + $0xca8] ss:$36 sps:$4 sm:$0xff]  }
  0xab   : > { %4042 = vmatpush1.bf16.msra.mxu0 %v12188_v16  ;;  %4214 = vmatpush1.bf16.msra.mxu1 %v12191_v17  ;;  %v12275_v16 = vld [vmem:[%s13965_s16 + $0xcb0] ss:$36 sps:$4 sm:$0xff]  }
  0xac   : > { %4054 = vmatprep.subr.bf16.mxu0 %v12196_v18  ;;  %4226 = vmatprep.subr.bf16.mxu1 %v12199_v19  ;;  %v12280_v17 = vld [vmem:[%s13965_s16 + $0xcf4] ss:$36 sps:$4 sm:$0xff]   ;;  %v12283_v18 = vld [vmem:[%s13965_s16 + $0xcfc] ss:$36 sps:$4 sm:$0xff]  }
  0xad   : > { %v12278_v19 = vld [vmem:[%s13965_s16 + $0xcf0] ss:$36 sps:$4 sm:$0xff]  }
  0xae   : > { %4044 = vmatmul.mubr.bf16.vlgmr.msra.gmra.mrb[0].mxu0 %v14126_v22  ;;  %4216 = vmatmul.mubr.bf16.vlgmr.msra.gmra.mrb[0].mxu1 %v14126_v22 }
  0xaf   : > { %4055 = vmatpush1.bf16.msra.mxu0 %v12194_v20  ;;  %4227 = vmatpush1.bf16.msra.mxu1 %v12197_v21  ;;  %v12281_v20 = vld [vmem:[%s13965_s16 + $0xcf8] ss:$36 sps:$4 sm:$0xff]  }
  0xb0   : > { %4056 = vmatprep.subr.bf16.mxu0 %v12202_v23  ;;  %4228 = vmatprep.subr.bf16.mxu1 %v12205_v24  ;;  %v12286_v21 = vld [vmem:[%s13965_s16 + $0xd3c] ss:$36 sps:$4 sm:$0xff]   ;;  %v12289_v23 = vld [vmem:[%s13965_s16 + $0xd44] ss:$36 sps:$4 sm:$0xff]  }
  0xb1   : > { %4086 = vmatprep.mubr.bf16.mxu0 %v14138_v27  ;;  %4258 = vmatprep.mubr.bf16.mxu1 %v14138_v27  ;;  %v12284_v24 = vld [vmem:[%s13965_s16 + $0xd38] ss:$36 sps:$4 sm:$0xff]  }
  0xb3   : > { %4057 = vmatpush1.bf16.msra.mxu0 %v12200_v28  ;;  %4229 = vmatpush1.bf16.msra.mxu1 %v12203_v29  ;;  %v12287_v28 = vld [vmem:[%s13965_s16 + $0xd40] ss:$36 sps:$4 sm:$0xff]  }
  0xb4   : > { %4058 = vmatprep.subr.bf16.mxu0 %v12208_v30  ;;  %4230 = vmatprep.subr.bf16.mxu1 %v12211_v31  ;;  %v12292_v29 = vld [vmem:[%s13965_s16 + $0xd84] ss:$36 sps:$4 sm:$0xff]   ;;  %v12295_v30 = vld [vmem:[%s13965_s16 + $0xd8c] ss:$36 sps:$4 sm:$0xff]  }
  0xb5   : > { %v12290_v31 = vld [vmem:[%s13965_s16 + $0xd80] ss:$36 sps:$4 sm:$0xff]  }
  0xb7   : > { %4059 = vmatpush1.bf16.msra.mxu0 %v12206_v32  ;;  %4231 = vmatpush1.bf16.msra.mxu1 %v12209_v33  ;;  %v12293_v32 = vld [vmem:[%s13965_s16 + $0xd88] ss:$36 sps:$4 sm:$0xff]   ;;  %v14208_v33 = vcombine.low %v14131_v25, %v14134_v26  ;;  %v12299_v26 = vld [vmem:[%s13965_s16 + $0xdd0] ss:$36 sps:$4 sm:$0xff]  }
  0xb8   : > { %4060 = vmatprep.subr.bf16.mxu0 %v12214_v34  ;;  %4232 = vmatprep.subr.bf16.mxu1 %v12217_v35  ;;  %v14211_v34 = vld [vmem:[%s13967_s17 + $0x18] sm:$0xff] }
  0xb9   : > { %v14214_v35 = vld [vmem:[%s13967_s17 + $0x38] sm:$0xff] }
  0xba   : > { %v12296_v25 = vld [vmem:[%s13965_s16 + $0xdc8] ss:$36 sps:$4 sm:$0xff]  }
  0xbb   : > { %4061 = vmatpush1.bf16.msra.mxu0 %v12212_v36  ;;  %4233 = vmatpush1.bf16.msra.mxu1 %v12215_v37  ;;  %v12298_v36 = vld [vmem:[%s13965_s16 + $0xdcc] ss:$36 sps:$4 sm:$0xff]   ;;  %v12301_v37 = vld [vmem:[%s13965_s16 + $0xdd4] ss:$36 sps:$4 sm:$0xff]  }
  0xbc   : > { %4062 = vmatprep.subr.bf16.mxu0 %v12220_v38  ;;  %4234 = vmatprep.subr.bf16.mxu1 %v12223_v39  ;;  %v14220_v38 = vcombine.high %v14211_v34, %v14214_v35  ;;  %v12304_v39 = vld [vmem:[%s13965_s16 + $0xe14] ss:$36 sps:$4 sm:$0xff]  }
  0xbf   : > { %4063 = vmatpush1.bf16.msra.mxu0 %v12218_v40  ;;  %4235 = vmatpush1.bf16.msra.mxu1 %v12221_v41  ;;  %v12307_v40 = vld [vmem:[%s13965_s16 + $0xe1c] ss:$36 sps:$4 sm:$0xff]   ;;  %v12302_v41 = vld [vmem:[%s13965_s16 + $0xe10] ss:$36 sps:$4 sm:$0xff]  }
  0xc0   : > { %4064 = vmatprep.subr.bf16.mxu0 %v12226_v42  ;;  %4236 = vmatprep.subr.bf16.mxu1 %v12229_v44  ;;  %v12305_v42 = vld [vmem:[%s13965_s16 + $0xe18] ss:$36 sps:$4 sm:$0xff]  }
  0xc1   : > { %v12310_v44 = vld [vmem:[%s13965_s16 + $0xe5c] ss:$36 sps:$4 sm:$0xff]  }
  0xc3   : > { %4065 = vmatpush1.bf16.msra.mxu0 %v12224_v45  ;;  %4237 = vmatpush1.bf16.msra.mxu1 %v12227_v46  ;;  %v12313_v45 = vld [vmem:[%s13965_s16 + $0xe64] ss:$36 sps:$4 sm:$0xff]   ;;  %v12308_v46 = vld [vmem:[%s13965_s16 + $0xe58] ss:$36 sps:$4 sm:$0xff]  }
  0xc4   : > { %4066 = vmatprep.subr.bf16.mxu0 %v12232_v47  ;;  %4238 = vmatprep.subr.bf16.mxu1 %v12235_v48  ;;  %v12311_v47 = vld [vmem:[%s13965_s16 + $0xe60] ss:$36 sps:$4 sm:$0xff]  }
  0xc5   : > { %v12316_v48 = vld [vmem:[%s13965_s16 + $0xea4] ss:$36 sps:$4 sm:$0xff]  }
  0xc7   : > { %4067 = vmatpush1.bf16.msra.mxu0 %v12230_v49  ;;  %4239 = vmatpush1.bf16.msra.mxu1 %v12233_v50  ;;  %v12319_v49 = vld [vmem:[%s13965_s16 + $0xeac] ss:$36 sps:$4 sm:$0xff]   ;;  %v12314_v50 = vld [vmem:[%s13965_s16 + $0xea0] ss:$36 sps:$4 sm:$0xff]  }
  0xc8   : > { %4068 = vmatprep.subr.bf16.mxu0 %v12238_v51  ;;  %4240 = vmatprep.subr.bf16.mxu1 %v12241_v52  ;;  %v12317_v51 = vld [vmem:[%s13965_s16 + $0xea8] ss:$36 sps:$4 sm:$0xff]  }
  0xc9   : > { %v12322_v52 = vld [vmem:[%s13965_s16 + $0xeec] ss:$36 sps:$4 sm:$0xff]  }
  0xcb   : > { %4069 = vmatpush1.bf16.msra.mxu0 %v12236_v53  ;;  %4241 = vmatpush1.bf16.msra.mxu1 %v12239_v54  ;;  %v12325_v53 = vld [vmem:[%s13965_s16 + $0xef4] ss:$36 sps:$4 sm:$0xff]   ;;  %v12320_v54 = vld [vmem:[%s13965_s16 + $0xee8] ss:$36 sps:$4 sm:$0xff]  }
  0xcc   : > { %4070 = vmatprep.subr.bf16.mxu0 %v12244_v55  ;;  %4242 = vmatprep.subr.bf16.mxu1 %v12247_v56  ;;  %v12323_v55 = vld [vmem:[%s13965_s16 + $0xef0] ss:$36 sps:$4 sm:$0xff]  }
  0xcd   : > { %v12328_v56 = vld [vmem:[%s13965_s16 + $0xf34] ss:$36 sps:$4 sm:$0xff]  }
  0xcf   : > { %4071 = vmatpush1.bf16.msra.mxu0 %v12242_v57  ;;  %4243 = vmatpush1.bf16.msra.mxu1 %v12245_v58  ;;  %v12331_v57 = vld [vmem:[%s13965_s16 + $0xf3c] ss:$36 sps:$4 sm:$0xff]   ;;  %v12326_v58 = vld [vmem:[%s13965_s16 + $0xf30] ss:$36 sps:$4 sm:$0xff]  }
  0xd0   : > { %4072 = vmatprep.subr.bf16.mxu0 %v12250_v60  ;;  %4244 = vmatprep.subr.bf16.mxu1 %v12253_v61  ;;  %v12329_v60 = vld [vmem:[%s13965_s16 + $0xf38] ss:$36 sps:$4 sm:$0xff]  }
  0xd1   : > { %v12334_v61 = vld [vmem:[%s13965_s16 + $0xf7c] ss:$36 sps:$4 sm:$0xff]  }
  0xd3   : > { %4073 = vmatpush1.bf16.msra.mxu0 %v12248_v62  ;;  %4245 = vmatpush1.bf16.msra.mxu1 %v12251_v63  ;;  %v12337_v62 = vld [vmem:[%s13965_s16 + $0xf84] ss:$36 sps:$4 sm:$0xff]   ;;  %v12332_v63 = vld [vmem:[%s13965_s16 + $0xf78] ss:$36 sps:$4 sm:$0xff]  }
  0xd4   : > { %4074 = vmatprep.subr.bf16.mxu0 %v12256_v0  ;;  %4246 = vmatprep.subr.bf16.mxu1 %v12259_v1  ;;  %v12335_v0 = vld [vmem:[%s13965_s16 + $0xf80] ss:$36 sps:$4 sm:$0xff]  }
  0xd5   : > { %v12340_v1 = vld [vmem:[%s13965_s16 + $0xfc4] ss:$36 sps:$4 sm:$0xff]  }
  0xd7   : > { %4075 = vmatpush1.bf16.msra.mxu0 %v12254_v2  ;;  %4247 = vmatpush1.bf16.msra.mxu1 %v12257_v3  ;;  %v12343_v2 = vld [vmem:[%s13965_s16 + $0xfcc] ss:$36 sps:$4 sm:$0xff]   ;;  %v12338_v3 = vld [vmem:[%s13965_s16 + $0xfc0] ss:$36 sps:$4 sm:$0xff]  }
  0xd8   : > { %4076 = vmatprep.subr.bf16.mxu0 %v12262_v4  ;;  %4248 = vmatprep.subr.bf16.mxu1 %v12265_v5  ;;  %v12341_v4 = vld [vmem:[%s13965_s16 + $0xfc8] ss:$36 sps:$4 sm:$0xff]  }
  0xd9   : > { %v12346_v5 = vld [vmem:[%s13965_s16 + $0x100c] ss:$36 sps:$4 sm:$0xff]  }
  0xdb   : > { %4077 = vmatpush1.bf16.msra.mxu0 %v12260_v6  ;;  %4249 = vmatpush1.bf16.msra.mxu1 %v12263_v7  ;;  %v12349_v6 = vld [vmem:[%s13965_s16 + $0x1014] ss:$36 sps:$4 sm:$0xff]   ;;  %v12344_v7 = vld [vmem:[%s13965_s16 + $0x1008] ss:$36 sps:$4 sm:$0xff]  }
  0xdc   : > { %4078 = vmatprep.subr.bf16.mxu0 %v12268_v8  ;;  %4250 = vmatprep.subr.bf16.mxu1 %v12271_v9  ;;  %v12347_v8 = vld [vmem:[%s13965_s16 + $0x1010] ss:$36 sps:$4 sm:$0xff]  }
  0xdd   : > { %v12352_v9 = vld [vmem:[%s13965_s16 + $0x1054] ss:$36 sps:$4 sm:$0xff]  }
  0xdf   : > { %4079 = vmatpush1.bf16.msra.mxu0 %v12266_v10  ;;  %4251 = vmatpush1.bf16.msra.mxu1 %v12269_v11  ;;  %v12355_v10 = vld [vmem:[%s13965_s16 + $0x105c] ss:$36 sps:$4 sm:$0xff]   ;;  %v12350_v11 = vld [vmem:[%s13965_s16 + $0x1050] ss:$36 sps:$4 sm:$0xff]  }
  0xe0   : > { %4080 = vmatprep.subr.bf16.mxu0 %v12274_v12  ;;  %4252 = vmatprep.subr.bf16.mxu1 %v12277_v13  ;;  %v12353_v12 = vld [vmem:[%s13965_s16 + $0x1058] ss:$36 sps:$4 sm:$0xff]  }
  0xe1   : > { %v12358_v13 = vld [vmem:[%s13965_s16 + $0x109c] ss:$36 sps:$4 sm:$0xff]  }
  0xe3   : > { %4081 = vmatpush1.bf16.msra.mxu0 %v12272_v15  ;;  %4253 = vmatpush1.bf16.msra.mxu1 %v12275_v16  ;;  %v12361_v15 = vld [vmem:[%s13965_s16 + $0x10a4] ss:$36 sps:$4 sm:$0xff]   ;;  %v12356_v16 = vld [vmem:[%s13965_s16 + $0x1098] ss:$36 sps:$4 sm:$0xff]  }
  0xe4   : > { %4082 = vmatprep.subr.bf16.mxu0 %v12280_v17  ;;  %4254 = vmatprep.subr.bf16.mxu1 %v12283_v18  ;;  %v12359_v17 = vld [vmem:[%s13965_s16 + $0x10a0] ss:$36 sps:$4 sm:$0xff]  }
  0xe5   : > { %v12364_v18 = vld [vmem:[%s13965_s16 + $0x10e4] ss:$36 sps:$4 sm:$0xff]  }
  0xe7   : > { %4083 = vmatpush1.bf16.msra.mxu0 %v12278_v19  ;;  %4255 = vmatpush1.bf16.msra.mxu1 %v12281_v20  ;;  %v12367_v19 = vld [vmem:[%s13965_s16 + $0x10ec] ss:$36 sps:$4 sm:$0xff]   ;;  %v12362_v20 = vld [vmem:[%s13965_s16 + $0x10e0] ss:$36 sps:$4 sm:$0xff]  }
  0xe8   : > { %4084 = vmatprep.subr.bf16.mxu0 %v12286_v21  ;;  %4256 = vmatprep.subr.bf16.mxu1 %v12289_v23  ;;  %v12365_v21 = vld [vmem:[%s13965_s16 + $0x10e8] ss:$36 sps:$4 sm:$0xff]  }
  0xe9   : > { %v12370_v23 = vld [vmem:[%s13965_s16 + $0x112c] ss:$36 sps:$4 sm:$0xff]  }
  0xeb   : > { %4085 = vmatpush1.bf16.msra.mxu0 %v12284_v24  ;;  %4257 = vmatpush1.bf16.msra.mxu1 %v12287_v28  ;;  %v12373_v24 = vld [vmem:[%s13965_s16 + $0x1134] ss:$36 sps:$4 sm:$0xff]   ;;  %v12368_v28 = vld [vmem:[%s13965_s16 + $0x1128] ss:$36 sps:$4 sm:$0xff]  }
  0xec   : > { %4097 = vmatprep.subr.bf16.mxu0 %v12292_v29  ;;  %4269 = vmatprep.subr.bf16.mxu1 %v12295_v30  ;;  %v12371_v29 = vld [vmem:[%s13965_s16 + $0x1130] ss:$36 sps:$4 sm:$0xff]  }
  0xed   : > { %v12376_v30 = vld [vmem:[%s13965_s16 + $0x1174] ss:$36 sps:$4 sm:$0xff]  }
  0xee   : > { %4087 = vmatmul.mubr.bf16.vlgmr.msra.gmra.mrb[0].mxu0 %v14208_v33  ;;  %4259 = vmatmul.mubr.bf16.vlgmr.msra.gmra.mrb[0].mxu1 %v14208_v33 }
  0xef   : > { %4098 = vmatpush1.bf16.msra.mxu0 %v12290_v31  ;;  %4270 = vmatpush1.bf16.msra.mxu1 %v12293_v32  ;;  %v12379_v31 = vld [vmem:[%s13965_s16 + $0x117c] ss:$36 sps:$4 sm:$0xff]   ;;  %v12374_v32 = vld [vmem:[%s13965_s16 + $0x1170] ss:$36 sps:$4 sm:$0xff]  }
  0xf0   : > { %4099 = vmatprep.subr.bf16.mxu0 %v12298_v36  ;;  %4271 = vmatprep.subr.bf16.mxu1 %v12301_v37  ;;  %v12377_v36 = vld [vmem:[%s13965_s16 + $0x1178] ss:$36 sps:$4 sm:$0xff]  }
  0xf1   : > { %4129 = vmatprep.mubr.bf16.mxu0 %v14220_v38  ;;  %4301 = vmatprep.mubr.bf16.mxu1 %v14220_v38  ;;  %v12382_v37 = vld [vmem:[%s13965_s16 + $0x11bc] ss:$36 sps:$4 sm:$0xff]  }
  0xf3   : > { %4100 = vmatpush1.bf16.msra.mxu0 %v12296_v25  ;;  %4272 = vmatpush1.bf16.msra.mxu1 %v12299_v26  ;;  %v12385_v25 = vld [vmem:[%s13965_s16 + $0x11c4] ss:$36 sps:$4 sm:$0xff]   ;;  %v12380_v26 = vld [vmem:[%s13965_s16 + $0x11b8] ss:$36 sps:$4 sm:$0xff]  }
  0xf4   : > { %4101 = vmatprep.subr.bf16.mxu0 %v12304_v39  ;;  %4273 = vmatprep.subr.bf16.mxu1 %v12307_v40  ;;  %v12383_v39 = vld [vmem:[%s13965_s16 + $0x11c0] ss:$36 sps:$4 sm:$0xff]   ;;  %v12388_v40 = vld [vmem:[%s13965_s16 + $0x14] ss:$36 sps:$4 sm:$0xff]  }
  0xf7   : > { %4102 = vmatpush1.bf16.msra.mxu0 %v12302_v41  ;;  %4274 = vmatpush1.bf16.msra.mxu1 %v12305_v42  ;;  %v12391_v41 = vld [vmem:[%s13965_s16 + $0x1c] ss:$36 sps:$4 sm:$0xff]   ;;  %v14288_v42 = vcombine.low %v14211_v34, %v14214_v35  ;;  %v12400_v34 = vld [vmem:[%s13965_s16 + $0xa4] ss:$36 sps:$4 sm:$0xff]   ;;  %v12403_v35 = vld [vmem:[%s13965_s16 + $0xac] ss:$36 sps:$4 sm:$0xff]  }
  0xf8   : > { %4103 = vmatprep.subr.bf16.mxu0 %v12310_v44  ;;  %4275 = vmatprep.subr.bf16.mxu1 %v12313_v45  ;;  %v12386_v44 = vld [vmem:[%s13965_s16 + $0x10] ss:$36 sps:$4 sm:$0xff]   ;;  %v12389_v45 = vld [vmem:[%s13965_s16 + $0x18] ss:$36 sps:$4 sm:$0xff]  }
  0xfb   : > { %4104 = vmatpush1.bf16.msra.mxu0 %v12308_v46  ;;  %4276 = vmatpush1.bf16.msra.mxu1 %v12311_v47  ;;  %v12394_v46 = vld [vmem:[%s13965_s16 + $0x5c] ss:$36 sps:$4 sm:$0xff]   ;;  %v12397_v47 = vld [vmem:[%s13965_s16 + $0x64] ss:$36 sps:$4 sm:$0xff]  }
  0xfc   : > { %4105 = vmatprep.subr.bf16.mxu0 %v12316_v48  ;;  %4277 = vmatprep.subr.bf16.mxu1 %v12319_v49  ;;  %v12392_v48 = vld [vmem:[%s13965_s16 + $0x58] ss:$36 sps:$4 sm:$0xff]   ;;  %v12395_v49 = vld [vmem:[%s13965_s16 + $0x60] ss:$36 sps:$4 sm:$0xff]  }
  0xff   : > { %4106 = vmatpush1.bf16.msra.mxu0 %v12314_v50  ;;  %4278 = vmatpush1.bf16.msra.mxu1 %v12317_v51  ;;  %v12398_v50 = vld [vmem:[%s13965_s16 + $0xa0] ss:$36 sps:$4 sm:$0xff]   ;;  %v12401_v51 = vld [vmem:[%s13965_s16 + $0xa8] ss:$36 sps:$4 sm:$0xff]  }
 0x100   : > { %4107 = vmatprep.subr.bf16.mxu0 %v12322_v52  ;;  %4279 = vmatprep.subr.bf16.mxu1 %v12325_v53  ;;  %v12406_v52 = vld [vmem:[%s13965_s16 + $0xec] ss:$36 sps:$4 sm:$0xff]   ;;  %v12409_v53 = vld [vmem:[%s13965_s16 + $0xf4] ss:$36 sps:$4 sm:$0xff]  }
 0x103   : > { %4108 = vmatpush1.bf16.msra.mxu0 %v12320_v54  ;;  %4280 = vmatpush1.bf16.msra.mxu1 %v12323_v55  ;;  %v12404_v54 = vld [vmem:[%s13965_s16 + $0xe8] ss:$36 sps:$4 sm:$0xff]   ;;  %v12407_v55 = vld [vmem:[%s13965_s16 + $0xf0] ss:$36 sps:$4 sm:$0xff]  }
 0x104   : > { %4109 = vmatprep.subr.bf16.mxu0 %v12328_v56  ;;  %4281 = vmatprep.subr.bf16.mxu1 %v12331_v57  ;;  %v12412_v56 = vld [vmem:[%s13965_s16 + $0x134] ss:$36 sps:$4 sm:$0xff]   ;;  %v12415_v57 = vld [vmem:[%s13965_s16 + $0x13c] ss:$36 sps:$4 sm:$0xff]  }
 0x107   : > { %4110 = vmatpush1.bf16.msra.mxu0 %v12326_v58  ;;  %4282 = vmatpush1.bf16.msra.mxu1 %v12329_v60  ;;  %v12410_v58 = vld [vmem:[%s13965_s16 + $0x130] ss:$36 sps:$4 sm:$0xff]   ;;  %v12413_v60 = vld [vmem:[%s13965_s16 + $0x138] ss:$36 sps:$4 sm:$0xff]  }
 0x108   : > { %4111 = vmatprep.subr.bf16.mxu0 %v12334_v61  ;;  %4283 = vmatprep.subr.bf16.mxu1 %v12337_v62  ;;  %v12418_v61 = vld [vmem:[%s13965_s16 + $0x17c] ss:$36 sps:$4 sm:$0xff]   ;;  %v12421_v62 = vld [vmem:[%s13965_s16 + $0x184] ss:$36 sps:$4 sm:$0xff]  }
 0x10b   : > { %4112 = vmatpush1.bf16.msra.mxu0 %v12332_v63  ;;  %4284 = vmatpush1.bf16.msra.mxu1 %v12335_v0  ;;  %v12416_v63 = vld [vmem:[%s13965_s16 + $0x178] ss:$36 sps:$4 sm:$0xff]   ;;  %v12419_v0 = vld [vmem:[%s13965_s16 + $0x180] ss:$36 sps:$4 sm:$0xff]  }
 0x10c   : > { %4113 = vmatprep.subr.bf16.mxu0 %v12340_v1  ;;  %4285 = vmatprep.subr.bf16.mxu1 %v12343_v2  ;;  %v12424_v1 = vld [vmem:[%s13965_s16 + $0x1c4] ss:$36 sps:$4 sm:$0xff]   ;;  %v12427_v2 = vld [vmem:[%s13965_s16 + $0x1cc] ss:$36 sps:$4 sm:$0xff]  }
 0x10f   : > { %4114 = vmatpush1.bf16.msra.mxu0 %v12338_v3  ;;  %4286 = vmatpush1.bf16.msra.mxu1 %v12341_v4  ;;  %v12422_v3 = vld [vmem:[%s13965_s16 + $0x1c0] ss:$36 sps:$4 sm:$0xff]   ;;  %v12425_v4 = vld [vmem:[%s13965_s16 + $0x1c8] ss:$36 sps:$4 sm:$0xff]  }
 0x110   : > { %4115 = vmatprep.subr.bf16.mxu0 %v12346_v5  ;;  %4287 = vmatprep.subr.bf16.mxu1 %v12349_v6  ;;  %v12430_v5 = vld [vmem:[%s13965_s16 + $0x20c] ss:$36 sps:$4 sm:$0xff]   ;;  %v12433_v6 = vld [vmem:[%s13965_s16 + $0x214] ss:$36 sps:$4 sm:$0xff]  }
 0x113   : > { %4116 = vmatpush1.bf16.msra.mxu0 %v12344_v7  ;;  %4288 = vmatpush1.bf16.msra.mxu1 %v12347_v8  ;;  %v12428_v7 = vld [vmem:[%s13965_s16 + $0x208] ss:$36 sps:$4 sm:$0xff]   ;;  %v12431_v8 = vld [vmem:[%s13965_s16 + $0x210] ss:$36 sps:$4 sm:$0xff]  }
 0x114   : > { %4117 = vmatprep.subr.bf16.mxu0 %v12352_v9  ;;  %4289 = vmatprep.subr.bf16.mxu1 %v12355_v10  ;;  %v12436_v9 = vld [vmem:[%s13965_s16 + $0x254] ss:$36 sps:$4 sm:$0xff]   ;;  %v12439_v10 = vld [vmem:[%s13965_s16 + $0x25c] ss:$36 sps:$4 sm:$0xff]  }
 0x117   : > { %4118 = vmatpush1.bf16.msra.mxu0 %v12350_v11  ;;  %4290 = vmatpush1.bf16.msra.mxu1 %v12353_v12  ;;  %v12434_v11 = vld [vmem:[%s13965_s16 + $0x250] ss:$36 sps:$4 sm:$0xff]   ;;  %v12437_v12 = vld [vmem:[%s13965_s16 + $0x258] ss:$36 sps:$4 sm:$0xff]  }
 0x118   : > { %4119 = vmatprep.subr.bf16.mxu0 %v12358_v13  ;;  %4291 = vmatprep.subr.bf16.mxu1 %v12361_v15  ;;  %v12442_v13 = vld [vmem:[%s13965_s16 + $0x29c] ss:$36 sps:$4 sm:$0xff]   ;;  %v12445_v15 = vld [vmem:[%s13965_s16 + $0x2a4] ss:$36 sps:$4 sm:$0xff]  }
 0x11b   : > { %4120 = vmatpush1.bf16.msra.mxu0 %v12356_v16  ;;  %4292 = vmatpush1.bf16.msra.mxu1 %v12359_v17  ;;  %v12440_v16 = vld [vmem:[%s13965_s16 + $0x298] ss:$36 sps:$4 sm:$0xff]   ;;  %v12443_v17 = vld [vmem:[%s13965_s16 + $0x2a0] ss:$36 sps:$4 sm:$0xff]  }
 0x11c   : > { %4121 = vmatprep.subr.bf16.mxu0 %v12364_v18  ;;  %4293 = vmatprep.subr.bf16.mxu1 %v12367_v19  ;;  %v12448_v18 = vld [vmem:[%s13965_s16 + $0x2e4] ss:$36 sps:$4 sm:$0xff]   ;;  %v12451_v19 = vld [vmem:[%s13965_s16 + $0x2ec] ss:$36 sps:$4 sm:$0xff]  }
 0x11f   : > { %4122 = vmatpush1.bf16.msra.mxu0 %v12362_v20  ;;  %4294 = vmatpush1.bf16.msra.mxu1 %v12365_v21  ;;  %v12446_v20 = vld [vmem:[%s13965_s16 + $0x2e0] ss:$36 sps:$4 sm:$0xff]   ;;  %v12449_v21 = vld [vmem:[%s13965_s16 + $0x2e8] ss:$36 sps:$4 sm:$0xff]  }
 0x120   : > { %4123 = vmatprep.subr.bf16.mxu0 %v12370_v23  ;;  %4295 = vmatprep.subr.bf16.mxu1 %v12373_v24  ;;  %v12454_v23 = vld [vmem:[%s13965_s16 + $0x32c] ss:$36 sps:$4 sm:$0xff]   ;;  %v12457_v24 = vld [vmem:[%s13965_s16 + $0x334] ss:$36 sps:$4 sm:$0xff]  }
 0x123   : > { %4124 = vmatpush1.bf16.msra.mxu0 %v12368_v28  ;;  %4296 = vmatpush1.bf16.msra.mxu1 %v12371_v29  ;;  %v12452_v28 = vld [vmem:[%s13965_s16 + $0x328] ss:$36 sps:$4 sm:$0xff]   ;;  %v12455_v29 = vld [vmem:[%s13965_s16 + $0x330] ss:$36 sps:$4 sm:$0xff]  }
 0x124   : > { %4125 = vmatprep.subr.bf16.mxu0 %v12376_v30  ;;  %4297 = vmatprep.subr.bf16.mxu1 %v12379_v31  ;;  %v12460_v30 = vld [vmem:[%s13965_s16 + $0x374] ss:$36 sps:$4 sm:$0xff]   ;;  %v12463_v31 = vld [vmem:[%s13965_s16 + $0x37c] ss:$36 sps:$4 sm:$0xff]  }
 0x127   : > { %4126 = vmatpush1.bf16.msra.mxu0 %v12374_v32  ;;  %4298 = vmatpush1.bf16.msra.mxu1 %v12377_v36  ;;  %v12458_v32 = vld [vmem:[%s13965_s16 + $0x370] ss:$36 sps:$4 sm:$0xff]   ;;  %v12461_v36 = vld [vmem:[%s13965_s16 + $0x378] ss:$36 sps:$4 sm:$0xff]  }
 0x128   : > { %4127 = vmatprep.subr.bf16.mxu0 %v12382_v37  ;;  %4299 = vmatprep.subr.bf16.mxu1 %v12385_v25  ;;  %v12466_v37 = vld [vmem:[%s13965_s16 + $0x3bc] ss:$36 sps:$4 sm:$0xff]   ;;  %v12469_v25 = vld [vmem:[%s13965_s16 + $0x3c4] ss:$36 sps:$4 sm:$0xff]  }
 0x12b   : > { %4128 = vmatpush1.bf16.msra.mxu0 %v12380_v26  ;;  %4300 = vmatpush1.bf16.msra.mxu1 %v12383_v39  ;;  %v12464_v26 = vld [vmem:[%s13965_s16 + $0x3b8] ss:$36 sps:$4 sm:$0xff]   ;;  %v12467_v39 = vld [vmem:[%s13965_s16 + $0x3c0] ss:$36 sps:$4 sm:$0xff]  }
 0x12c   : > { %4312 = vmatprep.subr.bf16.mxu0 %v12388_v40  ;;  %4484 = vmatprep.subr.bf16.mxu1 %v12391_v41  ;;  %v12472_v40 = vld [vmem:[%s13965_s16 + $0x404] ss:$36 sps:$4 sm:$0xff]   ;;  %v12475_v41 = vld [vmem:[%s13965_s16 + $0x40c] ss:$36 sps:$4 sm:$0xff]  }
 0x12e   : > { %4130 = vmatmul.mubr.bf16.vlgmr.msra.gmra.mrb[0].mxu0 %v14288_v42  ;;  %4302 = vmatmul.mubr.bf16.vlgmr.msra.gmra.mrb[0].mxu1 %v14288_v42 }
 0x12f   : > { %4313 = vmatpush1.bf16.msra.mxu0 %v12386_v44  ;;  %4485 = vmatpush1.bf16.msra.mxu1 %v12389_v45  ;;  %v12470_v44 = vld [vmem:[%s13965_s16 + $0x400] ss:$36 sps:$4 sm:$0xff]   ;;  %v12473_v45 = vld [vmem:[%s13965_s16 + $0x408] ss:$36 sps:$4 sm:$0xff]  }
 0x130   : > { %4314 = vmatprep.subr.bf16.mxu0 %v12394_v46  ;;  %4486 = vmatprep.subr.bf16.mxu1 %v12397_v47  ;;  %v12478_v46 = vld [vmem:[%s13965_s16 + $0x44c] ss:$36 sps:$4 sm:$0xff]   ;;  %v12481_v47 = vld [vmem:[%s13965_s16 + $0x454] ss:$36 sps:$4 sm:$0xff]  }
 0x131   : > { %4344 = vmatprep.mubr.bf16.mxu0 %v14020_v59  ;;  %4516 = vmatprep.mubr.bf16.mxu1 %v14020_v59 }
 0x133   : > { %4315 = vmatpush1.bf16.msra.mxu0 %v12392_v48  ;;  %4487 = vmatpush1.bf16.msra.mxu1 %v12395_v49  ;;  %v12476_v48 = vld [vmem:[%s13965_s16 + $0x448] ss:$36 sps:$4 sm:$0xff]   ;;  %v12479_v49 = vld [vmem:[%s13965_s16 + $0x450] ss:$36 sps:$4 sm:$0xff]  }
 0x134   : > { %4316 = vmatprep.subr.bf16.mxu0 %v12400_v34  ;;  %4488 = vmatprep.subr.bf16.mxu1 %v12403_v35  ;;  %v12484_v34 = vld [vmem:[%s13965_s16 + $0x494] ss:$36 sps:$4 sm:$0xff]   ;;  %v12487_v35 = vld [vmem:[%s13965_s16 + $0x49c] ss:$36 sps:$4 sm:$0xff]  }
 0x137   : > { %4317 = vmatpush1.bf16.msra.mxu0 %v12398_v50  ;;  %4489 = vmatpush1.bf16.msra.mxu1 %v12401_v51  ;;  %v12482_v50 = vld [vmem:[%s13965_s16 + $0x490] ss:$36 sps:$4 sm:$0xff]   ;;  %v12485_v51 = vld [vmem:[%s13965_s16 + $0x498] ss:$36 sps:$4 sm:$0xff]  }
 0x138   : > { %4318 = vmatprep.subr.bf16.mxu0 %v12406_v52  ;;  %4490 = vmatprep.subr.bf16.mxu1 %v12409_v53  ;;  %v12490_v52 = vld [vmem:[%s13965_s16 + $0x4dc] ss:$36 sps:$4 sm:$0xff]   ;;  %v12493_v53 = vld [vmem:[%s13965_s16 + $0x4e4] ss:$36 sps:$4 sm:$0xff]  }
 0x13b   : > { %4319 = vmatpush1.bf16.msra.mxu0 %v12404_v54  ;;  %4491 = vmatpush1.bf16.msra.mxu1 %v12407_v55  ;;  %v12488_v54 = vld [vmem:[%s13965_s16 + $0x4d8] ss:$36 sps:$4 sm:$0xff]   ;;  %v12491_v55 = vld [vmem:[%s13965_s16 + $0x4e0] ss:$36 sps:$4 sm:$0xff]  }
 0x13c   : > { %4320 = vmatprep.subr.bf16.mxu0 %v12412_v56  ;;  %4492 = vmatprep.subr.bf16.mxu1 %v12415_v57  ;;  %v12496_v56 = vld [vmem:[%s13965_s16 + $0x524] ss:$36 sps:$4 sm:$0xff]   ;;  %v12499_v57 = vld [vmem:[%s13965_s16 + $0x52c] ss:$36 sps:$4 sm:$0xff]  }
 0x13f   : > { %4321 = vmatpush1.bf16.msra.mxu0 %v12410_v58  ;;  %4493 = vmatpush1.bf16.msra.mxu1 %v12413_v60  ;;  %v12494_v58 = vld [vmem:[%s13965_s16 + $0x520] ss:$36 sps:$4 sm:$0xff]   ;;  %v12497_v60 = vld [vmem:[%s13965_s16 + $0x528] ss:$36 sps:$4 sm:$0xff]  }
 0x140   : > { %4322 = vmatprep.subr.bf16.mxu0 %v12418_v61  ;;  %4494 = vmatprep.subr.bf16.mxu1 %v12421_v62  ;;  %v12502_v61 = vld [vmem:[%s13965_s16 + $0x56c] ss:$36 sps:$4 sm:$0xff]   ;;  %v12505_v62 = vld [vmem:[%s13965_s16 + $0x574] ss:$36 sps:$4 sm:$0xff]  }
 0x143   : > { %4323 = vmatpush1.bf16.msra.mxu0 %v12416_v63  ;;  %4495 = vmatpush1.bf16.msra.mxu1 %v12419_v0  ;;  %v12500_v63 = vld [vmem:[%s13965_s16 + $0x568] ss:$36 sps:$4 sm:$0xff]   ;;  %v12503_v0 = vld [vmem:[%s13965_s16 + $0x570] ss:$36 sps:$4 sm:$0xff]  }
 0x144   : > { %4324 = vmatprep.subr.bf16.mxu0 %v12424_v1  ;;  %4496 = vmatprep.subr.bf16.mxu1 %v12427_v2  ;;  %v12508_v1 = vld [vmem:[%s13965_s16 + $0x5b4] ss:$36 sps:$4 sm:$0xff]   ;;  %v12511_v2 = vld [vmem:[%s13965_s16 + $0x5bc] ss:$36 sps:$4 sm:$0xff]  }
 0x147   : > { %4325 = vmatpush1.bf16.msra.mxu0 %v12422_v3  ;;  %4497 = vmatpush1.bf16.msra.mxu1 %v12425_v4  ;;  %v12506_v3 = vld [vmem:[%s13965_s16 + $0x5b0] ss:$36 sps:$4 sm:$0xff]   ;;  %v12509_v4 = vld [vmem:[%s13965_s16 + $0x5b8] ss:$36 sps:$4 sm:$0xff]  }
 0x148   : > { %4326 = vmatprep.subr.bf16.mxu0 %v12430_v5  ;;  %4498 = vmatprep.subr.bf16.mxu1 %v12433_v6  ;;  %v12514_v5 = vld [vmem:[%s13965_s16 + $0x5fc] ss:$36 sps:$4 sm:$0xff]   ;;  %v12517_v6 = vld [vmem:[%s13965_s16 + $0x604] ss:$36 sps:$4 sm:$0xff]  }
 0x14b   : > { %4327 = vmatpush1.bf16.msra.mxu0 %v12428_v7  ;;  %4499 = vmatpush1.bf16.msra.mxu1 %v12431_v8  ;;  %v12512_v7 = vld [vmem:[%s13965_s16 + $0x5f8] ss:$36 sps:$4 sm:$0xff]   ;;  %v12515_v8 = vld [vmem:[%s13965_s16 + $0x600] ss:$36 sps:$4 sm:$0xff]  }
 0x14c   : > { %4328 = vmatprep.subr.bf16.mxu0 %v12436_v9  ;;  %4500 = vmatprep.subr.bf16.mxu1 %v12439_v10  ;;  %v12520_v9 = vld [vmem:[%s13965_s16 + $0x644] ss:$36 sps:$4 sm:$0xff]   ;;  %v12523_v10 = vld [vmem:[%s13965_s16 + $0x64c] ss:$36 sps:$4 sm:$0xff]  }
 0x14f   : > { %4329 = vmatpush1.bf16.msra.mxu0 %v12434_v11  ;;  %4501 = vmatpush1.bf16.msra.mxu1 %v12437_v12  ;;  %v12518_v11 = vld [vmem:[%s13965_s16 + $0x640] ss:$36 sps:$4 sm:$0xff]   ;;  %v12521_v12 = vld [vmem:[%s13965_s16 + $0x648] ss:$36 sps:$4 sm:$0xff]  }
 0x150   : > { %4330 = vmatprep.subr.bf16.mxu0 %v12442_v13  ;;  %4502 = vmatprep.subr.bf16.mxu1 %v12445_v15  ;;  %v12526_v13 = vld [vmem:[%s13965_s16 + $0x68c] ss:$36 sps:$4 sm:$0xff]   ;;  %v12529_v15 = vld [vmem:[%s13965_s16 + $0x694] ss:$36 sps:$4 sm:$0xff]  }
 0x153   : > { %4331 = vmatpush1.bf16.msra.mxu0 %v12440_v16  ;;  %4503 = vmatpush1.bf16.msra.mxu1 %v12443_v17  ;;  %v12524_v16 = vld [vmem:[%s13965_s16 + $0x688] ss:$36 sps:$4 sm:$0xff]   ;;  %v12527_v17 = vld [vmem:[%s13965_s16 + $0x690] ss:$36 sps:$4 sm:$0xff]  }
 0x154   : > { %4332 = vmatprep.subr.bf16.mxu0 %v12448_v18  ;;  %4504 = vmatprep.subr.bf16.mxu1 %v12451_v19  ;;  %v12532_v18 = vld [vmem:[%s13965_s16 + $0x6d4] ss:$36 sps:$4 sm:$0xff]   ;;  %v12535_v19 = vld [vmem:[%s13965_s16 + $0x6dc] ss:$36 sps:$4 sm:$0xff]  }
 0x157   : > { %4333 = vmatpush1.bf16.msra.mxu0 %v12446_v20  ;;  %4505 = vmatpush1.bf16.msra.mxu1 %v12449_v21  ;;  %v12530_v20 = vld [vmem:[%s13965_s16 + $0x6d0] ss:$36 sps:$4 sm:$0xff]   ;;  %v12533_v21 = vld [vmem:[%s13965_s16 + $0x6d8] ss:$36 sps:$4 sm:$0xff]  }
 0x158   : > { %4334 = vmatprep.subr.bf16.mxu0 %v12454_v23  ;;  %4506 = vmatprep.subr.bf16.mxu1 %v12457_v24  ;;  %v12538_v23 = vld [vmem:[%s13965_s16 + $0x71c] ss:$36 sps:$4 sm:$0xff]   ;;  %v12541_v24 = vld [vmem:[%s13965_s16 + $0x724] ss:$36 sps:$4 sm:$0xff]  }
 0x15b   : > { %4335 = vmatpush1.bf16.msra.mxu0 %v12452_v28  ;;  %4507 = vmatpush1.bf16.msra.mxu1 %v12455_v29  ;;  %v12536_v28 = vld [vmem:[%s13965_s16 + $0x718] ss:$36 sps:$4 sm:$0xff]   ;;  %v12539_v29 = vld [vmem:[%s13965_s16 + $0x720] ss:$36 sps:$4 sm:$0xff]  }
 0x15c   : > { %4336 = vmatprep.subr.bf16.mxu0 %v12460_v30  ;;  %4508 = vmatprep.subr.bf16.mxu1 %v12463_v31  ;;  %v12544_v30 = vld [vmem:[%s13965_s16 + $0x764] ss:$36 sps:$4 sm:$0xff]   ;;  %v12547_v31 = vld [vmem:[%s13965_s16 + $0x76c] ss:$36 sps:$4 sm:$0xff]  }
 0x15f   : > { %4337 = vmatpush1.bf16.msra.mxu0 %v12458_v32  ;;  %4509 = vmatpush1.bf16.msra.mxu1 %v12461_v36  ;;  %v12542_v32 = vld [vmem:[%s13965_s16 + $0x760] ss:$36 sps:$4 sm:$0xff]   ;;  %v12545_v36 = vld [vmem:[%s13965_s16 + $0x768] ss:$36 sps:$4 sm:$0xff]  }
 0x160   : > { %4338 = vmatprep.subr.bf16.mxu0 %v12466_v37  ;;  %4510 = vmatprep.subr.bf16.mxu1 %v12469_v25  ;;  %v12550_v37 = vld [vmem:[%s13965_s16 + $0x7ac] ss:$36 sps:$4 sm:$0xff]   ;;  %v12553_v25 = vld [vmem:[%s13965_s16 + $0x7b4] ss:$36 sps:$4 sm:$0xff]  }
 0x163   : > { %4339 = vmatpush1.bf16.msra.mxu0 %v12464_v26  ;;  %4511 = vmatpush1.bf16.msra.mxu1 %v12467_v39  ;;  %v12548_v26 = vld [vmem:[%s13965_s16 + $0x7a8] ss:$36 sps:$4 sm:$0xff]   ;;  %v12551_v39 = vld [vmem:[%s13965_s16 + $0x7b0] ss:$36 sps:$4 sm:$0xff]  }
 0x164   : > { %4340 = vmatprep.subr.bf16.mxu0 %v12472_v40  ;;  %4512 = vmatprep.subr.bf16.mxu1 %v12475_v41  ;;  %v12556_v40 = vld [vmem:[%s13965_s16 + $0x7f4] ss:$36 sps:$4 sm:$0xff]   ;;  %v12559_v41 = vld [vmem:[%s13965_s16 + $0x7fc] ss:$36 sps:$4 sm:$0xff]  }
 0x167   : > { %4341 = vmatpush1.bf16.msra.mxu0 %v12470_v44  ;;  %4513 = vmatpush1.bf16.msra.mxu1 %v12473_v45  ;;  %v12554_v44 = vld [vmem:[%s13965_s16 + $0x7f0] ss:$36 sps:$4 sm:$0xff]   ;;  %v12557_v45 = vld [vmem:[%s13965_s16 + $0x7f8] ss:$36 sps:$4 sm:$0xff]  }
 0x168   : > { %4342 = vmatprep.subr.bf16.mxu0 %v12478_v46  ;;  %4514 = vmatprep.subr.bf16.mxu1 %v12481_v47  ;;  %v12562_v46 = vld [vmem:[%s13965_s16 + $0x83c] ss:$36 sps:$4 sm:$0xff]   ;;  %v12565_v47 = vld [vmem:[%s13965_s16 + $0x844] ss:$36 sps:$4 sm:$0xff]  }
 0x16b   : > { %4343 = vmatpush1.bf16.msra.mxu0 %v12476_v48  ;;  %4515 = vmatpush1.bf16.msra.mxu1 %v12479_v49  ;;  %v12560_v48 = vld [vmem:[%s13965_s16 + $0x838] ss:$36 sps:$4 sm:$0xff]   ;;  %v12563_v49 = vld [vmem:[%s13965_s16 + $0x840] ss:$36 sps:$4 sm:$0xff]  }
 0x16c   : > { %4355 = vmatprep.subr.bf16.mxu0 %v12484_v34  ;;  %4527 = vmatprep.subr.bf16.mxu1 %v12487_v35  ;;  %v12568_v34 = vld [vmem:[%s13965_s16 + $0x884] ss:$36 sps:$4 sm:$0xff]   ;;  %v12571_v35 = vld [vmem:[%s13965_s16 + $0x88c] ss:$36 sps:$4 sm:$0xff]  }
 0x16e   : > { %4345 = vmatmul.mubr.bf16.vlgmr.msra.gmra.mrb[4].mxu0 %v14042_v14  ;;  %4517 = vmatmul.mubr.bf16.vlgmr.msra.gmra.mrb[4].mxu1 %v14042_v14 }
 0x16f   : > { %4356 = vmatpush1.bf16.msra.mxu0 %v12482_v50  ;;  %4528 = vmatpush1.bf16.msra.mxu1 %v12485_v51  ;;  %v12566_v50 = vld [vmem:[%s13965_s16 + $0x880] ss:$36 sps:$4 sm:$0xff]   ;;  %v12569_v51 = vld [vmem:[%s13965_s16 + $0x888] ss:$36 sps:$4 sm:$0xff]  }
 0x170   : > { %4357 = vmatprep.subr.bf16.mxu0 %v12490_v52  ;;  %4529 = vmatprep.subr.bf16.mxu1 %v12493_v53  ;;  %v12574_v52 = vld [vmem:[%s13965_s16 + $0x8cc] ss:$36 sps:$4 sm:$0xff]   ;;  %v12577_v53 = vld [vmem:[%s13965_s16 + $0x8d4] ss:$36 sps:$4 sm:$0xff]  }
 0x171   : > { %4387 = vmatprep.mubr.bf16.mxu0 %v14080_v43  ;;  %4559 = vmatprep.mubr.bf16.mxu1 %v14080_v43 }
 0x173   : > { %4358 = vmatpush1.bf16.msra.mxu0 %v12488_v54  ;;  %4530 = vmatpush1.bf16.msra.mxu1 %v12491_v55  ;;  %v12572_v54 = vld [vmem:[%s13965_s16 + $0x8c8] ss:$36 sps:$4 sm:$0xff]   ;;  %v12575_v55 = vld [vmem:[%s13965_s16 + $0x8d0] ss:$36 sps:$4 sm:$0xff]  }
 0x174   : > { %4359 = vmatprep.subr.bf16.mxu0 %v12496_v56  ;;  %4531 = vmatprep.subr.bf16.mxu1 %v12499_v57  ;;  %v12580_v56 = vld [vmem:[%s13965_s16 + $0x914] ss:$36 sps:$4 sm:$0xff]   ;;  %v12583_v57 = vld [vmem:[%s13965_s16 + $0x91c] ss:$36 sps:$4 sm:$0xff]  }
 0x177   : > { %4360 = vmatpush1.bf16.msra.mxu0 %v12494_v58  ;;  %4532 = vmatpush1.bf16.msra.mxu1 %v12497_v60  ;;  %v12578_v58 = vld [vmem:[%s13965_s16 + $0x910] ss:$36 sps:$4 sm:$0xff]   ;;  %v12581_v60 = vld [vmem:[%s13965_s16 + $0x918] ss:$36 sps:$4 sm:$0xff]  }
 0x178   : > { %4361 = vmatprep.subr.bf16.mxu0 %v12502_v61  ;;  %4533 = vmatprep.subr.bf16.mxu1 %v12505_v62  ;;  %v12586_v61 = vld [vmem:[%s13965_s16 + $0x95c] ss:$36 sps:$4 sm:$0xff]   ;;  %v12589_v62 = vld [vmem:[%s13965_s16 + $0x964] ss:$36 sps:$4 sm:$0xff]  }
 0x17b   : > { %4362 = vmatpush1.bf16.msra.mxu0 %v12500_v63  ;;  %4534 = vmatpush1.bf16.msra.mxu1 %v12503_v0  ;;  %v12584_v63 = vld [vmem:[%s13965_s16 + $0x958] ss:$36 sps:$4 sm:$0xff]   ;;  %v12587_v0 = vld [vmem:[%s13965_s16 + $0x960] ss:$36 sps:$4 sm:$0xff]  }
 0x17c   : > { %4363 = vmatprep.subr.bf16.mxu0 %v12508_v1  ;;  %4535 = vmatprep.subr.bf16.mxu1 %v12511_v2  ;;  %v12592_v1 = vld [vmem:[%s13965_s16 + $0x9a4] ss:$36 sps:$4 sm:$0xff]   ;;  %v12595_v2 = vld [vmem:[%s13965_s16 + $0x9ac] ss:$36 sps:$4 sm:$0xff]  }
 0x17f   : > { %4364 = vmatpush1.bf16.msra.mxu0 %v12506_v3  ;;  %4536 = vmatpush1.bf16.msra.mxu1 %v12509_v4  ;;  %v12590_v3 = vld [vmem:[%s13965_s16 + $0x9a0] ss:$36 sps:$4 sm:$0xff]   ;;  %v12593_v4 = vld [vmem:[%s13965_s16 + $0x9a8] ss:$36 sps:$4 sm:$0xff]  }
 0x180   : > { %4365 = vmatprep.subr.bf16.mxu0 %v12514_v5  ;;  %4537 = vmatprep.subr.bf16.mxu1 %v12517_v6  ;;  %v12598_v5 = vld [vmem:[%s13965_s16 + $0x9ec] ss:$36 sps:$4 sm:$0xff]   ;;  %v12601_v6 = vld [vmem:[%s13965_s16 + $0x9f4] ss:$36 sps:$4 sm:$0xff]  }
 0x183   : > { %4366 = vmatpush1.bf16.msra.mxu0 %v12512_v7  ;;  %4538 = vmatpush1.bf16.msra.mxu1 %v12515_v8  ;;  %v12596_v7 = vld [vmem:[%s13965_s16 + $0x9e8] ss:$36 sps:$4 sm:$0xff]   ;;  %v12599_v8 = vld [vmem:[%s13965_s16 + $0x9f0] ss:$36 sps:$4 sm:$0xff]  }
 0x184   : > { %4367 = vmatprep.subr.bf16.mxu0 %v12520_v9  ;;  %4539 = vmatprep.subr.bf16.mxu1 %v12523_v10  ;;  %v12604_v9 = vld [vmem:[%s13965_s16 + $0xa34] ss:$36 sps:$4 sm:$0xff]   ;;  %v12607_v10 = vld [vmem:[%s13965_s16 + $0xa3c] ss:$36 sps:$4 sm:$0xff]  }
 0x187   : > { %4368 = vmatpush1.bf16.msra.mxu0 %v12518_v11  ;;  %4540 = vmatpush1.bf16.msra.mxu1 %v12521_v12  ;;  %v12602_v11 = vld [vmem:[%s13965_s16 + $0xa30] ss:$36 sps:$4 sm:$0xff]   ;;  %v12605_v12 = vld [vmem:[%s13965_s16 + $0xa38] ss:$36 sps:$4 sm:$0xff]  }
 0x188   : > { %4369 = vmatprep.subr.bf16.mxu0 %v12526_v13  ;;  %4541 = vmatprep.subr.bf16.mxu1 %v12529_v15  ;;  %v12610_v13 = vld [vmem:[%s13965_s16 + $0xa7c] ss:$36 sps:$4 sm:$0xff]   ;;  %v12613_v15 = vld [vmem:[%s13965_s16 + $0xa84] ss:$36 sps:$4 sm:$0xff]  }
 0x18b   : > { %4370 = vmatpush1.bf16.msra.mxu0 %v12524_v16  ;;  %4542 = vmatpush1.bf16.msra.mxu1 %v12527_v17  ;;  %v12608_v16 = vld [vmem:[%s13965_s16 + $0xa78] ss:$36 sps:$4 sm:$0xff]   ;;  %v12611_v17 = vld [vmem:[%s13965_s16 + $0xa80] ss:$36 sps:$4 sm:$0xff]  }
 0x18c   : > { %4371 = vmatprep.subr.bf16.mxu0 %v12532_v18  ;;  %4543 = vmatprep.subr.bf16.mxu1 %v12535_v19  ;;  %v12616_v18 = vld [vmem:[%s13965_s16 + $0xac4] ss:$36 sps:$4 sm:$0xff]   ;;  %v12619_v19 = vld [vmem:[%s13965_s16 + $0xacc] ss:$36 sps:$4 sm:$0xff]  }
 0x18f   : > { %4372 = vmatpush1.bf16.msra.mxu0 %v12530_v20  ;;  %4544 = vmatpush1.bf16.msra.mxu1 %v12533_v21  ;;  %v12614_v20 = vld [vmem:[%s13965_s16 + $0xac0] ss:$36 sps:$4 sm:$0xff]   ;;  %v12617_v21 = vld [vmem:[%s13965_s16 + $0xac8] ss:$36 sps:$4 sm:$0xff]  }
 0x190   : > { %4373 = vmatprep.subr.bf16.mxu0 %v12538_v23  ;;  %4545 = vmatprep.subr.bf16.mxu1 %v12541_v24  ;;  %v12622_v23 = vld [vmem:[%s13965_s16 + $0xb0c] ss:$36 sps:$4 sm:$0xff]   ;;  %v12625_v24 = vld [vmem:[%s13965_s16 + $0xb14] ss:$36 sps:$4 sm:$0xff]  }
 0x193   : > { %4374 = vmatpush1.bf16.msra.mxu0 %v12536_v28  ;;  %4546 = vmatpush1.bf16.msra.mxu1 %v12539_v29  ;;  %v12620_v28 = vld [vmem:[%s13965_s16 + $0xb08] ss:$36 sps:$4 sm:$0xff]   ;;  %v12623_v29 = vld [vmem:[%s13965_s16 + $0xb10] ss:$36 sps:$4 sm:$0xff]  }
 0x194   : > { %4375 = vmatprep.subr.bf16.mxu0 %v12544_v30  ;;  %4547 = vmatprep.subr.bf16.mxu1 %v12547_v31  ;;  %v12628_v30 = vld [vmem:[%s13965_s16 + $0xb54] ss:$36 sps:$4 sm:$0xff]   ;;  %v12631_v31 = vld [vmem:[%s13965_s16 + $0xb5c] ss:$36 sps:$4 sm:$0xff]  }
 0x197   : > { %4376 = vmatpush1.bf16.msra.mxu0 %v12542_v32  ;;  %4548 = vmatpush1.bf16.msra.mxu1 %v12545_v36  ;;  %v12626_v32 = vld [vmem:[%s13965_s16 + $0xb50] ss:$36 sps:$4 sm:$0xff]   ;;  %v12629_v36 = vld [vmem:[%s13965_s16 + $0xb58] ss:$36 sps:$4 sm:$0xff]  }
 0x198   : > { %4377 = vmatprep.subr.bf16.mxu0 %v12550_v37  ;;  %4549 = vmatprep.subr.bf16.mxu1 %v12553_v25  ;;  %v12634_v37 = vld [vmem:[%s13965_s16 + $0xb9c] ss:$36 sps:$4 sm:$0xff]   ;;  %v12637_v25 = vld [vmem:[%s13965_s16 + $0xba4] ss:$36 sps:$4 sm:$0xff]  }
 0x19b   : > { %4378 = vmatpush1.bf16.msra.mxu0 %v12548_v26  ;;  %4550 = vmatpush1.bf16.msra.mxu1 %v12551_v39  ;;  %v12632_v26 = vld [vmem:[%s13965_s16 + $0xb98] ss:$36 sps:$4 sm:$0xff]   ;;  %v12635_v39 = vld [vmem:[%s13965_s16 + $0xba0] ss:$36 sps:$4 sm:$0xff]  }
 0x19c   : > { %4379 = vmatprep.subr.bf16.mxu0 %v12556_v40  ;;  %4551 = vmatprep.subr.bf16.mxu1 %v12559_v41  ;;  %v12640_v40 = vld [vmem:[%s13965_s16 + $0xbe4] ss:$36 sps:$4 sm:$0xff]   ;;  %v12643_v41 = vld [vmem:[%s13965_s16 + $0xbec] ss:$36 sps:$4 sm:$0xff]  }
 0x19f   : > { %4380 = vmatpush1.bf16.msra.mxu0 %v12554_v44  ;;  %4552 = vmatpush1.bf16.msra.mxu1 %v12557_v45  ;;  %v12638_v44 = vld [vmem:[%s13965_s16 + $0xbe0] ss:$36 sps:$4 sm:$0xff]   ;;  %v12641_v45 = vld [vmem:[%s13965_s16 + $0xbe8] ss:$36 sps:$4 sm:$0xff]  }
 0x1a0   : > { %4381 = vmatprep.subr.bf16.mxu0 %v12562_v46  ;;  %4553 = vmatprep.subr.bf16.mxu1 %v12565_v47  ;;  %v12646_v46 = vld [vmem:[%s13965_s16 + $0xc2c] ss:$36 sps:$4 sm:$0xff]   ;;  %v12649_v47 = vld [vmem:[%s13965_s16 + $0xc34] ss:$36 sps:$4 sm:$0xff]  }
 0x1a3   : > { %4382 = vmatpush1.bf16.msra.mxu0 %v12560_v48  ;;  %4554 = vmatpush1.bf16.msra.mxu1 %v12563_v49  ;;  %v12644_v48 = vld [vmem:[%s13965_s16 + $0xc28] ss:$36 sps:$4 sm:$0xff]   ;;  %v12647_v49 = vld [vmem:[%s13965_s16 + $0xc30] ss:$36 sps:$4 sm:$0xff]  }
 0x1a4   : > { %4383 = vmatprep.subr.bf16.mxu0 %v12568_v34  ;;  %4555 = vmatprep.subr.bf16.mxu1 %v12571_v35  ;;  %v12652_v34 = vld [vmem:[%s13965_s16 + $0xc74] ss:$36 sps:$4 sm:$0xff]   ;;  %v12655_v35 = vld [vmem:[%s13965_s16 + $0xc7c] ss:$36 sps:$4 sm:$0xff]  }
 0x1a7   : > { %4384 = vmatpush1.bf16.msra.mxu0 %v12566_v50  ;;  %4556 = vmatpush1.bf16.msra.mxu1 %v12569_v51  ;;  %v12650_v50 = vld [vmem:[%s13965_s16 + $0xc70] ss:$36 sps:$4 sm:$0xff]   ;;  %v12653_v51 = vld [vmem:[%s13965_s16 + $0xc78] ss:$36 sps:$4 sm:$0xff]  }
 0x1a8   : > { %4385 = vmatprep.subr.bf16.mxu0 %v12574_v52  ;;  %4557 = vmatprep.subr.bf16.mxu1 %v12577_v53  ;;  %v12658_v52 = vld [vmem:[%s13965_s16 + $0xcbc] ss:$36 sps:$4 sm:$0xff]   ;;  %v12661_v53 = vld [vmem:[%s13965_s16 + $0xcc4] ss:$36 sps:$4 sm:$0xff]  }
 0x1ab   : > { %4386 = vmatpush1.bf16.msra.mxu0 %v12572_v54  ;;  %4558 = vmatpush1.bf16.msra.mxu1 %v12575_v55  ;;  %v12656_v54 = vld [vmem:[%s13965_s16 + $0xcb8] ss:$36 sps:$4 sm:$0xff]   ;;  %v12659_v55 = vld [vmem:[%s13965_s16 + $0xcc0] ss:$36 sps:$4 sm:$0xff]  }
 0x1ac   : > { %4398 = vmatprep.subr.bf16.mxu0 %v12580_v56  ;;  %4570 = vmatprep.subr.bf16.mxu1 %v12583_v57  ;;  %v12664_v56 = vld [vmem:[%s13965_s16 + $0xd04] ss:$36 sps:$4 sm:$0xff]   ;;  %v12667_v57 = vld [vmem:[%s13965_s16 + $0xd0c] ss:$36 sps:$4 sm:$0xff]  }
 0x1ae   : > { %4388 = vmatmul.mubr.bf16.vlgmr.msra.gmra.mrb[4].mxu0 %v14126_v22  ;;  %4560 = vmatmul.mubr.bf16.vlgmr.msra.gmra.mrb[4].mxu1 %v14126_v22 }
 0x1af   : > { %4399 = vmatpush1.bf16.msra.mxu0 %v12578_v58  ;;  %4571 = vmatpush1.bf16.msra.mxu1 %v12581_v60  ;;  %v12662_v58 = vld [vmem:[%s13965_s16 + $0xd00] ss:$36 sps:$4 sm:$0xff]   ;;  %v12665_v60 = vld [vmem:[%s13965_s16 + $0xd08] ss:$36 sps:$4 sm:$0xff]  }
 0x1b0   : > { %4400 = vmatprep.subr.bf16.mxu0 %v12586_v61  ;;  %4572 = vmatprep.subr.bf16.mxu1 %v12589_v62  ;;  %v12670_v61 = vld [vmem:[%s13965_s16 + $0xd4c] ss:$36 sps:$4 sm:$0xff]   ;;  %v12673_v62 = vld [vmem:[%s13965_s16 + $0xd54] ss:$36 sps:$4 sm:$0xff]  }
 0x1b1   : > { %4430 = vmatprep.mubr.bf16.mxu0 %v14138_v27  ;;  %4602 = vmatprep.mubr.bf16.mxu1 %v14138_v27 }
 0x1b3   : > { %4401 = vmatpush1.bf16.msra.mxu0 %v12584_v63  ;;  %4573 = vmatpush1.bf16.msra.mxu1 %v12587_v0  ;;  %v12668_v63 = vld [vmem:[%s13965_s16 + $0xd48] ss:$36 sps:$4 sm:$0xff]   ;;  %v12671_v0 = vld [vmem:[%s13965_s16 + $0xd50] ss:$36 sps:$4 sm:$0xff]  }
 0x1b4   : > { %4402 = vmatprep.subr.bf16.mxu0 %v12592_v1  ;;  %4574 = vmatprep.subr.bf16.mxu1 %v12595_v2  ;;  %v12676_v1 = vld [vmem:[%s13965_s16 + $0xd94] ss:$36 sps:$4 sm:$0xff]   ;;  %v12679_v2 = vld [vmem:[%s13965_s16 + $0xd9c] ss:$36 sps:$4 sm:$0xff]  }
 0x1b7   : > { %4403 = vmatpush1.bf16.msra.mxu0 %v12590_v3  ;;  %4575 = vmatpush1.bf16.msra.mxu1 %v12593_v4  ;;  %v12674_v3 = vld [vmem:[%s13965_s16 + $0xd90] ss:$36 sps:$4 sm:$0xff]   ;;  %v12677_v4 = vld [vmem:[%s13965_s16 + $0xd98] ss:$36 sps:$4 sm:$0xff]  }
 0x1b8   : > { %4404 = vmatprep.subr.bf16.mxu0 %v12598_v5  ;;  %4576 = vmatprep.subr.bf16.mxu1 %v12601_v6  ;;  %v12682_v5 = vld [vmem:[%s13965_s16 + $0xddc] ss:$36 sps:$4 sm:$0xff]   ;;  %v12685_v6 = vld [vmem:[%s13965_s16 + $0xde4] ss:$36 sps:$4 sm:$0xff]  }
 0x1bb   : > { %4405 = vmatpush1.bf16.msra.mxu0 %v12596_v7  ;;  %4577 = vmatpush1.bf16.msra.mxu1 %v12599_v8  ;;  %v12680_v7 = vld [vmem:[%s13965_s16 + $0xdd8] ss:$36 sps:$4 sm:$0xff]   ;;  %v12683_v8 = vld [vmem:[%s13965_s16 + $0xde0] ss:$36 sps:$4 sm:$0xff]  }
 0x1bc   : > { %4406 = vmatprep.subr.bf16.mxu0 %v12604_v9  ;;  %4578 = vmatprep.subr.bf16.mxu1 %v12607_v10  ;;  %v12688_v9 = vld [vmem:[%s13965_s16 + $0xe24] ss:$36 sps:$4 sm:$0xff]   ;;  %v12691_v10 = vld [vmem:[%s13965_s16 + $0xe2c] ss:$36 sps:$4 sm:$0xff]  }
 0x1bf   : > { %4407 = vmatpush1.bf16.msra.mxu0 %v12602_v11  ;;  %4579 = vmatpush1.bf16.msra.mxu1 %v12605_v12  ;;  %v12686_v11 = vld [vmem:[%s13965_s16 + $0xe20] ss:$36 sps:$4 sm:$0xff]   ;;  %v12689_v12 = vld [vmem:[%s13965_s16 + $0xe28] ss:$36 sps:$4 sm:$0xff]  }
 0x1c0   : > { %4408 = vmatprep.subr.bf16.mxu0 %v12610_v13  ;;  %4580 = vmatprep.subr.bf16.mxu1 %v12613_v15  ;;  %v12694_v13 = vld [vmem:[%s13965_s16 + $0xe6c] ss:$36 sps:$4 sm:$0xff]   ;;  %v12697_v15 = vld [vmem:[%s13965_s16 + $0xe74] ss:$36 sps:$4 sm:$0xff]  }
 0x1c3   : > { %4409 = vmatpush1.bf16.msra.mxu0 %v12608_v16  ;;  %4581 = vmatpush1.bf16.msra.mxu1 %v12611_v17  ;;  %v12692_v16 = vld [vmem:[%s13965_s16 + $0xe68] ss:$36 sps:$4 sm:$0xff]   ;;  %v12695_v17 = vld [vmem:[%s13965_s16 + $0xe70] ss:$36 sps:$4 sm:$0xff]  }
 0x1c4   : > { %4410 = vmatprep.subr.bf16.mxu0 %v12616_v18  ;;  %4582 = vmatprep.subr.bf16.mxu1 %v12619_v19  ;;  %v12700_v18 = vld [vmem:[%s13965_s16 + $0xeb4] ss:$36 sps:$4 sm:$0xff]   ;;  %v12703_v19 = vld [vmem:[%s13965_s16 + $0xebc] ss:$36 sps:$4 sm:$0xff]  }
 0x1c7   : > { %4411 = vmatpush1.bf16.msra.mxu0 %v12614_v20  ;;  %4583 = vmatpush1.bf16.msra.mxu1 %v12617_v21  ;;  %v12698_v20 = vld [vmem:[%s13965_s16 + $0xeb0] ss:$36 sps:$4 sm:$0xff]   ;;  %v12701_v21 = vld [vmem:[%s13965_s16 + $0xeb8] ss:$36 sps:$4 sm:$0xff]  }
 0x1c8   : > { %4412 = vmatprep.subr.bf16.mxu0 %v12622_v23  ;;  %4584 = vmatprep.subr.bf16.mxu1 %v12625_v24  ;;  %v12706_v23 = vld [vmem:[%s13965_s16 + $0xefc] ss:$36 sps:$4 sm:$0xff]   ;;  %v12709_v24 = vld [vmem:[%s13965_s16 + $0xf04] ss:$36 sps:$4 sm:$0xff]  }
 0x1cb   : > { %4413 = vmatpush1.bf16.msra.mxu0 %v12620_v28  ;;  %4585 = vmatpush1.bf16.msra.mxu1 %v12623_v29  ;;  %v318_v28 = vld [vmem:[#allocation2] sm:$0xff]  ;;  %v320_v29 = vld [vmem:[#allocation2 + $0x10] sm:$0xff] }
 0x1cc   : > { %4414 = vmatprep.subr.bf16.mxu0 %v12628_v30  ;;  %4586 = vmatprep.subr.bf16.mxu1 %v12631_v31  ;;  %v319_v30 = vld [vmem:[#allocation2 + $0x8] sm:$0xff]  ;;  %v12704_v31 = vld [vmem:[%s13965_s16 + $0xef8] ss:$36 sps:$4 sm:$0xff]  }
 0x1cf   : > { %4415 = vmatpush1.bf16.msra.mxu0 %v12626_v32  ;;  %4587 = vmatpush1.bf16.msra.mxu1 %v12629_v36  ;;  %v12707_v32 = vld [vmem:[%s13965_s16 + $0xf00] ss:$36 sps:$4 sm:$0xff]   ;;  %v321_v36 = vld [vmem:[#allocation2 + $0x18] sm:$0xff] }
 0x1d0   : > { %4416 = vmatprep.subr.bf16.mxu0 %v12634_v37  ;;  %4588 = vmatprep.subr.bf16.mxu1 %v12637_v25  ;;  %v12712_v37 = vld [vmem:[%s13965_s16 + $0xf44] ss:$36 sps:$4 sm:$0xff]   ;;  %v12715_v25 = vld [vmem:[%s13965_s16 + $0xf4c] ss:$36 sps:$4 sm:$0xff]  }
 0x1d3   : > { %4417 = vmatpush1.bf16.msra.mxu0 %v12632_v26  ;;  %4589 = vmatpush1.bf16.msra.mxu1 %v12635_v39 }
 0x1d4   : > { %4418 = vmatprep.subr.bf16.mxu0 %v12640_v40  ;;  %4590 = vmatprep.subr.bf16.mxu1 %v12643_v41  ;;  %v327_v40 = vld [vmem:[#allocation2 + $0x48] sm:$0xff]  ;;  %v329_v41 = vld [vmem:[#allocation2 + $0x58] sm:$0xff] }
 0x1d7   : > { %4419 = vmatpush1.bf16.msra.mxu0 %v12638_v44  ;;  %4591 = vmatpush1.bf16.msra.mxu1 %v12641_v45 }
 0x1d8   : > { %4420 = vmatprep.subr.bf16.mxu0 %v12646_v46  ;;  %4592 = vmatprep.subr.bf16.mxu1 %v12649_v47 }
 0x1db   : > { %4421 = vmatpush1.bf16.msra.mxu0 %v12644_v48  ;;  %4593 = vmatpush1.bf16.msra.mxu1 %v12647_v49  ;;  %v328_v48 = vld [vmem:[#allocation2 + $0x50] sm:$0xff]  ;;  %v330_v49 = vld [vmem:[#allocation2 + $0x60] sm:$0xff] }
 0x1dc   : > { %4422 = vmatprep.subr.bf16.mxu0 %v12652_v34  ;;  %4594 = vmatprep.subr.bf16.mxu1 %v12655_v35 }
 0x1df   : > { %4423 = vmatpush1.bf16.msra.mxu0 %v12650_v50  ;;  %4595 = vmatpush1.bf16.msra.mxu1 %v12653_v51 }
 0x1e0   : > { %4424 = vmatprep.subr.bf16.mxu0 %v12658_v52  ;;  %4596 = vmatprep.subr.bf16.mxu1 %v12661_v53  ;;  %v12710_v52 = vld [vmem:[%s13965_s16 + $0xf40] ss:$36 sps:$4 sm:$0xff]   ;;  %v12713_v53 = vld [vmem:[%s13965_s16 + $0xf48] ss:$36 sps:$4 sm:$0xff]  }
 0x1e3   : > { %4425 = vmatpush1.bf16.msra.mxu0 %v12656_v54  ;;  %4597 = vmatpush1.bf16.msra.mxu1 %v12659_v55 }
 0x1e4   : > { %4426 = vmatprep.subr.bf16.mxu0 %v12664_v56  ;;  %4598 = vmatprep.subr.bf16.mxu1 %v12667_v57 }
 0x1e7   : > { %4427 = vmatpush1.bf16.msra.mxu0 %v12662_v58  ;;  %4599 = vmatpush1.bf16.msra.mxu1 %v12665_v60  ;;  %v12718_v58 = vld [vmem:[%s13965_s16 + $0xf8c] ss:$36 sps:$4 sm:$0xff]   ;;  %v12721_v60 = vld [vmem:[%s13965_s16 + $0xf94] ss:$36 sps:$4 sm:$0xff]  }
 0x1e8   : > { %4428 = vmatprep.subr.bf16.mxu0 %v12670_v61  ;;  %4600 = vmatprep.subr.bf16.mxu1 %v12673_v62 }
 0x1eb   : > { %4429 = vmatpush1.bf16.msra.mxu0 %v12668_v63  ;;  %4601 = vmatpush1.bf16.msra.mxu1 %v12671_v0  ;;  %v12716_v63 = vld [vmem:[%s13965_s16 + $0xf88] ss:$36 sps:$4 sm:$0xff]   ;;  %v12719_v0 = vld [vmem:[%s13965_s16 + $0xf90] ss:$36 sps:$4 sm:$0xff]  }
 0x1ec   : > { %4441 = vmatprep.subr.bf16.mxu0 %v12676_v1  ;;  %4613 = vmatprep.subr.bf16.mxu1 %v12679_v2  ;;  %v12724_v1 = vld [vmem:[%s13965_s16 + $0xfd4] ss:$36 sps:$4 sm:$0xff]   ;;  %v12727_v2 = vld [vmem:[%s13965_s16 + $0xfdc] ss:$36 sps:$4 sm:$0xff]  }
 0x1ee   : > { %4431 = vmatmul.mubr.bf16.vlgmr.msra.gmra.mrb[4].mxu0 %v14208_v33  ;;  %4603 = vmatmul.mubr.bf16.vlgmr.msra.gmra.mrb[4].mxu1 %v14208_v33 }
 0x1ef   : > { %4442 = vmatpush1.bf16.msra.mxu0 %v12674_v3  ;;  %4614 = vmatpush1.bf16.msra.mxu1 %v12677_v4  ;;  %v12722_v3 = vld [vmem:[%s13965_s16 + $0xfd0] ss:$36 sps:$4 sm:$0xff]   ;;  %v12725_v4 = vld [vmem:[%s13965_s16 + $0xfd8] ss:$36 sps:$4 sm:$0xff]  }
 0x1f0   : > { %4443 = vmatprep.subr.bf16.mxu0 %v12682_v5  ;;  %4615 = vmatprep.subr.bf16.mxu1 %v12685_v6  ;;  %v12730_v5 = vld [vmem:[%s13965_s16 + $0x101c] ss:$36 sps:$4 sm:$0xff]   ;;  %v12733_v6 = vld [vmem:[%s13965_s16 + $0x1024] ss:$36 sps:$4 sm:$0xff]  }
 0x1f1   : > { %4473 = vmatprep.mubr.bf16.mxu0 %v14220_v38  ;;  %4645 = vmatprep.mubr.bf16.mxu1 %v14220_v38 }
 0x1f3   : > { %4444 = vmatpush1.bf16.msra.mxu0 %v12680_v7  ;;  %4616 = vmatpush1.bf16.msra.mxu1 %v12683_v8  ;;  %v12728_v7 = vld [vmem:[%s13965_s16 + $0x1018] ss:$36 sps:$4 sm:$0xff]   ;;  %v12731_v8 = vld [vmem:[%s13965_s16 + $0x1020] ss:$36 sps:$4 sm:$0xff]  }
 0x1f4   : > { %4445 = vmatprep.subr.bf16.mxu0 %v12688_v9  ;;  %4617 = vmatprep.subr.bf16.mxu1 %v12691_v10  ;;  %v12736_v9 = vld [vmem:[%s13965_s16 + $0x1064] ss:$36 sps:$4 sm:$0xff]   ;;  %v12739_v10 = vld [vmem:[%s13965_s16 + $0x106c] ss:$36 sps:$4 sm:$0xff]  }
 0x1f7   : > { %4446 = vmatpush1.bf16.msra.mxu0 %v12686_v11  ;;  %4618 = vmatpush1.bf16.msra.mxu1 %v12689_v12  ;;  %v12734_v11 = vld [vmem:[%s13965_s16 + $0x1060] ss:$36 sps:$4 sm:$0xff]   ;;  %v12737_v12 = vld [vmem:[%s13965_s16 + $0x1068] ss:$36 sps:$4 sm:$0xff]  }
 0x1f8   : > { %4447 = vmatprep.subr.bf16.mxu0 %v12694_v13  ;;  %4619 = vmatprep.subr.bf16.mxu1 %v12697_v15  ;;  %v12742_v13 = vld [vmem:[%s13965_s16 + $0x10ac] ss:$36 sps:$4 sm:$0xff]   ;;  %v12745_v15 = vld [vmem:[%s13965_s16 + $0x10b4] ss:$36 sps:$4 sm:$0xff]  }
 0x1fb   : > { %4448 = vmatpush1.bf16.msra.mxu0 %v12692_v16  ;;  %4620 = vmatpush1.bf16.msra.mxu1 %v12695_v17  ;;  %v12740_v16 = vld [vmem:[%s13965_s16 + $0x10a8] ss:$36 sps:$4 sm:$0xff]   ;;  %v12743_v17 = vld [vmem:[%s13965_s16 + $0x10b0] ss:$36 sps:$4 sm:$0xff]  }
 0x1fc   : > { %4449 = vmatprep.subr.bf16.mxu0 %v12700_v18  ;;  %4621 = vmatprep.subr.bf16.mxu1 %v12703_v19  ;;  %v12748_v18 = vld [vmem:[%s13965_s16 + $0x10f4] ss:$36 sps:$4 sm:$0xff]   ;;  %v12751_v19 = vld [vmem:[%s13965_s16 + $0x10fc] ss:$36 sps:$4 sm:$0xff]  }
 0x1ff   : > { %4450 = vmatpush1.bf16.msra.mxu0 %v12698_v20  ;;  %4622 = vmatpush1.bf16.msra.mxu1 %v12701_v21  ;;  %v12746_v20 = vld [vmem:[%s13965_s16 + $0x10f0] ss:$36 sps:$4 sm:$0xff]   ;;  %v12749_v21 = vld [vmem:[%s13965_s16 + $0x10f8] ss:$36 sps:$4 sm:$0xff]  }
 0x200   : > { %4451 = vmatprep.subr.bf16.mxu0 %v12706_v23  ;;  %4623 = vmatprep.subr.bf16.mxu1 %v12709_v24  ;;  %v12754_v23 = vld [vmem:[%s13965_s16 + $0x113c] ss:$36 sps:$4 sm:$0xff]   ;;  %v12757_v24 = vld [vmem:[%s13965_s16 + $0x1144] ss:$36 sps:$4 sm:$0xff]  }
 0x201   : > { %v4131_v26 = vpop.f32.mrb[0].mxu0  ;;  %v4303_v39 = vpop.f32.mrb[0].mxu1 }
 0x202   : > { %v4820_v44 = vadd.f32 %v4131_v26, %v318_v28  ;;  %v4822_v45 = vadd.f32 %v4303_v39, %v320_v29  ;;  %v4133_v46 = vpop.f32.mrb[1].mxu0  ;;  %v4305_v47 = vpop.f32.mrb[1].mxu1  ;;  %v12752_v28 = vld [vmem:[%s13965_s16 + $0x1138] ss:$36 sps:$4 sm:$0xff]   ;;  %v12755_v29 = vld [vmem:[%s13965_s16 + $0x1140] ss:$36 sps:$4 sm:$0xff]  }
 0x203   : > { %v4821_v34 = vadd.f32 %v4133_v46, %v319_v30  ;;  %v4823_v35 = vadd.f32 %v4305_v47, %v321_v36  ;;  %v4135_v50 = vpop.f32.mrb[2].mxu0  ;;  %v4307_v51 = vpop.f32.mrb[2].mxu1  ;;  %4452 = vmatpush1.bf16.msra.mxu0 %v12704_v31  ;;  %4624 = vmatpush1.bf16.msra.mxu1 %v12707_v32  ;;  %v12760_v30 = vld [vmem:[%s13965_s16 + $0x1184] ss:$36 sps:$4 sm:$0xff]   ;;  %v12763_v31 = vld [vmem:[%s13965_s16 + $0x118c] ss:$36 sps:$4 sm:$0xff]  }
 0x204   : > { %4838 = vst [vmem:[#allocation2] sm:$0xff] %v4820_v44  ;;  %4840 = vst [vmem:[#allocation2 + $0x10] sm:$0xff] %v4822_v45  ;;  %v4829_v54 = vadd.f32 %v4135_v50, %v327_v40  ;;  %v4831_v55 = vadd.f32 %v4307_v51, %v329_v41  ;;  %v4137_v56 = vpop.f32.mrb[3].mxu0  ;;  %v4309_v57 = vpop.f32.mrb[3].mxu1  ;;  %4453 = vmatprep.subr.bf16.mxu0 %v12712_v37  ;;  %4625 = vmatprep.subr.bf16.mxu1 %v12715_v25  ;;  %v12758_v32 = vld [vmem:[%s13965_s16 + $0x1180] ss:$36 sps:$4 sm:$0xff]  }
 0x205   : > { %4839 = vst [vmem:[#allocation2 + $0x8] sm:$0xff] %v4821_v34  ;;  %4841 = vst [vmem:[#allocation2 + $0x18] sm:$0xff] %v4823_v35  ;;  %v4830_v61 = vadd.f32 %v4137_v56, %v328_v48  ;;  %v4832_v62 = vadd.f32 %v4309_v57, %v330_v49  ;;  %v12761_v36 = vld [vmem:[%s13965_s16 + $0x1188] ss:$36 sps:$4 sm:$0xff]   ;;  %v12769_v25 = vld [vmem:[%s13965_s16 + $0x11d4] ss:$36 sps:$4 sm:$0xff]  }
 0x206   : > { %4847 = vst [vmem:[#allocation2 + $0x48] sm:$0xff] %v4829_v54  ;;  %4849 = vst [vmem:[#allocation2 + $0x58] sm:$0xff] %v4831_v55  ;;  %v12766_v37 = vld [vmem:[%s13965_s16 + $0x11cc] ss:$36 sps:$4 sm:$0xff]   ;;  %v12770_v40 = vld [vmem:[%s13965_s16 + $0x260] ss:$36 sps:$4 sm:$0xff]  }
 0x207   : > { %4848 = vst [vmem:[#allocation2 + $0x50] sm:$0xff] %v4830_v61  ;;  %4850 = vst [vmem:[#allocation2 + $0x60] sm:$0xff] %v4832_v62  ;;  %4454 = vmatpush1.bf16.msra.mxu0 %v12710_v52  ;;  %4626 = vmatpush1.bf16.msra.mxu1 %v12713_v53  ;;  %v12764_v26 = vld [vmem:[%s13965_s16 + $0x11c8] ss:$36 sps:$4 sm:$0xff]   ;;  %v12767_v39 = vld [vmem:[%s13965_s16 + $0x11d0] ss:$36 sps:$4 sm:$0xff]  }
 0x208   : > { %4455 = vmatprep.subr.bf16.mxu0 %v12718_v58  ;;  %4627 = vmatprep.subr.bf16.mxu1 %v12721_v60  ;;  %v12771_v41 = vld [vmem:[%s13965_s16 + $0x6e0] ss:$36 sps:$4 sm:$0xff]   ;;  %v12774_v46 = vld [vmem:[%s13965_s16 + $0x2a8] ss:$36 sps:$4 sm:$0xff]   ;;  %v12778_v34 = vld [vmem:[%s13965_s16 + $0x2f0] ss:$36 sps:$4 sm:$0xff]  }
 0x209   : > { %v12772_v44 = vld [vmem:[%s13965_s16 + $0x20] ss:$36 sps:$4 sm:$0xff]   ;;  %v12775_v47 = vld [vmem:[%s13965_s16 + $0x728] ss:$36 sps:$4 sm:$0xff]   ;;  %v12779_v35 = vld [vmem:[%s13965_s16 + $0x770] ss:$36 sps:$4 sm:$0xff]  }
 0x20a   : > { %v12773_v45 = vld [vmem:[%s13965_s16 + $0x4a0] ss:$36 sps:$4 sm:$0xff]   ;;  %v12776_v48 = vld [vmem:[%s13965_s16 + $0x68] ss:$36 sps:$4 sm:$0xff]   ;;  %v12780_v50 = vld [vmem:[%s13965_s16 + $0xb0] ss:$36 sps:$4 sm:$0xff]  }
 0x20b   : > { %4456 = vmatpush1.bf16.msra.mxu0 %v12716_v63  ;;  %4628 = vmatpush1.bf16.msra.mxu1 %v12719_v0  ;;  %v12777_v49 = vld [vmem:[%s13965_s16 + $0x4e8] ss:$36 sps:$4 sm:$0xff]   ;;  %v12781_v51 = vld [vmem:[%s13965_s16 + $0x530] ss:$36 sps:$4 sm:$0xff]   ;;  %v12782_v52 = vld [vmem:[%s13965_s16 + $0x338] ss:$36 sps:$4 sm:$0xff]  }
 0x20c   : > { %4457 = vmatprep.subr.bf16.mxu0 %v12724_v1  ;;  %4629 = vmatprep.subr.bf16.mxu1 %v12727_v2  ;;  %v12783_v53 = vld [vmem:[%s13965_s16 + $0x7b8] ss:$36 sps:$4 sm:$0xff]   ;;  %v12787_v55 = vld [vmem:[%s13965_s16 + $0x800] ss:$36 sps:$4 sm:$0xff]   ;;  %v12790_v58 = vld [vmem:[%s13965_s16 + $0x3c8] ss:$36 sps:$4 sm:$0xff]  }
 0x20d   : > { %v12784_v54 = vld [vmem:[%s13965_s16 + $0xf8] ss:$36 sps:$4 sm:$0xff]   ;;  %v12788_v56 = vld [vmem:[%s13965_s16 + $0x140] ss:$36 sps:$4 sm:$0xff]   ;;  %v12791_v60 = vld [vmem:[%s13965_s16 + $0x848] ss:$36 sps:$4 sm:$0xff]  }
 0x20e   : > { %v12789_v57 = vld [vmem:[%s13965_s16 + $0x5c0] ss:$36 sps:$4 sm:$0xff]   ;;  %v12792_v61 = vld [vmem:[%s13965_s16 + $0x188] ss:$36 sps:$4 sm:$0xff]   ;;  %v12794_v63 = vld [vmem:[%s13965_s16 + $0x410] ss:$36 sps:$4 sm:$0xff]  }
 0x20f   : > { %4458 = vmatpush1.bf16.msra.mxu0 %v12722_v3  ;;  %4630 = vmatpush1.bf16.msra.mxu1 %v12725_v4  ;;  %v12793_v62 = vld [vmem:[%s13965_s16 + $0x608] ss:$36 sps:$4 sm:$0xff]   ;;  %v12795_v0 = vld [vmem:[%s13965_s16 + $0x890] ss:$36 sps:$4 sm:$0xff]   ;;  %v12798_v3 = vld [vmem:[%s13965_s16 + $0x458] ss:$36 sps:$4 sm:$0xff]  }
 0x210   : > { %4459 = vmatprep.subr.bf16.mxu0 %v12730_v5  ;;  %4631 = vmatprep.subr.bf16.mxu1 %v12733_v6  ;;  %v12796_v1 = vld [vmem:[%s13965_s16 + $0x1d0] ss:$36 sps:$4 sm:$0xff]   ;;  %v12799_v4 = vld [vmem:[%s13965_s16 + $0x8d8] ss:$36 sps:$4 sm:$0xff]  }
 0x211   : > { %v12797_v2 = vld [vmem:[%s13965_s16 + $0x650] ss:$36 sps:$4 sm:$0xff]   ;;  %v12800_v5 = vld [vmem:[%s13965_s16 + $0x218] ss:$36 sps:$4 sm:$0xff]  }
 0x212   : > { %v12801_v6 = vld [vmem:[%s13965_s16 + $0x698] ss:$36 sps:$4 sm:$0xff]  }
 0x213   : > { %4460 = vmatpush1.bf16.msra.mxu0 %v12728_v7  ;;  %4632 = vmatpush1.bf16.msra.mxu1 %v12731_v8  ;;  %v12802_v7 = vld [vmem:[%s13965_s16 + $0xb60] ss:$36 sps:$4 sm:$0xff]  }
 0x214   : > { %4461 = vmatprep.subr.bf16.mxu0 %v12736_v9  ;;  %4633 = vmatprep.subr.bf16.mxu1 %v12739_v10  ;;  %v12803_v8 = vld [vmem:[%s13965_s16 + $0xfe0] ss:$36 sps:$4 sm:$0xff]  }
 0x215   : > { %v12804_v9 = vld [vmem:[%s13965_s16 + $0x920] ss:$36 sps:$4 sm:$0xff]  }
 0x216   : > { %v12805_v10 = vld [vmem:[%s13965_s16 + $0xda0] ss:$36 sps:$4 sm:$0xff]  }
 0x217   : > { %4462 = vmatpush1.bf16.msra.mxu0 %v12734_v11  ;;  %4634 = vmatpush1.bf16.msra.mxu1 %v12737_v12  ;;  %v12806_v11 = vld [vmem:[%s13965_s16 + $0xba8] ss:$36 sps:$4 sm:$0xff]  }
 0x218   : > { %4463 = vmatprep.subr.bf16.mxu0 %v12742_v13  ;;  %4635 = vmatprep.subr.bf16.mxu1 %v12745_v15  ;;  %v12807_v12 = vld [vmem:[%s13965_s16 + $0x1028] ss:$36 sps:$4 sm:$0xff]  }
 0x219   : > { %v12808_v13 = vld [vmem:[%s13965_s16 + $0x968] ss:$36 sps:$4 sm:$0xff]  }
 0x21a   : > { %v12809_v15 = vld [vmem:[%s13965_s16 + $0xde8] ss:$36 sps:$4 sm:$0xff]  }
 0x21b   : > { %4464 = vmatpush1.bf16.msra.mxu0 %v12740_v16  ;;  %4636 = vmatpush1.bf16.msra.mxu1 %v12743_v17  ;;  %v12810_v16 = vld [vmem:[%s13965_s16 + $0xbf0] ss:$36 sps:$4 sm:$0xff]  }
 0x21c   : > { %4465 = vmatprep.subr.bf16.mxu0 %v12748_v18  ;;  %4637 = vmatprep.subr.bf16.mxu1 %v12751_v19  ;;  %v12811_v17 = vld [vmem:[%s13965_s16 + $0x1070] ss:$36 sps:$4 sm:$0xff]   ;;  %v12814_v18 = vld [vmem:[%s13965_s16 + $0xc38] ss:$36 sps:$4 sm:$0xff]  }
 0x21d   : > { %v12815_v19 = vld [vmem:[%s13965_s16 + $0x10b8] ss:$36 sps:$4 sm:$0xff]  }
 0x21f   : > { %4466 = vmatpush1.bf16.msra.mxu0 %v12746_v20  ;;  %4638 = vmatpush1.bf16.msra.mxu1 %v12749_v21  ;;  %v12816_v20 = vld [vmem:[%s13965_s16 + $0x9f8] ss:$36 sps:$4 sm:$0xff]   ;;  %v12819_v21 = vld [vmem:[%s13965_s16 + $0x1100] ss:$36 sps:$4 sm:$0xff]  }
 0x220   : > { %4467 = vmatprep.subr.bf16.mxu0 %v12754_v23  ;;  %4639 = vmatprep.subr.bf16.mxu1 %v12757_v24  ;;  %v12820_v23 = vld [vmem:[%s13965_s16 + $0xa40] ss:$36 sps:$4 sm:$0xff]  }
 0x221   : > { %v12821_v24 = vld [vmem:[%s13965_s16 + $0xec0] ss:$36 sps:$4 sm:$0xff]  }
 0x223   : > { %4468 = vmatpush1.bf16.msra.mxu0 %v12752_v28  ;;  %4640 = vmatpush1.bf16.msra.mxu1 %v12755_v29  ;;  %v12822_v28 = vld [vmem:[%s13965_s16 + $0xcc8] ss:$36 sps:$4 sm:$0xff]  }
 0x224   : > { %4469 = vmatprep.subr.bf16.mxu0 %v12760_v30  ;;  %4641 = vmatprep.subr.bf16.mxu1 %v12763_v31  ;;  %v12823_v29 = vld [vmem:[%s13965_s16 + $0x1148] ss:$36 sps:$4 sm:$0xff]  }
 0x225   : > { %v12824_v30 = vld [vmem:[%s13965_s16 + $0xa88] ss:$36 sps:$4 sm:$0xff]  }
 0x226   : > { %v12825_v31 = vld [vmem:[%s13965_s16 + $0xf08] ss:$36 sps:$4 sm:$0xff]  }
 0x227   : > { %4470 = vmatpush1.bf16.msra.mxu0 %v12758_v32  ;;  %4642 = vmatpush1.bf16.msra.mxu1 %v12761_v36  ;;  %v12826_v32 = vld [vmem:[%s13965_s16 + $0xd10] ss:$36 sps:$4 sm:$0xff]  }
 0x228   : > { %4471 = vmatprep.subr.bf16.mxu0 %v12766_v37  ;;  %4643 = vmatprep.subr.bf16.mxu1 %v12769_v25  ;;  %v12827_v36 = vld [vmem:[%s13965_s16 + $0x1190] ss:$36 sps:$4 sm:$0xff]  }
 0x229   : > { %v12828_v37 = vld [vmem:[%s13965_s16 + $0xad0] ss:$36 sps:$4 sm:$0xff]  }
 0x22a   : > { %v12829_v25 = vld [vmem:[%s13965_s16 + $0xf50] ss:$36 sps:$4 sm:$0xff]  }
 0x22b   : > { %4472 = vmatpush1.bf16.msra.mxu0 %v12764_v26  ;;  %4644 = vmatpush1.bf16.msra.mxu1 %v12767_v39  ;;  %v12830_v26 = vld [vmem:[%s13965_s16 + $0xd58] ss:$36 sps:$4 sm:$0xff]  }
 0x22c   : > { %11615 = vmatprep.subr.bf16.mxu0 %v12770_v40  ;;  %11637 = vmatprep.subr.bf16.mxu1 %v12771_v41  ;;  %v12831_v39 = vld [vmem:[%s13965_s16 + $0x11d8] ss:$36 sps:$4 sm:$0xff]  }
 0x22d   : > { %v12832_v40 = vld [vmem:[%s13965_s16 + $0xb18] ss:$36 sps:$4 sm:$0xff]  }
 0x22e   : > { %4474 = vmatmul.mubr.bf16.vlgmr.msra.gmra.mrb[4].mxu0 %v14288_v42  ;;  %4646 = vmatmul.mubr.bf16.vlgmr.msra.gmra.mrb[4].mxu1 %v14288_v42  ;;  %v12833_v41 = vld [vmem:[%s13965_s16 + $0xf98] ss:$36 sps:$4 sm:$0xff]  }
 0x22f   : > { %11616 = vmatpush3.bf16.msra.mxu0 %v12772_v44  ;;  %11638 = vmatpush3.bf16.msra.mxu1 %v12773_v45  ;;  %v322_v44 = vld [vmem:[#allocation2 + $0x20] sm:$0xff]  ;;  %v324_v45 = vld [vmem:[#allocation2 + $0x30] sm:$0xff] }
 0x230   : > { %11617 = vmatprep.subr.bf16.mxu0 %v12774_v46  ;;  %11639 = vmatprep.subr.bf16.mxu1 %v12775_v47  ;;  %v323_v46 = vld [vmem:[#allocation2 + $0x28] sm:$0xff]  ;;  %v325_v47 = vld [vmem:[#allocation2 + $0x38] sm:$0xff] }
 0x231   : > { %4688 = vmatprep.mubr.bf16.mxu0 %v14020_v59  ;;  %4729 = vmatprep.mubr.bf16.mxu1 %v14080_v43  ;;  %v12785_v59 = vld [vmem:[%s13965_s16 + $0x578] ss:$36 sps:$4 sm:$0xff]   ;;  %v12786_v43 = vld [vmem:[%s13965_s16 + $0x380] ss:$36 sps:$4 sm:$0xff]  }
 0x233   : > { %11618 = vmatpush3.bf16.msra.mxu0 %v12776_v48  ;;  %11640 = vmatpush3.bf16.msra.mxu1 %v12777_v49 }
 0x234   : > { %11619 = vmatprep.subr.bf16.mxu0 %v12778_v34  ;;  %11641 = vmatprep.subr.bf16.mxu1 %v12779_v35  ;;  %v331_v34 = vld [vmem:[#allocation2 + $0x68] sm:$0xff]  ;;  %v333_v35 = vld [vmem:[#allocation2 + $0x78] sm:$0xff] }
 0x237   : > { %11620 = vmatpush3.bf16.msra.mxu0 %v12780_v50  ;;  %11642 = vmatpush3.bf16.msra.mxu1 %v12781_v51 }
 0x238   : > { %11621 = vmatprep.subr.bf16.mxu0 %v12782_v52  ;;  %11643 = vmatprep.subr.bf16.mxu1 %v12783_v53 }
 0x23b   : > { %11622 = vmatpush3.bf16.msra.mxu0 %v12784_v54  ;;  %11644 = vmatpush3.bf16.msra.mxu1 %v12785_v59  ;;  %v332_v54 = vld [vmem:[#allocation2 + $0x70] sm:$0xff]  ;;  %v334_v59 = vld [vmem:[#allocation2 + $0x80] sm:$0xff] }
 0x23c   : > { %11623 = vmatprep.subr.bf16.mxu0 %v12786_v43  ;;  %11645 = vmatprep.subr.bf16.mxu1 %v12787_v55 }
 0x23f   : > { %11624 = vmatpush3.bf16.msra.mxu0 %v12788_v56  ;;  %11646 = vmatpush3.bf16.msra.mxu1 %v12789_v57 }
 0x240   : > { %11625 = vmatprep.subr.bf16.mxu0 %v12790_v58  ;;  %11647 = vmatprep.subr.bf16.mxu1 %v12791_v60 }
 0x243   : > { %11626 = vmatpush3.bf16.msra.mxu0 %v12792_v61  ;;  %11648 = vmatpush3.bf16.msra.mxu1 %v12793_v62 }
 0x244   : > { %11627 = vmatprep.subr.bf16.mxu0 %v12794_v63  ;;  %11649 = vmatprep.subr.bf16.mxu1 %v12795_v0 }
 0x247   : > { %11628 = vmatpush3.bf16.msra.mxu0 %v12796_v1  ;;  %11650 = vmatpush3.bf16.msra.mxu1 %v12797_v2 }
 0x248   : > { %11629 = vmatprep.subr.bf16.mxu0 %v12798_v3  ;;  %11651 = vmatprep.subr.bf16.mxu1 %v12799_v4 }
 0x24b   : > { %11630 = vmatpush3.bf16.msra.mxu0 %v12800_v5  ;;  %11652 = vmatpush3.bf16.msra.mxu1 %v12801_v6 }
 0x24c   : > { %11659 = vmatprep.subr.bf16.mxu0 %v12802_v7  ;;  %11681 = vmatprep.subr.bf16.mxu1 %v12803_v8 }
 0x24e   : > { %4689 = vmatmul.mubr.bf16.vlgmr.msra.gmra.mrb[8].mxu0 %v14042_v14  ;;  %4730 = vmatmul.mubr.bf16.vlgmr.msra.gmra.mrb[8].mxu1 %v14126_v22  ;;  %v12812_v14 = vld [vmem:[%s13965_s16 + $0x9b0] ss:$36 sps:$4 sm:$0xff]  }
 0x24f   : > { %11660 = vmatpush3.bf16.msra.mxu0 %v12804_v9  ;;  %11682 = vmatpush3.bf16.msra.mxu1 %v12805_v10  ;;  %v12813_v22 = vld [vmem:[%s13965_s16 + $0xe30] ss:$36 sps:$4 sm:$0xff]  }
 0x250   : > { %11661 = vmatprep.subr.bf16.mxu0 %v12806_v11  ;;  %11683 = vmatprep.subr.bf16.mxu1 %v12807_v12 }
 0x251   : > { %4770 = vmatprep.mubr.bf16.mxu0 %v14138_v27  ;;  %4811 = vmatprep.mubr.bf16.mxu1 %v14220_v38  ;;  %v12817_v27 = vld [vmem:[%s13965_s16 + $0xe78] ss:$36 sps:$4 sm:$0xff]   ;;  %v12818_v38 = vld [vmem:[%s13965_s16 + $0xc80] ss:$36 sps:$4 sm:$0xff]  }
 0x253   : > { %11662 = vmatpush3.bf16.msra.mxu0 %v12808_v13  ;;  %11684 = vmatpush3.bf16.msra.mxu1 %v12809_v15 }
 0x254   : > { %11663 = vmatprep.subr.bf16.mxu0 %v12810_v16  ;;  %11685 = vmatprep.subr.bf16.mxu1 %v12811_v17 }
 0x257   : > { %11664 = vmatpush3.bf16.msra.mxu0 %v12812_v14  ;;  %11686 = vmatpush3.bf16.msra.mxu1 %v12813_v22 }
 0x258   : > { %11665 = vmatprep.subr.bf16.mxu0 %v12814_v18  ;;  %11687 = vmatprep.subr.bf16.mxu1 %v12815_v19 }
 0x25b   : > { %11666 = vmatpush3.bf16.msra.mxu0 %v12816_v20  ;;  %11688 = vmatpush3.bf16.msra.mxu1 %v12817_v27 }
 0x25c   : > { %11667 = vmatprep.subr.bf16.mxu0 %v12818_v38  ;;  %11689 = vmatprep.subr.bf16.mxu1 %v12819_v21 }
 0x25f   : > { %11668 = vmatpush3.bf16.msra.mxu0 %v12820_v23  ;;  %11690 = vmatpush3.bf16.msra.mxu1 %v12821_v24  ;;  %v326_v24 = vld [vmem:[#allocation2 + $0x40] sm:$0xff] }
 0x260   : > { %11669 = vmatprep.subr.bf16.mxu0 %v12822_v28  ;;  %11691 = vmatprep.subr.bf16.mxu1 %v12823_v29 }
 0x263   : > { %11670 = vmatpush3.bf16.msra.mxu0 %v12824_v30  ;;  %11692 = vmatpush3.bf16.msra.mxu1 %v12825_v31  ;;  %v335_v30 = vld [vmem:[#allocation2 + $0x88] sm:$0xff] }
 0x264   : > { %11671 = vmatprep.subr.bf16.mxu0 %v12826_v32  ;;  %11693 = vmatprep.subr.bf16.mxu1 %v12827_v36 }
 0x267   : > { %11672 = vmatpush3.bf16.msra.mxu0 %v12828_v37  ;;  %11694 = vmatpush3.bf16.msra.mxu1 %v12829_v25  ;;  %v12834_v37 = vld [vmem:[%s16897_s3 + $0x4] ss:$36 sps:$4 sm:$0xff] (!%p10959_p11)   ;;  %v12836_v25 = vld [vmem:[%s16897_s3 + $0xc] ss:$36 sps:$4 sm:$0xff] (!%p10959_p11)  }
 0x268   : > { %11673 = vmatprep.subr.bf16.mxu0 %v12830_v26  ;;  %11695 = vmatprep.subr.bf16.mxu1 %v12831_v39  ;;  %v12838_v26 = vld [vmem:[%s16897_s3] ss:$36 sps:$4 sm:$0xff] (!%p10959_p11)   ;;  %v12839_v39 = vld [vmem:[%s16897_s3 + $0x8] ss:$36 sps:$4 sm:$0xff] (!%p10959_p11)  }
 0x26b   : > { %11674 = vmatpush3.bf16.msra.mxu0 %v12832_v40  ;;  %11696 = vmatpush3.bf16.msra.mxu1 %v12833_v41  ;;  %v12840_v40 = vld [vmem:[%s16897_s3 + $0x4c] ss:$36 sps:$4 sm:$0xff] (!%p10959_p11)   ;;  %v12842_v41 = vld [vmem:[%s16897_s3 + $0x54] ss:$36 sps:$4 sm:$0xff] (!%p10959_p11)  }
 0x26c   : > { %9197 = vmatprep.subr.bf16.mxu0 (!%p10959_p11), %v12834_v37  ;;  %9412 = vmatprep.subr.bf16.mxu1 (!%p10959_p11), %v12836_v25  ;;  %v12911_v37 = vld [vmem:[%s16897_s3 + $0x368] ss:$36 sps:$4 sm:$0xff] (!%p10959_p11)  }
 0x26e   : > { %4771 = vmatmul.mubr.bf16.vlgmr.msra.gmra.mrb[12].mxu0 %v14208_v33  ;;  %4812 = vmatmul.mubr.bf16.vlgmr.msra.gmra.mrb[12].mxu1 %v14288_v42 }
 0x26f   : > { %9198 = vmatpush1.bf16.msra.mxu0 (!%p10959_p11), %v12838_v26  ;;  %9413 = vmatpush1.bf16.msra.mxu1 (!%p10959_p11), %v12839_v39  ;;  %v12912_v39 = vld [vmem:[%s16897_s3 + $0x3ac] ss:$36 sps:$4 sm:$0xff] (!%p10959_p11)  }
 0x270   : > { %9199 = vmatprep.subr.bf16.mxu0 (!%p10959_p11), %v12840_v40  ;;  %9414 = vmatprep.subr.bf16.mxu1 (!%p10959_p11), %v12842_v41 }
 0x301   : > { %v4475_v48 = vpop.f32.mrb[4].mxu0  ;;  %v4647_v49 = vpop.f32.mrb[4].mxu1 }
 0x302   : > { %v4824_v50 = vadd.f32 %v4475_v48, %v322_v44  ;;  %v4826_v51 = vadd.f32 %v4647_v49, %v324_v45  ;;  %v4477_v52 = vpop.f32.mrb[5].mxu0  ;;  %v4649_v53 = vpop.f32.mrb[5].mxu1  ;;  %v12844_v44 = vld [vmem:[%s16897_s3 + $0x48] ss:$36 sps:$4 sm:$0xff] (!%p10959_p11)   ;;  %v12845_v45 = vld [vmem:[%s16897_s3 + $0x50] ss:$36 sps:$4 sm:$0xff] (!%p10959_p11)  }
 0x303   : > { %v4825_v43 = vadd.f32 %v4477_v52, %v323_v46  ;;  %v4827_v55 = vadd.f32 %v4649_v53, %v325_v47  ;;  %v4479_v56 = vpop.f32.mrb[6].mxu0  ;;  %v4651_v33 = vpop.f32.mrb[6].mxu1  ;;  %v12846_v46 = vld [vmem:[%s16897_s3 + $0x94] ss:$36 sps:$4 sm:$0xff] (!%p10959_p11)   ;;  %v12848_v47 = vld [vmem:[%s16897_s3 + $0x9c] ss:$36 sps:$4 sm:$0xff] (!%p10959_p11)   ;;  %9200 = vmatpush1.bf16.msra.mxu0 (!%p10959_p11), %v12844_v44  ;;  %9415 = vmatpush1.bf16.msra.mxu1 (!%p10959_p11), %v12845_v45 }
 0x304   : > { %4842 = vst [vmem:[#allocation2 + $0x20] sm:$0xff] %v4824_v50  ;;  %4844 = vst [vmem:[#allocation2 + $0x30] sm:$0xff] %v4826_v51  ;;  %v4833_v42 = vadd.f32 %v4479_v56, %v331_v34  ;;  %v4835_v57 = vadd.f32 %v4651_v33, %v333_v35  ;;  %v4481_v58 = vpop.f32.mrb[7].mxu0  ;;  %v4653_v60 = vpop.f32.mrb[7].mxu1  ;;  %v12850_v48 = vld [vmem:[%s16897_s3 + $0x90] ss:$36 sps:$4 sm:$0xff] (!%p10959_p11)   ;;  %9201 = vmatprep.subr.bf16.mxu0 (!%p10959_p11), %v12846_v46  ;;  %9416 = vmatprep.subr.bf16.mxu1 (!%p10959_p11), %v12848_v47 }
 0x305   : > { %4843 = vst [vmem:[#allocation2 + $0x28] sm:$0xff] %v4825_v43  ;;  %4845 = vst [vmem:[#allocation2 + $0x38] sm:$0xff] %v4827_v55  ;;  %v4834_v61 = vadd.f32 %v4481_v58, %v332_v54  ;;  %v4836_v62 = vadd.f32 %v4653_v60, %v334_v59  ;;  %v12851_v49 = vld [vmem:[%s16897_s3 + $0x98] ss:$36 sps:$4 sm:$0xff] (!%p10959_p11)   ;;  %v12854_v35 = vld [vmem:[%s16897_s3 + $0xe4] ss:$36 sps:$4 sm:$0xff] (!%p10959_p11)  }
 0x306   : > { %4851 = vst [vmem:[#allocation2 + $0x68] sm:$0xff] %v4833_v42  ;;  %4853 = vst [vmem:[#allocation2 + $0x78] sm:$0xff] %v4835_v57  ;;  %v12852_v34 = vld [vmem:[%s16897_s3 + $0xdc] ss:$36 sps:$4 sm:$0xff] (!%p10959_p11)   ;;  %v12858_v52 = vld [vmem:[%s16897_s3 + $0x124] ss:$36 sps:$4 sm:$0xff] (!%p10959_p11)  }
 0x307   : > { %4852 = vst [vmem:[#allocation2 + $0x70] sm:$0xff] %v4834_v61  ;;  %4854 = vst [vmem:[#allocation2 + $0x80] sm:$0xff] %v4836_v62  ;;  %v12856_v50 = vld [vmem:[%s16897_s3 + $0xd8] ss:$36 sps:$4 sm:$0xff] (!%p10959_p11)   ;;  %9202 = vmatpush1.bf16.msra.mxu0 (!%p10959_p11), %v12850_v48  ;;  %9417 = vmatpush1.bf16.msra.mxu1 (!%p10959_p11), %v12851_v49  ;;  %v12857_v51 = vld [vmem:[%s16897_s3 + $0xe0] ss:$36 sps:$4 sm:$0xff] (!%p10959_p11)  }
 0x308   : > { %9203 = vmatprep.subr.bf16.mxu0 (!%p10959_p11), %v12852_v34  ;;  %9418 = vmatprep.subr.bf16.mxu1 (!%p10959_p11), %v12854_v35  ;;  %v12860_v53 = vld [vmem:[%s16897_s3 + $0x12c] ss:$36 sps:$4 sm:$0xff] (!%p10959_p11)   ;;  %v12862_v54 = vld [vmem:[%s16897_s3 + $0x120] ss:$36 sps:$4 sm:$0xff] (!%p10959_p11)   ;;  %v12866_v55 = vld [vmem:[%s16897_s3 + $0x174] ss:$36 sps:$4 sm:$0xff] (!%p10959_p11)  }
 0x309   : > { %v12863_v59 = vld [vmem:[%s16897_s3 + $0x128] ss:$36 sps:$4 sm:$0xff] (!%p10959_p11)   ;;  %v12869_v33 = vld [vmem:[%s16897_s3 + $0x170] ss:$36 sps:$4 sm:$0xff] (!%p10959_p11)   ;;  %v12872_v57 = vld [vmem:[%s16897_s3 + $0x1bc] ss:$36 sps:$4 sm:$0xff] (!%p10959_p11)  }
 0x30a   : > { %v12864_v43 = vld [vmem:[%s16897_s3 + $0x16c] ss:$36 sps:$4 sm:$0xff] (!%p10959_p11)   ;;  %v12870_v42 = vld [vmem:[%s16897_s3 + $0x1b4] ss:$36 sps:$4 sm:$0xff] (!%p10959_p11)   ;;  %v12876_v61 = vld [vmem:[%s16897_s3 + $0x1fc] ss:$36 sps:$4 sm:$0xff] (!%p10959_p11)  }
 0x30b   : > { %9204 = vmatpush1.bf16.msra.mxu0 (!%p10959_p11), %v12856_v50  ;;  %9419 = vmatpush1.bf16.msra.mxu1 (!%p10959_p11), %v12857_v51  ;;  %v12868_v56 = vld [vmem:[%s16897_s3 + $0x168] ss:$36 sps:$4 sm:$0xff] (!%p10959_p11)   ;;  %v12874_v58 = vld [vmem:[%s16897_s3 + $0x1b0] ss:$36 sps:$4 sm:$0xff] (!%p10959_p11)   ;;  %v12875_v60 = vld [vmem:[%s16897_s3 + $0x1b8] ss:$36 sps:$4 sm:$0xff] (!%p10959_p11)  }
 0x30c   : > { %9205 = vmatprep.subr.bf16.mxu0 (!%p10959_p11), %v12858_v52  ;;  %9420 = vmatprep.subr.bf16.mxu1 (!%p10959_p11), %v12860_v53  ;;  %v12878_v62 = vld [vmem:[%s16897_s3 + $0x204] ss:$36 sps:$4 sm:$0xff] (!%p10959_p11)   ;;  %v12914_v44 = vld [vmem:[%s16897_s3 + $0x3b4] ss:$36 sps:$4 sm:$0xff] (!%p10959_p11)  }
 0x30d   : > { %v12916_v49 = vld [vmem:[%s16897_s3 + $0x3a8] ss:$36 sps:$4 sm:$0xff] (!%p10959_p11)   ;;  %v12917_v50 = vld [vmem:[%s16897_s3 + $0x3b0] ss:$36 sps:$4 sm:$0xff] (!%p10959_p11)  }
 0x30e   : > { %v12918_v51 = vld [vmem:[%s16897_s3 + $0x3f4] ss:$36 sps:$4 sm:$0xff] (!%p10959_p11)  }
 0x30f   : > { %9206 = vmatpush1.bf16.msra.mxu0 (!%p10959_p11), %v12862_v54  ;;  %9421 = vmatpush1.bf16.msra.mxu1 (!%p10959_p11), %v12863_v59  ;;  %v12920_v54 = vld [vmem:[%s16897_s3 + $0x3fc] ss:$36 sps:$4 sm:$0xff] (!%p10959_p11)  }
 0x310   : > { %9207 = vmatprep.subr.bf16.mxu0 (!%p10959_p11), %v12864_v43  ;;  %9422 = vmatprep.subr.bf16.mxu1 (!%p10959_p11), %v12866_v55  ;;  %v12922_v55 = vld [vmem:[%s16897_s3 + $0x3f0] ss:$36 sps:$4 sm:$0xff] (!%p10959_p11)  }
 0x313   : > { %9208 = vmatpush1.bf16.msra.mxu0 (!%p10959_p11), %v12868_v56  ;;  %9423 = vmatpush1.bf16.msra.mxu1 (!%p10959_p11), %v12869_v33 }
 0x314   : > { %9209 = vmatprep.subr.bf16.mxu0 (!%p10959_p11), %v12870_v42  ;;  %9424 = vmatprep.subr.bf16.mxu1 (!%p10959_p11), %v12872_v57  ;;  %v12923_v42 = vld [vmem:[%s16897_s3 + $0x3f8] ss:$36 sps:$4 sm:$0xff] (!%p10959_p11)  }
 0x315   : > { %v12924_v57 = vld [vmem:[%s16897_s3 + $0x43c] ss:$36 sps:$4 sm:$0xff] (!%p10959_p11)  }
 0x317   : > { %9210 = vmatpush1.bf16.msra.mxu0 (!%p10959_p11), %v12874_v58  ;;  %9425 = vmatpush1.bf16.msra.mxu1 (!%p10959_p11), %v12875_v60 }
 0x318   : > { %9211 = vmatprep.subr.bf16.mxu0 (!%p10959_p11), %v12876_v61  ;;  %9426 = vmatprep.subr.bf16.mxu1 (!%p10959_p11), %v12878_v62 }
 0x321   : > { %v11631_v63 = vpop.f32.mrb[8].mxu0  ;;  %v11653_v0 = vpop.f32.mrb[8].mxu1 }
 0x322   : > { %v11632_v1 = vpop.f32.mrb[9].mxu0  ;;  %v11654_v2 = vpop.f32.mrb[9].mxu1 }
 0x323   : > { %v11633_v3 = vadd.f32 %v11632_v1, %v11631_v63  ;;  %v11655_v4 = vadd.f32 %v11654_v2, %v11653_v0  ;;  %v11634_v5 = vpop.f32.mrb[10].mxu0  ;;  %v11656_v6 = vpop.f32.mrb[10].mxu1  ;;  %v12880_v63 = vld [vmem:[%s16897_s3 + $0x1f8] ss:$36 sps:$4 sm:$0xff] (!%p10959_p11)   ;;  %v12881_v0 = vld [vmem:[%s16897_s3 + $0x200] ss:$36 sps:$4 sm:$0xff] (!%p10959_p11)  }
 0x324   : > { %v11635_v7 = vpop.f32.mrb[11].mxu0  ;;  %v11657_v8 = vpop.f32.mrb[11].mxu1  ;;  %v12882_v1 = vld [vmem:[%s16897_s3 + $0x244] ss:$36 sps:$4 sm:$0xff] (!%p10959_p11)   ;;  %v12884_v2 = vld [vmem:[%s16897_s3 + $0x24c] ss:$36 sps:$4 sm:$0xff] (!%p10959_p11)   ;;  %9212 = vmatpush1.bf16.msra.mxu0 (!%p10959_p11), %v12880_v63  ;;  %9427 = vmatpush1.bf16.msra.mxu1 (!%p10959_p11), %v12881_v0 }
 0x325   : > { %v4732_v9 = vadd.f32 %v11655_v4, %v11633_v3  ;;  %v11636_v10 = vadd.f32 %v11635_v7, %v11634_v5  ;;  %v11658_v11 = vadd.f32 %v11657_v8, %v11656_v6  ;;  %v12886_v3 = vld [vmem:[%s16897_s3 + $0x240] ss:$36 sps:$4 sm:$0xff] (!%p10959_p11)   ;;  %v12887_v4 = vld [vmem:[%s16897_s3 + $0x248] ss:$36 sps:$4 sm:$0xff] (!%p10959_p11)   ;;  %v4882_v6 = vlaneseq (!%p10959_p11)  ;;  %9213 = vmatprep.subr.bf16.mxu0 (!%p10959_p11), %v12882_v1  ;;  %9428 = vmatprep.subr.bf16.mxu1 (!%p10959_p11), %v12884_v2  ;;  %v12890_v7 = vld [vmem:[%s16897_s3 + $0x294] ss:$36 sps:$4 sm:$0xff] (!%p10959_p11)  }
 0x326   : > { %v12888_v5 = vld [vmem:[%s16897_s3 + $0x28c] ss:$36 sps:$4 sm:$0xff] (!%p10959_p11)   ;;  %v12926_v63 = vld [vmem:[%s16897_s3 + $0x444] ss:$36 sps:$4 sm:$0xff] (!%p10959_p11)   ;;  %v12928_v2 = vld [vmem:[%s16897_s3 + $0x438] ss:$36 sps:$4 sm:$0xff] (!%p10959_p11)  }
 0x327   : > { %v4735_v12 = vadd.f32 %v11658_v11, %v11636_v10  ;;  %v12892_v8 = vld [vmem:[%s16897_s3 + $0x288] ss:$36 sps:$4 sm:$0xff] (!%p10959_p11)   ;;  %v12894_v10 = vld [vmem:[%s16897_s3 + $0x2d4] ss:$36 sps:$4 sm:$0xff] (!%p10959_p11)   ;;  %v14758_v11 = vshrl.u32 (!%p10959_p11), %v4882_v6, 7 }
 0x328   : > { %9214 = vmatpush1.bf16.msra.mxu0 (!%p10959_p11), %v12886_v3  ;;  %9429 = vmatpush1.bf16.msra.mxu1 (!%p10959_p11), %v12887_v4  ;;  %v12929_v3 = vld [vmem:[%s16897_s3 + $0x440] ss:$36 sps:$4 sm:$0xff] (!%p10959_p11)  }
 0x329   : > { %9215 = vmatprep.subr.bf16.mxu0 (!%p10959_p11), %v12888_v5  ;;  %9430 = vmatprep.subr.bf16.mxu1 (!%p10959_p11), %v12890_v7  ;;  %v12932_v4 = vld [vmem:[%s16897_s3 + $0x484] ss:$36 sps:$4 sm:$0xff] (!%p10959_p11)   ;;  %v12935_v5 = vld [vmem:[%s16897_s3 + $0x48c] ss:$36 sps:$4 sm:$0xff] (!%p10959_p11)  }
 0x32c   : > { %9216 = vmatpush1.bf16.msra.mxu0 (!%p10959_p11), %v12892_v8 }
 0x32d   : > { %9217 = vmatprep.subr.bf16.mxu0 (!%p10959_p11), %v12894_v10 }
 0x341   : > { %v11675_v13 = vpop.f32.mrb[12].mxu0  ;;  %v11697_v15 = vpop.f32.mrb[12].mxu1 }
 0x342   : > { %v11676_v16 = vpop.f32.mrb[13].mxu0  ;;  %v11698_v17 = vpop.f32.mrb[13].mxu1 }
 0x343   : > { %v11677_v14 = vadd.f32 %v11676_v16, %v11675_v13  ;;  %v11699_v22 = vadd.f32 %v11698_v17, %v11697_v15  ;;  %v11678_v18 = vpop.f32.mrb[14].mxu0  ;;  %v11700_v19 = vpop.f32.mrb[14].mxu1  ;;  %v12898_v13 = vld [vmem:[%s16897_s3 + $0x2d0] ss:$36 sps:$4 sm:$0xff] (!%p10959_p11)   ;;  %v12899_v15 = vld [vmem:[%s16897_s3 + $0x2d8] ss:$36 sps:$4 sm:$0xff] (!%p10959_p11)  }
 0x344   : > { %v11679_v20 = vpop.f32.mrb[15].mxu0  ;;  %v11701_v27 = vpop.f32.mrb[15].mxu1  ;;  %v12900_v16 = vld [vmem:[%s16897_s3 + $0x31c] ss:$36 sps:$4 sm:$0xff] (!%p10959_p11)   ;;  %v4888_v17 = vsub.s32 (!%p10959_p11), 1, %v14758_v11  ;;  %9218 = vmatpush1.bf16.msra.mxu0 (!%p10959_p11), %v12898_v13 }
 0x345   : > { %v4773_v38 = vadd.f32 %v11677_v14, %v4732_v9  ;;  %v11680_v21 = vadd.f32 %v11679_v20, %v11678_v18  ;;  %v11702_v23 = vadd.f32 %v11701_v27, %v11700_v19  ;;  %v12893_v9 = vld [vmem:[%s16897_s3 + $0x290] ss:$36 sps:$4 sm:$0xff] (!%p10959_p11)   ;;  %v4884_v14 = vsub.s32 (!%p10959_p11), 0, %v14758_v11  ;;  %v12904_v18 = vld [vmem:[%s16897_s3 + $0x318] ss:$36 sps:$4 sm:$0xff] (!%p10959_p11)   ;;  %v4861_v19 = vld [vmem:[#allocation2 + $0x8] sm:$0xff] (!%p10959_p11)  ;;  %9219 = vmatprep.subr.bf16.mxu0 (!%p10959_p11), %v12900_v16 }
 0x346   : > { %9431 = vmatpush1.bf16.msra.mxu1 (!%p10959_p11), %v12893_v9  ;;  %v4870_v20 = vld [vmem:[#allocation2 + $0x50] sm:$0xff] (!%p10959_p11)  ;;  %v14783_v27 = vld [vmem:[%s16896_s2] sm:$0xff] (!%p10959_p11) }
 0x347   : > { %v4814_v28 = vadd.f32 %v11699_v22, %v4773_v38  ;;  %v4776_v29 = vadd.f32 %v11680_v21, %v4735_v12  ;;  %4859 = sbr.rel (%p10959_p11) target bundleno = 1700 (0x6a4), region = 71  ;;  %v12896_v12 = vld [vmem:[%s16897_s3 + $0x2dc] ss:$36 sps:$4 sm:$0xff] (!%p10959_p11)   ;;  %v12902_v22 = vld [vmem:[%s16897_s3 + $0x324] ss:$36 sps:$4 sm:$0xff] (!%p10959_p11)  }
 0x348   : > { %9432 = vmatprep.subr.bf16.mxu1 (!%p10959_p11), %v12896_v12  ;;  %v12905_v38 = vld [vmem:[%s16897_s3 + $0x320] ss:$36 sps:$4 sm:$0xff] (!%p10959_p11)   ;;  %9220 = vmatpush1.bf16.msra.mxu0 (!%p10959_p11), %v12904_v18 }
 0x349   : > { %v4828_v31 = vadd.f32 %v4814_v28, %v326_v24  ;;  %v4817_v32 = vadd.f32 %v11702_v23, %v4776_v29  ;;  %v12906_v21 = vld [vmem:[%s16897_s3 + $0x364] ss:$36 sps:$4 sm:$0xff] (!%p10959_p11)   ;;  %v4889_v23 = vrot.slane (!%p10959_p11), %v14783_v27, %v4888_v17  ;;  %v4885_v24 = vrot.slane (!%p10959_p11), %v14783_v27, %v4884_v14  ;;  %v12908_v28 = vld [vmem:[%s16897_s3 + $0x36c] ss:$36 sps:$4 sm:$0xff] (!%p10959_p11)  }
 0x34a   : > { %9433 = vmatpush1.bf16.msra.mxu1 (!%p10959_p11), %v12899_v15  ;;  %v12910_v29 = vld [vmem:[%s16897_s3 + $0x360] ss:$36 sps:$4 sm:$0xff] (!%p10959_p11)   ;;  %9221 = vmatprep.subr.bf16.mxu0 (!%p10959_p11), %v12906_v21 }
 0x34b   : > { %4846 = vst [vmem:[#allocation2 + $0x40] sm:$0xff] %v4828_v31  ;;  %v4837_v36 = vadd.f32 %v4817_v32, %v335_v30  ;;  %9434 = vmatprep.subr.bf16.mxu1 (!%p10959_p11), %v12902_v22  ;;  %v14803_v30 = vadd.f32 (!%p10959_p11), %v4889_v23, %v4861_v19  ;;  %v14805_v31 = vadd.f32 (!%p10959_p11), %v4889_v23, %v4870_v20  ;;  %v4860_v32 = vld [vmem:[#allocation2] sm:$0xff] (!%p10959_p11) }
 0x34c   : > { %v14810_v25 = vadd.f32 (!%p10959_p11), %v4885_v24, %v4860_v32  ;;  %9222 = vmatpush1.bf16.msra.mxu0 (!%p10959_p11), %v12910_v29  ;;  %v12933_v29 = vld [vmem:[%s16897_s3 + $0x488] ss:$36 sps:$4 sm:$0xff] (!%p10959_p11)   ;;  %v12941_v32 = vld [vmem:[%s16897_s3 + $0x4d4] ss:$36 sps:$4 sm:$0xff] (!%p10959_p11)  }
 0x34d   : > { %4855 = vst [vmem:[#allocation2 + $0x88] sm:$0xff] %v4837_v36  ;;  %v4869_v36 = vld [vmem:[#allocation2 + $0x48] sm:$0xff] (!%p10959_p11)  ;;  %v4964_v40 = vmul.f32 (!%p10959_p11), 0.044715, %v14803_v30  ;;  %v4973_v41 = vmul.f32 (!%p10959_p11), 0.044715, %v14805_v31  ;;  %9223 = vmatprep.subr.bf16.mxu0 (!%p10959_p11), %v12912_v39 }
 0x34e   : > { %v14812_v26 = vadd.f32 %v4885_v24, %v4869_v36  ;;  %9435 = vmatpush1.bf16.msra.mxu1 %v12905_v38  ;;  %v4963_v45 = vmul.f32 0.044715, %v14810_v25  ;;  %v4946_v6 = vmul.f32 0.5, %v14803_v30  ;;  %v4955_v8 = vmul.f32 0.5, %v14805_v31  ;;  %v12930_v24 = vld [vmem:[%s16897_s3 + $0x480] ss:$36 sps:$4 sm:$0xff]  }
 0x34f   : > { %9436 = vmatprep.subr.bf16.mxu1 %v12908_v28  ;;  %v4982_v47 = vmul.f32 %v4964_v40, %v14803_v30  ;;  %v4991_v48 = vmul.f32 %v4973_v41, %v14805_v31  ;;  %v4945_v12 = vmul.f32 0.5, %v14810_v25  ;;  %v12936_v36 = vld [vmem:[%s16897_s3 + $0x4c8] ss:$36 sps:$4 sm:$0xff]   ;;  %v12942_v39 = vld [vmem:[%s16897_s3 + $0x510] ss:$36 sps:$4 sm:$0xff]   ;;  %v4896_v41 = vsub.s32 3, %v14758_v11 }
 0x350   : > { %v4972_v46 = vmul.f32 0.044715, %v14812_v26  ;;  %v4981_v34 = vmul.f32 %v4963_v45, %v14810_v25  ;;  %9224 = vmatpush1.bf16.msra.mxu0 %v12916_v49  ;;  %v4954_v16 = vmul.f32 0.5, %v14812_v26  ;;  %v12945_v40 = vld [vmem:[%s16897_s3 + $0x518] ss:$36 sps:$4 sm:$0xff]   ;;  %v4892_v49 = vsub.s32 2, %v14758_v11 }
 0x351   : > { %v5000_v52 = vmul.f32 %v4982_v47, %v14803_v30  ;;  %v5009_v53 = vmul.f32 %v4991_v48, %v14805_v31  ;;  %9225 = vmatprep.subr.bf16.mxu0 %v12918_v51  ;;  %v12953_v45 = vld [vmem:[%s16897_s3 + $0x564] ss:$36 sps:$4 sm:$0xff]   ;;  %v4897_v48 = vrot.slane %v14783_v27, %v4896_v41  ;;  %v4863_v51 = vld [vmem:[#allocation2 + $0x18] sm:$0xff] }
 0x352   : > { %v4990_v35 = vmul.f32 %v4972_v46, %v14812_v26  ;;  %9437 = vmatpush1.bf16.msra.mxu1 %v12911_v37  ;;  %v4999_v59 = vmul.f32 %v4981_v34, %v14810_v25  ;;  %v12939_v37 = vld [vmem:[%s16897_s3 + $0x4d0] ss:$36 sps:$4 sm:$0xff]   ;;  %v12948_v46 = vld [vmem:[%s16897_s3 + $0x558] ss:$36 sps:$4 sm:$0xff]   ;;  %v12951_v47 = vld [vmem:[%s16897_s3 + $0x560] ss:$36 sps:$4 sm:$0xff]  }
 0x353   : > { %9438 = vmatprep.subr.bf16.mxu1 %v12914_v44  ;;  %v5018_v56 = vadd.f32 %v5000_v52, %v14803_v30  ;;  %v5027_v33 = vadd.f32 %v5009_v53, %v14805_v31  ;;  %v12938_v31 = vld [vmem:[%s16897_s3 + $0x4cc] ss:$36 sps:$4 sm:$0xff]   ;;  %v12950_v44 = vld [vmem:[%s16897_s3 + $0x55c] ss:$36 sps:$4 sm:$0xff]   ;;  %v12956_v34 = vld [vmem:[%s16897_s3 + $0x5a4] ss:$36 sps:$4 sm:$0xff]  }
 0x354   : > { %v5008_v43 = vmul.f32 %v4990_v35, %v14812_v26  ;;  %v5017_v58 = vadd.f32 %v4999_v59, %v14810_v25  ;;  %9226 = vmatpush1.bf16.msra.mxu0 %v12922_v55  ;;  %v12944_v25 = vld [vmem:[%s16897_s3 + $0x514] ss:$36 sps:$4 sm:$0xff]   ;;  %v12959_v35 = vld [vmem:[%s16897_s3 + $0x5ac] ss:$36 sps:$4 sm:$0xff]   ;;  %v4872_v52 = vld [vmem:[#allocation2 + $0x60] sm:$0xff]  ;;  %v14946_v59 = vadd.f32 %v4897_v48, %v4863_v51  ;;  %v4893_v55 = vrot.slane %v14783_v27, %v4892_v49 }
 0x355   : > { %v5036_v61 = vmul.f32 0.7978846, %v5018_v56  ;;  %v5045_v62 = vmul.f32 0.7978846, %v5027_v33  ;;  %9227 = vmatprep.subr.bf16.mxu0 %v12924_v57  ;;  %v12957_v53 = vld [vmem:[%s16897_s3 + $0x5a8] ss:$36 sps:$4 sm:$0xff]  }
 0x356   : > { %v5026_v60 = vadd.f32 %v5008_v43, %v14812_v26  ;;  %9439 = vmatpush1.bf16.msra.mxu1 %v12917_v50  ;;  %v5035_v0 = vmul.f32 0.7978846, %v5017_v58  ;;  %v12947_v26 = vld [vmem:[%s16897_s3 + $0x51c] ss:$36 sps:$4 sm:$0xff]   ;;  %v14948_v43 = vadd.f32 %v4897_v48, %v4872_v52  ;;  %v12965_v56 = vld [vmem:[%s16897_s3 + $0x5f4] ss:$36 sps:$4 sm:$0xff]  }
 0x357   : > { %9440 = vmatprep.subr.bf16.mxu1 %v12920_v54  ;;  %13770 = vtanh.f32 %v5036_v61  ;;  %v12954_v50 = vld [vmem:[%s16897_s3 + $0x5a0] ss:$36 sps:$4 sm:$0xff]   ;;  %v12962_v54 = vld [vmem:[%s16897_s3 + $0x5ec] ss:$36 sps:$4 sm:$0xff]   ;;  %v4871_v61 = vld [vmem:[#allocation2 + $0x58] sm:$0xff] }
 0x358   : > { %v5044_v1 = vmul.f32 0.7978846, %v5026_v60  ;;  %13772 = vtanh.f32 %v5045_v62  ;;  %9228 = vmatpush1.bf16.msra.mxu0 %v12928_v2  ;;  %v12960_v33 = vld [vmem:[%s16897_s3 + $0x5e8] ss:$36 sps:$4 sm:$0xff]   ;;  %v4975_v57 = vmul.f32 0.044715, %v14948_v43 }
 0x359   : > { %13774 = vtanh.f32 %v5035_v0  ;;  %9240 = vmatprep.subr.bf16.mxu0 %v12932_v4  ;;  %v12963_v58 = vld [vmem:[%s16897_s3 + $0x5f0] ss:$36 sps:$4 sm:$0xff]   ;;  %v12971_v2 = vld [vmem:[%s16897_s3 + $0x63c] ss:$36 sps:$4 sm:$0xff]  }
 0x35a   : > { %9441 = vmatpush1.bf16.msra.mxu1 %v12923_v42  ;;  %13776 = vtanh.f32 %v5044_v1  ;;  %v4966_v42 = vmul.f32 0.044715, %v14946_v59  ;;  %v4862_v60 = vld [vmem:[#allocation2 + $0x10] sm:$0xff]  ;;  %v4993_v0 = vmul.f32 %v4975_v57, %v14948_v43  ;;  %v12993_v52 = vld [vmem:[%s16897_s3 + $0x758] ss:$36 sps:$4 sm:$0xff]  }
 0x35b   : > { %9442 = vmatprep.subr.bf16.mxu1 %v12926_v63  ;;  %v12968_v62 = vld [vmem:[%s16897_s3 + $0x634] ss:$36 sps:$4 sm:$0xff]   ;;  %v14969_v1 = vadd.f32 %v4893_v55, %v4862_v60  ;;  %v13004_v57 = vld [vmem:[%s16897_s3 + $0x7e4] ss:$36 sps:$4 sm:$0xff]   ;;  %v13007_v60 = vld [vmem:[%s16897_s3 + $0x7ec] ss:$36 sps:$4 sm:$0xff]  }
 0x35c   : > { %v4984_v63 = vmul.f32 %v4966_v42, %v14946_v59  ;;  %v12990_v51 = vld [vmem:[%s16897_s3 + $0x750] ss:$36 sps:$4 sm:$0xff]   ;;  %v12999_v42 = vld [vmem:[%s16897_s3 + $0x7a0] ss:$36 sps:$4 sm:$0xff]  }
 0x35e   : > { %9443 = vmatpush1.bf16.msra.mxu1 %v12929_v3  ;;  %v14974_v3 = vadd.f32 %v4893_v55, %v4871_v61  ;;  %v5002_v4 = vmul.f32 %v4984_v63, %v14946_v59  ;;  %v13002_v61 = vld [vmem:[%s16897_s3 + $0x7e0] ss:$36 sps:$4 sm:$0xff]   ;;  %v13010_v63 = vld [vmem:[%s16897_s3 + $0x82c] ss:$36 sps:$4 sm:$0xff]  }
 0x35f   : > { %9455 = vmatprep.subr.bf16.mxu1 %v12935_v5  ;;  %v5011_v5 = vmul.f32 %v4993_v0, %v14948_v43  ;;  %v13013_v0 = vld [vmem:[%s16897_s3 + $0x834] ss:$36 sps:$4 sm:$0xff]  }
 0x361   : > { %v13771_v7 = vpop.eup %13770 }
 0x362   : > { %v13773_v9 = vpop.eup %13772  ;;  %v5072_v10 = vadd.f32 1.0, %v13771_v7  ;;  %v4974_v7 = vmul.f32 0.044715, %v14974_v3 }
 0x363   : > { %v13775_v13 = vpop.eup %13774  ;;  %v5081_v15 = vadd.f32 1.0, %v13773_v9  ;;  %v12969_v9 = vld [vmem:[%s16897_s3 + $0x638] ss:$36 sps:$4 sm:$0xff]  }
 0x364   : > { %v13777_v22 = vpop.eup %13776  ;;  %v5090_v18 = vmul.f32 %v5072_v10, %v4946_v6  ;;  %v5071_v19 = vadd.f32 1.0, %v13775_v13  ;;  %v4965_v6 = vmul.f32 0.044715, %v14969_v1  ;;  %v5020_v10 = vadd.f32 %v5002_v4, %v14946_v59  ;;  %v12974_v13 = vld [vmem:[%s16897_s3 + $0x67c] ss:$36 sps:$4 sm:$0xff]  }
 0x365   : > { %v5099_v20 = vmul.f32 %v5081_v15, %v4955_v8  ;;  %v5080_v38 = vadd.f32 1.0, %v13777_v22  ;;  %v12966_v8 = vld [vmem:[%s16897_s3 + $0x630] ss:$36 sps:$4 sm:$0xff]   ;;  %v12977_v15 = vld [vmem:[%s16897_s3 + $0x684] ss:$36 sps:$4 sm:$0xff]  }
 0x366   : > { %v5089_v21 = vmul.f32 %v5071_v19, %v4945_v12  ;;  %v5029_v12 = vadd.f32 %v5011_v5, %v14948_v43  ;;  %v5038_v22 = vmul.f32 0.7978846, %v5020_v10  ;;  %v4992_v19 = vmul.f32 %v4974_v7, %v14974_v3  ;;  %v13008_v4 = vld [vmem:[%s16897_s3 + $0x828] ss:$36 sps:$4 sm:$0xff]   ;;  %v13011_v5 = vld [vmem:[%s16897_s3 + $0x830] ss:$36 sps:$4 sm:$0xff]  }
 0x367   : > { %v14876_v23 = vpack.c.bf16 %v5099_v20, %v5090_v18  ;;  %v5098_v28 = vmul.f32 %v5080_v38, %v4954_v16  ;;  %v4983_v16 = vmul.f32 %v4965_v6, %v14969_v1  ;;  %v12972_v20 = vld [vmem:[%s16897_s3 + $0x678] ss:$36 sps:$4 sm:$0xff]   ;;  %v12975_v38 = vld [vmem:[%s16897_s3 + $0x680] ss:$36 sps:$4 sm:$0xff]  }
 0x368   : > { %v5047_v18 = vmul.f32 0.7978846, %v5029_v12  ;;  %13778 = vtanh.f32 %v5038_v22  ;;  %v13016_v7 = vld [vmem:[%s16897_s3 + $0x874] ss:$36 sps:$4 sm:$0xff]   ;;  %v4904_v12 = vsub.s32 5, %v14758_v11 }
 0x369   : > { %9229 = vmatprep.mubr.bf16.mxu0 %v14876_v23  ;;  %9444 = vmatprep.mubr.bf16.mxu1 %v14876_v23  ;;  %v14886_v30 = vpack.c.bf16 %v5098_v28, %v5089_v21  ;;  %v12980_v21 = vld [vmem:[%s16897_s3 + $0x6c4] ss:$36 sps:$4 sm:$0xff]   ;;  %v5001_v28 = vmul.f32 %v4983_v16, %v14969_v1  ;;  %v13017_v10 = vld [vmem:[%s16897_s3 + $0x878] ss:$36 sps:$4 sm:$0xff]  }
 0x36a   : > { %13780 = vtanh.f32 %v5047_v18  ;;  %v13022_v18 = vld [vmem:[%s16897_s3 + $0x8bc] ss:$36 sps:$4 sm:$0xff]  }
 0x36b   : > { %9230 = vmatmul.mubr.bf16.vlgmr.msra.gmra.mrb[0].mxu0 %v14886_v30  ;;  %9445 = vmatmul.mubr.bf16.vlgmr.msra.gmra.mrb[0].mxu1 %v14886_v30 }
 0x36c   : > { %9241 = vmatpush1.bf16.msra.mxu0 %v12930_v24  ;;  %9456 = vmatpush1.bf16.msra.mxu1 %v12933_v29  ;;  %v12983_v24 = vld [vmem:[%s16897_s3 + $0x6cc] ss:$36 sps:$4 sm:$0xff]   ;;  %v5010_v29 = vmul.f32 %v4992_v19, %v14974_v3  ;;  %v13025_v19 = vld [vmem:[%s16897_s3 + $0x8c4] ss:$36 sps:$4 sm:$0xff]  }
 0x36d   : > { %9242 = vmatprep.subr.bf16.mxu0 %v12938_v31  ;;  %9457 = vmatprep.subr.bf16.mxu1 %v12941_v32  ;;  %v12978_v31 = vld [vmem:[%s16897_s3 + $0x6c0] ss:$36 sps:$4 sm:$0xff]   ;;  %v12981_v32 = vld [vmem:[%s16897_s3 + $0x6c8] ss:$36 sps:$4 sm:$0xff]  }
 0x370   : > { %9243 = vmatpush1.bf16.msra.mxu0 %v12936_v36  ;;  %9458 = vmatpush1.bf16.msra.mxu1 %v12939_v37  ;;  %v12986_v36 = vld [vmem:[%s16897_s3 + $0x70c] ss:$36 sps:$4 sm:$0xff]   ;;  %v12989_v37 = vld [vmem:[%s16897_s3 + $0x714] ss:$36 sps:$4 sm:$0xff]  }
 0x371   : > { %9244 = vmatprep.subr.bf16.mxu0 %v12944_v25  ;;  %9459 = vmatprep.subr.bf16.mxu1 %v12947_v26  ;;  %v5019_v25 = vadd.f32 %v5001_v28, %v14969_v1  ;;  %v12984_v26 = vld [vmem:[%s16897_s3 + $0x708] ss:$36 sps:$4 sm:$0xff]  }
 0x372   : > { %v13779_v48 = vpop.eup %13778  ;;  %v13031_v28 = vld [vmem:[%s16897_s3 + $0x90c] ss:$36 sps:$4 sm:$0xff]  }
 0x374   : > { %9245 = vmatpush1.bf16.msra.mxu0 %v12942_v39  ;;  %9460 = vmatpush1.bf16.msra.mxu1 %v12945_v40  ;;  %v5028_v39 = vadd.f32 %v5010_v29, %v14974_v3  ;;  %v12987_v40 = vld [vmem:[%s16897_s3 + $0x710] ss:$36 sps:$4 sm:$0xff]   ;;  %v4865_v29 = vld [vmem:[#allocation2 + $0x28] sm:$0xff] }
 0x375   : > { %9246 = vmatprep.subr.bf16.mxu0 %v12950_v44  ;;  %9461 = vmatprep.subr.bf16.mxu1 %v12953_v45  ;;  %v12992_v44 = vld [vmem:[%s16897_s3 + $0x754] ss:$36 sps:$4 sm:$0xff]   ;;  %v12995_v45 = vld [vmem:[%s16897_s3 + $0x75c] ss:$36 sps:$4 sm:$0xff]  }
 0x378   : > { %9247 = vmatpush1.bf16.msra.mxu0 %v12948_v46  ;;  %9462 = vmatpush1.bf16.msra.mxu1 %v12951_v47  ;;  %v4948_v46 = vmul.f32 0.5, %v14946_v59  ;;  %v5037_v47 = vmul.f32 0.7978846, %v5019_v25 }
 0x379   : > { %9248 = vmatprep.subr.bf16.mxu0 %v12956_v34  ;;  %9463 = vmatprep.subr.bf16.mxu1 %v12959_v35  ;;  %v4957_v34 = vmul.f32 0.5, %v14948_v43  ;;  %v5046_v35 = vmul.f32 0.7978846, %v5028_v39  ;;  %v13001_v43 = vld [vmem:[%s16897_s3 + $0x7a4] ss:$36 sps:$4 sm:$0xff]  }
 0x37a   : > { %13782 = vtanh.f32 %v5037_v47 }
 0x37b   : > { %13784 = vtanh.f32 %v5046_v35 }
 0x37c   : > { %9249 = vmatpush1.bf16.msra.mxu0 %v12954_v50  ;;  %9464 = vmatpush1.bf16.msra.mxu1 %v12957_v53  ;;  %v13781_v50 = vpop.eup %13780  ;;  %v5074_v53 = vadd.f32 1.0, %v13779_v48  ;;  %v13032_v48 = vld [vmem:[%s16897_s3 + $0x948] ss:$36 sps:$4 sm:$0xff]  }
 0x37d   : > { %9250 = vmatprep.subr.bf16.mxu0 %v12962_v54  ;;  %9465 = vmatprep.subr.bf16.mxu1 %v12965_v56  ;;  %v12998_v54 = vld [vmem:[%s16897_s3 + $0x79c] ss:$36 sps:$4 sm:$0xff]   ;;  %v5083_v59 = vadd.f32 1.0, %v13781_v50 }
 0x37e   : > { %v5092_v55 = vmul.f32 %v5074_v53, %v4948_v46  ;;  %v13038_v53 = vld [vmem:[%s16897_s3 + $0x990] ss:$36 sps:$4 sm:$0xff]  }
 0x37f   : > { %v5101_v56 = vmul.f32 %v5083_v59, %v4957_v34  ;;  %v13035_v34 = vld [vmem:[%s16897_s3 + $0x950] ss:$36 sps:$4 sm:$0xff]  }
 0x380   : > { %9251 = vmatpush1.bf16.msra.mxu0 %v12960_v33  ;;  %9466 = vmatpush1.bf16.msra.mxu1 %v12963_v58  ;;  %v12996_v33 = vld [vmem:[%s16897_s3 + $0x798] ss:$36 sps:$4 sm:$0xff]  }
 0x381   : > { %9252 = vmatprep.subr.bf16.mxu0 %v12968_v62  ;;  %9467 = vmatprep.subr.bf16.mxu1 %v12971_v2  ;;  %v15059_v58 = vpack.c.bf16 %v5101_v56, %v5092_v55  ;;  %v13005_v62 = vld [vmem:[%s16897_s3 + $0x7e8] ss:$36 sps:$4 sm:$0xff]   ;;  %v13046_v55 = vld [vmem:[%s16897_s3 + $0x9dc] ss:$36 sps:$4 sm:$0xff]  }
 0x383   : > { %9272 = vmatprep.mubr.bf16.mxu0 %v15059_v58  ;;  %9487 = vmatprep.mubr.bf16.mxu1 %v15059_v58 }
 0x384   : > { %9253 = vmatpush1.bf16.msra.mxu0 %v12966_v8  ;;  %9468 = vmatpush1.bf16.msra.mxu1 %v12969_v9  ;;  %v13783_v2 = vpop.eup %13782  ;;  %v13019_v8 = vld [vmem:[%s16897_s3 + $0x87c] ss:$36 sps:$4 sm:$0xff]   ;;  %v13014_v9 = vld [vmem:[%s16897_s3 + $0x870] ss:$36 sps:$4 sm:$0xff]  }
 0x385   : > { %9254 = vmatprep.subr.bf16.mxu0 %v12974_v13  ;;  %9469 = vmatprep.subr.bf16.mxu1 %v12977_v15  ;;  %v13785_v6 = vpop.eup %13784  ;;  %v4947_v13 = vmul.f32 0.5, %v14969_v1  ;;  %v4956_v15 = vmul.f32 0.5, %v14974_v3  ;;  %v5073_v16 = vadd.f32 1.0, %v13783_v2  ;;  %v4905_v1 = vrot.slane %v14783_v27, %v4904_v12  ;;  %v13020_v3 = vld [vmem:[%s16897_s3 + $0x8b8] ss:$36 sps:$4 sm:$0xff]   ;;  %v4864_v2 = vld [vmem:[#allocation2 + $0x20] sm:$0xff] }
 0x386   : > { %v5082_v22 = vadd.f32 1.0, %v13785_v6  ;;  %v13053_v6 = vld [vmem:[%s16897_s3 + $0xa28] ss:$36 sps:$4 sm:$0xff]  }
 0x388   : > { %9255 = vmatpush1.bf16.msra.mxu0 %v12972_v20  ;;  %9470 = vmatpush1.bf16.msra.mxu1 %v12975_v38  ;;  %v13023_v20 = vld [vmem:[%s16897_s3 + $0x8c0] ss:$36 sps:$4 sm:$0xff]   ;;  %v5091_v38 = vmul.f32 %v5073_v16, %v4947_v13  ;;  %v13059_v13 = vld [vmem:[%s16897_s3 + $0xa70] ss:$36 sps:$4 sm:$0xff]  }
 0x389   : > { %9256 = vmatprep.subr.bf16.mxu0 %v12980_v21  ;;  %9471 = vmatprep.subr.bf16.mxu1 %v12983_v24  ;;  %v5100_v21 = vmul.f32 %v5082_v22, %v4956_v15  ;;  %v13028_v24 = vld [vmem:[%s16897_s3 + $0x904] ss:$36 sps:$4 sm:$0xff]   ;;  %v13064_v22 = vld [vmem:[%s16897_s3 + $0xab4] ss:$36 sps:$4 sm:$0xff]  }
 0x38b   : > { %v15127_v25 = vpack.c.bf16 %v5100_v21, %v5091_v38 }
 0x38c   : > { %9257 = vmatpush1.bf16.msra.mxu0 %v12978_v31  ;;  %9472 = vmatpush1.bf16.msra.mxu1 %v12981_v32  ;;  %v4874_v31 = vld [vmem:[#allocation2 + $0x70] sm:$0xff]  ;;  %v15120_v32 = vadd.f32 %v4905_v1, %v4865_v29  ;;  %v13065_v29 = vld [vmem:[%s16897_s3 + $0xab8] ss:$36 sps:$4 sm:$0xff]  }
 0x38d   : > { %9258 = vmatprep.subr.bf16.mxu0 %v12986_v36  ;;  %9473 = vmatprep.subr.bf16.mxu1 %v12989_v37  ;;  %v15122_v36 = vadd.f32 %v4905_v1, %v4874_v31  ;;  %v13026_v37 = vld [vmem:[%s16897_s3 + $0x900] ss:$36 sps:$4 sm:$0xff]  }
 0x38e   : > { %v4968_v39 = vmul.f32 0.044715, %v15120_v32  ;;  %v4950_v15 = vmul.f32 0.5, %v15120_v32  ;;  %v13070_v31 = vld [vmem:[%s16897_s3 + $0xafc] ss:$36 sps:$4 sm:$0xff]  }
 0x390   : > { %9259 = vmatpush1.bf16.msra.mxu0 %v12984_v26  ;;  %9474 = vmatpush1.bf16.msra.mxu1 %v12987_v40  ;;  %v13029_v26 = vld [vmem:[%s16897_s3 + $0x908] ss:$36 sps:$4 sm:$0xff]   ;;  %v4977_v40 = vmul.f32 0.044715, %v15122_v36  ;;  %v4986_v46 = vmul.f32 %v4968_v39, %v15120_v32 }
 0x391   : > { %9260 = vmatprep.subr.bf16.mxu0 %v12992_v44  ;;  %9475 = vmatprep.subr.bf16.mxu1 %v12995_v45  ;;  %v13034_v44 = vld [vmem:[%s16897_s3 + $0x94c] ss:$36 sps:$4 sm:$0xff]   ;;  %v13037_v45 = vld [vmem:[%s16897_s3 + $0x954] ss:$36 sps:$4 sm:$0xff]  }
 0x392   : > { %v4995_v47 = vmul.f32 %v4977_v40, %v15122_v36  ;;  %v5004_v35 = vmul.f32 %v4986_v46, %v15120_v32  ;;  %v13068_v40 = vld [vmem:[%s16897_s3 + $0xaf8] ss:$36 sps:$4 sm:$0xff]   ;;  %v13079_v46 = vld [vmem:[%s16897_s3 + $0xb4c] ss:$36 sps:$4 sm:$0xff]  }
 0x394   : > { %9261 = vmatpush1.bf16.msra.mxu0 %v12990_v51  ;;  %9476 = vmatpush1.bf16.msra.mxu1 %v12993_v52  ;;  %v5013_v50 = vmul.f32 %v4995_v47, %v15122_v36  ;;  %v13040_v51 = vld [vmem:[%s16897_s3 + $0x994] ss:$36 sps:$4 sm:$0xff]   ;;  %v13043_v52 = vld [vmem:[%s16897_s3 + $0x99c] ss:$36 sps:$4 sm:$0xff]  }
 0x395   : > { %9262 = vmatprep.subr.bf16.mxu0 %v12998_v54  ;;  %9477 = vmatprep.subr.bf16.mxu1 %v13001_v43  ;;  %v5022_v54 = vadd.f32 %v5004_v35, %v15120_v32  ;;  %v13041_v43 = vld [vmem:[%s16897_s3 + $0x998] ss:$36 sps:$4 sm:$0xff]   ;;  %v13077_v35 = vld [vmem:[%s16897_s3 + $0xb48] ss:$36 sps:$4 sm:$0xff]  }
 0x396   : > { %v5031_v59 = vadd.f32 %v5013_v50, %v15122_v36  ;;  %v13082_v50 = vld [vmem:[%s16897_s3 + $0xb8c] ss:$36 sps:$4 sm:$0xff]  }
 0x397   : > { %v5040_v56 = vmul.f32 0.7978846, %v5022_v54  ;;  %v13080_v54 = vld [vmem:[%s16897_s3 + $0xb88] ss:$36 sps:$4 sm:$0xff]  }
 0x398   : > { %9263 = vmatpush1.bf16.msra.mxu0 %v12996_v33  ;;  %9478 = vmatpush1.bf16.msra.mxu1 %v12999_v42  ;;  %v5049_v33 = vmul.f32 0.7978846, %v5031_v59  ;;  %v13049_v42 = vld [vmem:[%s16897_s3 + $0x9e4] ss:$36 sps:$4 sm:$0xff]   ;;  %v13083_v59 = vld [vmem:[%s16897_s3 + $0xb90] ss:$36 sps:$4 sm:$0xff]  }
 0x399   : > { %9264 = vmatprep.subr.bf16.mxu0 %v13004_v57  ;;  %9479 = vmatprep.subr.bf16.mxu1 %v13007_v60  ;;  %v4900_v57 = vsub.s32 4, %v14758_v11  ;;  %13786 = vtanh.f32 %v5040_v56  ;;  %v13044_v60 = vld [vmem:[%s16897_s3 + $0x9d8] ss:$36 sps:$4 sm:$0xff]  }
 0x39a   : > { %13788 = vtanh.f32 %v5049_v33  ;;  %v13091_v56 = vld [vmem:[%s16897_s3 + $0xbdc] ss:$36 sps:$4 sm:$0xff]  }
 0x39c   : > { %9265 = vmatpush1.bf16.msra.mxu0 %v13002_v61  ;;  %9480 = vmatpush1.bf16.msra.mxu1 %v13005_v62  ;;  %v13047_v61 = vld [vmem:[%s16897_s3 + $0x9e0] ss:$36 sps:$4 sm:$0xff]  }
 0x39d   : > { %9266 = vmatprep.subr.bf16.mxu0 %v13010_v63  ;;  %9481 = vmatprep.subr.bf16.mxu1 %v13013_v0  ;;  %v13052_v62 = vld [vmem:[%s16897_s3 + $0xa24] ss:$36 sps:$4 sm:$0xff]   ;;  %v13055_v63 = vld [vmem:[%s16897_s3 + $0xa2c] ss:$36 sps:$4 sm:$0xff]   ;;  %v4901_v0 = vrot.slane %v14783_v27, %v4900_v57  ;;  %v13061_v27 = vld [vmem:[%s16897_s3 + $0xa74] ss:$36 sps:$4 sm:$0xff]  }
 0x3a0   : > { %9267 = vmatpush1.bf16.msra.mxu0 %v13008_v4  ;;  %9482 = vmatpush1.bf16.msra.mxu1 %v13011_v5  ;;  %v13050_v4 = vld [vmem:[%s16897_s3 + $0xa20] ss:$36 sps:$4 sm:$0xff]   ;;  %v4873_v5 = vld [vmem:[#allocation2 + $0x68] sm:$0xff] }
 0x3a1   : > { %9268 = vmatprep.subr.bf16.mxu0 %v13016_v7  ;;  %9483 = vmatprep.subr.bf16.mxu1 %v13019_v8  ;;  %v13058_v7 = vld [vmem:[%s16897_s3 + $0xa6c] ss:$36 sps:$4 sm:$0xff]   ;;  %v15200_v8 = vadd.f32 %v4901_v0, %v4864_v2  ;;  %v13097_v2 = vld [vmem:[%s16897_s3 + $0xc24] ss:$36 sps:$4 sm:$0xff]  }
 0x3a3   : > { %v13787_v16 = vpop.eup %13786 }
 0x3a4   : > { %9269 = vmatpush1.bf16.msra.mxu0 %v13014_v9  ;;  %9484 = vmatpush1.bf16.msra.mxu1 %v13017_v10  ;;  %v15202_v9 = vadd.f32 %v4901_v0, %v4873_v5  ;;  %v13056_v10 = vld [vmem:[%s16897_s3 + $0xa68] ss:$36 sps:$4 sm:$0xff]   ;;  %v13789_v1 = vpop.eup %13788  ;;  %v13095_v5 = vld [vmem:[%s16897_s3 + $0xc20] ss:$36 sps:$4 sm:$0xff]  }
 0x3a5   : > { %9270 = vmatprep.subr.bf16.mxu0 %v13022_v18  ;;  %9485 = vmatprep.subr.bf16.mxu1 %v13025_v19  ;;  %v13067_v18 = vld [vmem:[%s16897_s3 + $0xabc] ss:$36 sps:$4 sm:$0xff]   ;;  %v4959_v19 = vmul.f32 0.5, %v15122_v36  ;;  %v5085_v38 = vadd.f32 1.0, %v13789_v1  ;;  %v13073_v36 = vld [vmem:[%s16897_s3 + $0xb04] ss:$36 sps:$4 sm:$0xff]  }
 0x3a6   : > { %v4976_v21 = vmul.f32 0.044715, %v15202_v9 }
 0x3a7   : > { %v5103_v32 = vmul.f32 %v5085_v38, %v4959_v19  ;;  %v13101_v19 = vld [vmem:[%s16897_s3 + $0xc68] ss:$36 sps:$4 sm:$0xff]  }
 0x3a8   : > { %9271 = vmatpush1.bf16.msra.mxu0 %v13020_v3  ;;  %9486 = vmatpush1.bf16.msra.mxu1 %v13023_v20  ;;  %v5076_v3 = vadd.f32 1.0, %v13787_v16  ;;  %v4967_v20 = vmul.f32 0.044715, %v15200_v8  ;;  %v4994_v39 = vmul.f32 %v4976_v21, %v15202_v9 }
 0x3a9   : > { %9283 = vmatprep.subr.bf16.mxu0 %v13028_v24  ;;  %9498 = vmatprep.subr.bf16.mxu1 %v13031_v28  ;;  %v13062_v24 = vld [vmem:[%s16897_s3 + $0xab0] ss:$36 sps:$4 sm:$0xff]  }
 0x3aa   : > { %v5094_v28 = vmul.f32 %v5076_v3, %v4950_v15  ;;  %v13106_v3 = vld [vmem:[%s16897_s3 + $0xcac] ss:$36 sps:$4 sm:$0xff]  }
 0x3ab   : > { %9273 = vmatmul.mubr.bf16.vlgmr.msra.gmra.mrb[0].mxu0 %v15127_v25  ;;  %9488 = vmatmul.mubr.bf16.vlgmr.msra.gmra.mrb[0].mxu1 %v15127_v25 }
 0x3ac   : > { %9284 = vmatpush1.bf16.msra.mxu0 %v13026_v37  ;;  %9499 = vmatpush1.bf16.msra.mxu1 %v13029_v26  ;;  %v4985_v37 = vmul.f32 %v4967_v20, %v15200_v8  ;;  %v15233_v26 = vpack.c.bf16 %v5103_v32, %v5094_v28  ;;  %v13109_v20 = vld [vmem:[%s16897_s3 + $0xcb4] ss:$36 sps:$4 sm:$0xff]   ;;  %v13104_v28 = vld [vmem:[%s16897_s3 + $0xca8] ss:$36 sps:$4 sm:$0xff]  }
 0x3ad   : > { %9285 = vmatprep.subr.bf16.mxu0 %v13034_v44  ;;  %9500 = vmatprep.subr.bf16.mxu1 %v13037_v45  ;;  %v13071_v44 = vld [vmem:[%s16897_s3 + $0xb00] ss:$36 sps:$4 sm:$0xff]   ;;  %v13107_v32 = vld [vmem:[%s16897_s3 + $0xcb0] ss:$36 sps:$4 sm:$0xff]  }
 0x3ae   : > { %v13076_v45 = vld [vmem:[%s16897_s3 + $0xb44] ss:$36 sps:$4 sm:$0xff]   ;;  %v5003_v47 = vmul.f32 %v4985_v37, %v15200_v8  ;;  %9315 = vmatprep.mubr.bf16.mxu0 %v15233_v26  ;;  %9530 = vmatprep.mubr.bf16.mxu1 %v15233_v26 }
 0x3b0   : > { %9286 = vmatpush1.bf16.msra.mxu0 %v13032_v48  ;;  %9501 = vmatpush1.bf16.msra.mxu1 %v13035_v34  ;;  %v5012_v48 = vmul.f32 %v4994_v39, %v15202_v9  ;;  %v13074_v34 = vld [vmem:[%s16897_s3 + $0xb40] ss:$36 sps:$4 sm:$0xff]  }
 0x3b1   : > { %9287 = vmatprep.subr.bf16.mxu0 %v13040_v51  ;;  %9502 = vmatprep.subr.bf16.mxu1 %v13043_v52  ;;  %v13085_v51 = vld [vmem:[%s16897_s3 + $0xb94] ss:$36 sps:$4 sm:$0xff]   ;;  %v5021_v52 = vadd.f32 %v5003_v47, %v15200_v8  ;;  %v13115_v39 = vld [vmem:[%s16897_s3 + $0xcfc] ss:$36 sps:$4 sm:$0xff]  }
 0x3b3   : > { %v5039_v33 = vmul.f32 0.7978846, %v5021_v52  ;;  %v13121_v52 = vld [vmem:[%s16897_s3 + $0xd44] ss:$36 sps:$4 sm:$0xff]  }
 0x3b4   : > { %9288 = vmatpush1.bf16.msra.mxu0 %v13038_v53  ;;  %9503 = vmatpush1.bf16.msra.mxu1 %v13041_v43  ;;  %v5030_v53 = vadd.f32 %v5012_v48, %v15202_v9  ;;  %v13088_v43 = vld [vmem:[%s16897_s3 + $0xbd4] ss:$36 sps:$4 sm:$0xff]   ;;  %v4958_v48 = vmul.f32 0.5, %v15202_v9 }
 0x3b5   : > { %9289 = vmatprep.subr.bf16.mxu0 %v13046_v55  ;;  %9504 = vmatprep.subr.bf16.mxu1 %v13049_v42  ;;  %v4912_v55 = vsub.s32 7, %v14758_v11  ;;  %13790 = vtanh.f32 %v5039_v33 }
 0x3b6   : > { %v5048_v42 = vmul.f32 0.7978846, %v5030_v53 }
 0x3b8   : > { %9290 = vmatpush1.bf16.msra.mxu0 %v13044_v60  ;;  %9505 = vmatpush1.bf16.msra.mxu1 %v13047_v61  ;;  %v13086_v60 = vld [vmem:[%s16897_s3 + $0xbd0] ss:$36 sps:$4 sm:$0xff]   ;;  %v13089_v61 = vld [vmem:[%s16897_s3 + $0xbd8] ss:$36 sps:$4 sm:$0xff]   ;;  %13792 = vtanh.f32 %v5048_v42  ;;  %v13125_v42 = vld [vmem:[%s16897_s3 + $0xd88] ss:$36 sps:$4 sm:$0xff]  }
 0x3b9   : > { %9291 = vmatprep.subr.bf16.mxu0 %v13052_v62  ;;  %9506 = vmatprep.subr.bf16.mxu1 %v13055_v63  ;;  %v13094_v62 = vld [vmem:[%s16897_s3 + $0xc1c] ss:$36 sps:$4 sm:$0xff]  }
 0x3ba   : > { %v15291_v63 = vld [vmem:[%s16896_s2] sm:$0xff] }
 0x3bb   : > { %v4913_v0 = vrot.slane %v15291_v63, %v4912_v55 }
 0x3bc   : > { %9292 = vmatpush1.bf16.msra.mxu0 %v13050_v4  ;;  %9507 = vmatpush1.bf16.msra.mxu1 %v13053_v6  ;;  %v13092_v4 = vld [vmem:[%s16897_s3 + $0xc18] ss:$36 sps:$4 sm:$0xff]  }
 0x3bd   : > { %9293 = vmatprep.subr.bf16.mxu0 %v13058_v7  ;;  %9508 = vmatprep.subr.bf16.mxu1 %v13061_v27  ;;  %v4867_v6 = vld [vmem:[#allocation2 + $0x38] sm:$0xff]  ;;  %v4876_v7 = vld [vmem:[#allocation2 + $0x80] sm:$0xff] }
 0x3be   : > { %v15305_v27 = vadd.f32 %v4913_v0, %v4867_v6  ;;  %v15313_v15 = vadd.f32 %v4913_v0, %v4876_v7  ;;  %v13131_v7 = vld [vmem:[%s16897_s3 + $0xdd0] ss:$36 sps:$4 sm:$0xff]  }
 0x3c0   : > { %9294 = vmatpush1.bf16.msra.mxu0 %v13056_v10  ;;  %9509 = vmatpush1.bf16.msra.mxu1 %v13059_v13  ;;  %v13100_v10 = vld [vmem:[%s16897_s3 + $0xc64] ss:$36 sps:$4 sm:$0xff]   ;;  %v13103_v13 = vld [vmem:[%s16897_s3 + $0xc6c] ss:$36 sps:$4 sm:$0xff]   ;;  %v4970_v16 = vmul.f32 0.044715, %v15305_v27 }
 0x3c1   : > { %9295 = vmatprep.subr.bf16.mxu0 %v13064_v22  ;;  %9510 = vmatprep.subr.bf16.mxu1 %v13067_v18  ;;  %v13098_v22 = vld [vmem:[%s16897_s3 + $0xc60] ss:$36 sps:$4 sm:$0xff]   ;;  %v4979_v18 = vmul.f32 0.044715, %v15313_v15 }
 0x3c2   : > { %v4988_v1 = vmul.f32 %v4970_v16, %v15305_v27 }
 0x3c3   : > { %v4997_v38 = vmul.f32 %v4979_v18, %v15313_v15  ;;  %v13137_v18 = vld [vmem:[%s16897_s3 + $0xe18] ss:$36 sps:$4 sm:$0xff]  }
 0x3c4   : > { %9296 = vmatpush1.bf16.msra.mxu0 %v13062_v24  ;;  %9511 = vmatpush1.bf16.msra.mxu1 %v13065_v29  ;;  %v5006_v21 = vmul.f32 %v4988_v1, %v15305_v27  ;;  %v13791_v24 = vpop.eup %13790  ;;  %v13142_v1 = vld [vmem:[%s16897_s3 + $0xe5c] ss:$36 sps:$4 sm:$0xff]  }
 0x3c5   : > { %9297 = vmatprep.subr.bf16.mxu0 %v13070_v31  ;;  %9512 = vmatprep.subr.bf16.mxu1 %v13073_v36  ;;  %v5015_v29 = vmul.f32 %v4997_v38, %v15313_v15  ;;  %v13793_v31 = vpop.eup %13792  ;;  %v13112_v36 = vld [vmem:[%s16897_s3 + $0xcf4] ss:$36 sps:$4 sm:$0xff]  }
 0x3c6   : > { %v5024_v37 = vadd.f32 %v5006_v21, %v15305_v27  ;;  %v13140_v38 = vld [vmem:[%s16897_s3 + $0xe58] ss:$36 sps:$4 sm:$0xff]   ;;  %v13143_v21 = vld [vmem:[%s16897_s3 + $0xe60] ss:$36 sps:$4 sm:$0xff]  }
 0x3c8   : > { %9298 = vmatpush1.bf16.msra.mxu0 %v13068_v40  ;;  %9513 = vmatpush1.bf16.msra.mxu1 %v13071_v44  ;;  %v5033_v40 = vadd.f32 %v5015_v29, %v15313_v15  ;;  %v13110_v44 = vld [vmem:[%s16897_s3 + $0xcf0] ss:$36 sps:$4 sm:$0xff]   ;;  %v5042_v47 = vmul.f32 0.7978846, %v5024_v37  ;;  %v13149_v37 = vld [vmem:[%s16897_s3 + $0xea8] ss:$36 sps:$4 sm:$0xff]  }
 0x3c9   : > { %9299 = vmatprep.subr.bf16.mxu0 %v13076_v45  ;;  %9514 = vmatprep.subr.bf16.mxu1 %v13079_v46  ;;  %v13113_v45 = vld [vmem:[%s16897_s3 + $0xcf8] ss:$36 sps:$4 sm:$0xff]   ;;  %v4949_v46 = vmul.f32 0.5, %v15200_v8 }
 0x3ca   : > { %13794 = vtanh.f32 %v5042_v47  ;;  %v13116_v8 = vld [vmem:[%s16897_s3 + $0xd38] ss:$36 sps:$4 sm:$0xff]  }
 0x3cb   : > { %v13160_v47 = vld [vmem:[%s16897_s3 + $0xf34] ss:$36 sps:$4 sm:$0xff]  }
 0x3cc   : > { %9300 = vmatpush1.bf16.msra.mxu0 %v13074_v34  ;;  %9515 = vmatpush1.bf16.msra.mxu1 %v13077_v35  ;;  %v5075_v34 = vadd.f32 1.0, %v13791_v24  ;;  %v5084_v35 = vadd.f32 1.0, %v13793_v31  ;;  %v13148_v24 = vld [vmem:[%s16897_s3 + $0xea4] ss:$36 sps:$4 sm:$0xff]  }
 0x3cd   : > { %9301 = vmatprep.subr.bf16.mxu0 %v13082_v50  ;;  %9516 = vmatprep.subr.bf16.mxu1 %v13085_v51  ;;  %v5051_v50 = vmul.f32 0.7978846, %v5033_v40  ;;  %v13118_v51 = vld [vmem:[%s16897_s3 + $0xd3c] ss:$36 sps:$4 sm:$0xff]  }
 0x3ce   : > { %v5093_v9 = vmul.f32 %v5075_v34, %v4949_v46  ;;  %v5102_v53 = vmul.f32 %v5084_v35, %v4958_v48  ;;  %v13146_v31 = vld [vmem:[%s16897_s3 + $0xea0] ss:$36 sps:$4 sm:$0xff]   ;;  %v13155_v46 = vld [vmem:[%s16897_s3 + $0xef0] ss:$36 sps:$4 sm:$0xff]  }
 0x3cf   : > { %13796 = vtanh.f32 %v5051_v50  ;;  %v13163_v48 = vld [vmem:[%s16897_s3 + $0xf3c] ss:$36 sps:$4 sm:$0xff]   ;;  %v13158_v50 = vld [vmem:[%s16897_s3 + $0xf30] ss:$36 sps:$4 sm:$0xff]  }
 0x3d0   : > { %9302 = vmatpush1.bf16.msra.mxu0 %v13080_v54  ;;  %9517 = vmatpush1.bf16.msra.mxu1 %v13083_v59  ;;  %v13119_v54 = vld [vmem:[%s16897_s3 + $0xd40] ss:$36 sps:$4 sm:$0xff]   ;;  %v15376_v33 = vpack.c.bf16 %v5102_v53, %v5093_v9 }
 0x3d1   : > { %9303 = vmatprep.subr.bf16.mxu0 %v13088_v43  ;;  %9518 = vmatprep.subr.bf16.mxu1 %v13091_v56  ;;  %v13124_v59 = vld [vmem:[%s16897_s3 + $0xd84] ss:$36 sps:$4 sm:$0xff]   ;;  %v13127_v43 = vld [vmem:[%s16897_s3 + $0xd8c] ss:$36 sps:$4 sm:$0xff]  }
 0x3d2   : > { %v13122_v56 = vld [vmem:[%s16897_s3 + $0xd80] ss:$36 sps:$4 sm:$0xff]  }
 0x3d4   : > { %9304 = vmatpush1.bf16.msra.mxu0 %v13086_v60  ;;  %9519 = vmatpush1.bf16.msra.mxu1 %v13089_v61  ;;  %v13130_v60 = vld [vmem:[%s16897_s3 + $0xdcc] ss:$36 sps:$4 sm:$0xff]   ;;  %v13133_v61 = vld [vmem:[%s16897_s3 + $0xdd4] ss:$36 sps:$4 sm:$0xff]   ;;  %v13795_v0 = vpop.eup %13794 }
 0x3d5   : > { %9305 = vmatprep.subr.bf16.mxu0 %v13094_v62  ;;  %9520 = vmatprep.subr.bf16.mxu1 %v13097_v2  ;;  %v4952_v62 = vmul.f32 0.5, %v15305_v27  ;;  %v4961_v2 = vmul.f32 0.5, %v15313_v15  ;;  %v5078_v6 = vadd.f32 1.0, %v13795_v0  ;;  %v13136_v27 = vld [vmem:[%s16897_s3 + $0xe14] ss:$36 sps:$4 sm:$0xff]  }
 0x3d6   : > { %v13178_v0 = vld [vmem:[%s16897_s3 + $0x100c] ss:$36 sps:$4 sm:$0xff]  }
 0x3d7   : > { %v5096_v15 = vmul.f32 %v5078_v6, %v4952_v62  ;;  %v13173_v62 = vld [vmem:[%s16897_s3 + $0xfc8] ss:$36 sps:$4 sm:$0xff]  }
 0x3d8   : > { %9306 = vmatpush1.bf16.msra.mxu0 %v13092_v4  ;;  %9521 = vmatpush1.bf16.msra.mxu1 %v13095_v5  ;;  %v13128_v5 = vld [vmem:[%s16897_s3 + $0xdc8] ss:$36 sps:$4 sm:$0xff]  }
 0x3d9   : > { %9307 = vmatprep.subr.bf16.mxu0 %v13100_v10  ;;  %9522 = vmatprep.subr.bf16.mxu1 %v13103_v13  ;;  %v13797_v4 = vpop.eup %13796  ;;  %v13139_v13 = vld [vmem:[%s16897_s3 + $0xe1c] ss:$36 sps:$4 sm:$0xff]   ;;  %v13176_v6 = vld [vmem:[%s16897_s3 + $0x1008] ss:$36 sps:$4 sm:$0xff]  }
 0x3da   : > { %v5087_v10 = vadd.f32 1.0, %v13797_v4 }
 0x3dc   : > { %9308 = vmatpush1.bf16.msra.mxu0 %v13098_v22  ;;  %9523 = vmatpush1.bf16.msra.mxu1 %v13101_v19  ;;  %v5105_v16 = vmul.f32 %v5087_v10, %v4961_v2  ;;  %v13134_v22 = vld [vmem:[%s16897_s3 + $0xe10] ss:$36 sps:$4 sm:$0xff]   ;;  %v13187_v10 = vld [vmem:[%s16897_s3 + $0x105c] ss:$36 sps:$4 sm:$0xff]  }
 0x3dd   : > { %9309 = vmatprep.subr.bf16.mxu0 %v13106_v3  ;;  %9524 = vmatprep.subr.bf16.mxu1 %v13109_v20  ;;  %v13145_v3 = vld [vmem:[%s16897_s3 + $0xe64] ss:$36 sps:$4 sm:$0xff]   ;;  %v4908_v20 = vsub.s32 6, %v14758_v11  ;;  %v13181_v2 = vld [vmem:[%s16897_s3 + $0x1014] ss:$36 sps:$4 sm:$0xff]  }
 0x3de   : > { %v15409_v19 = vpack.c.bf16 %v5105_v16, %v5096_v15  ;;  %v13182_v16 = vld [vmem:[%s16897_s3 + $0x1050] ss:$36 sps:$4 sm:$0xff]  }
 0x3df   : > { %v4909_v29 = vrot.slane %v15291_v63, %v4908_v20  ;;  %v13157_v63 = vld [vmem:[%s16897_s3 + $0xef4] ss:$36 sps:$4 sm:$0xff]  }
 0x3e0   : > { %9310 = vmatpush1.bf16.msra.mxu0 %v13104_v28  ;;  %9525 = vmatpush1.bf16.msra.mxu1 %v13107_v32  ;;  %v13151_v28 = vld [vmem:[%s16897_s3 + $0xeac] ss:$36 sps:$4 sm:$0xff]  }
 0x3e1   : > { %9311 = vmatprep.subr.bf16.mxu0 %v13112_v36  ;;  %9526 = vmatprep.subr.bf16.mxu1 %v13115_v39  ;;  %v4866_v32 = vld [vmem:[#allocation2 + $0x30] sm:$0xff]  ;;  %v4875_v36 = vld [vmem:[#allocation2 + $0x78] sm:$0xff] }
 0x3e2   : > { %v13154_v39 = vld [vmem:[%s16897_s3 + $0xeec] ss:$36 sps:$4 sm:$0xff]   ;;  %v15447_v40 = vadd.f32 %v4909_v29, %v4866_v32 }
 0x3e3   : > { %v4877_v32 = vld [vmem:[#allocation2 + $0x88] sm:$0xff] }
 0x3e4   : > { %9312 = vmatpush1.bf16.msra.mxu0 %v13110_v44  ;;  %9527 = vmatpush1.bf16.msra.mxu1 %v13113_v45  ;;  %v15449_v44 = vadd.f32 %v4909_v29, %v4875_v36  ;;  %v13152_v45 = vld [vmem:[%s16897_s3 + $0xee8] ss:$36 sps:$4 sm:$0xff]   ;;  %v4969_v34 = vmul.f32 0.044715, %v15447_v40 }
 0x3e5   : > { %9313 = vmatprep.subr.bf16.mxu0 %v13118_v51  ;;  %9528 = vmatprep.subr.bf16.mxu1 %v13121_v52  ;;  %v13161_v51 = vld [vmem:[%s16897_s3 + $0xf38] ss:$36 sps:$4 sm:$0xff]   ;;  %v10960_v29 = vld [vmem:[%s16896_s2 + $0x8] ss:$0 sm:$0xff] }
 0x3e6   : > { %v4978_v35 = vmul.f32 0.044715, %v15449_v44  ;;  %v13166_v52 = vld [vmem:[%s16897_s3 + $0xf7c] ss:$36 sps:$4 sm:$0xff]   ;;  %v4987_v9 = vmul.f32 %v4969_v34, %v15447_v40  ;;  %v13197_v36 = vld [vmem:[%s16897_s3 + $0x10e8] ss:$36 sps:$4 sm:$0xff]  }
 0x3e7   : > { %v13203_v34 = vld [vmem:[%s16897_s3 + $0x1130] ss:$36 sps:$4 sm:$0xff]  }
 0x3e8   : > { %9314 = vmatpush1.bf16.msra.mxu0 %v13116_v8  ;;  %9529 = vmatpush1.bf16.msra.mxu1 %v13119_v54  ;;  %v13169_v8 = vld [vmem:[%s16897_s3 + $0xf84] ss:$36 sps:$4 sm:$0xff]   ;;  %v4996_v53 = vmul.f32 %v4978_v35, %v15449_v44  ;;  %v13164_v54 = vld [vmem:[%s16897_s3 + $0xf78] ss:$36 sps:$4 sm:$0xff]  }
 0x3e9   : > { %9326 = vmatprep.subr.bf16.mxu0 %v13124_v59  ;;  %9541 = vmatprep.subr.bf16.mxu1 %v13127_v43  ;;  %v13167_v59 = vld [vmem:[%s16897_s3 + $0xf80] ss:$36 sps:$4 sm:$0xff]   ;;  %v13208_v35 = vld [vmem:[%s16897_s3 + $0x1174] ss:$36 sps:$4 sm:$0xff]  }
 0x3ea   : > { %v13172_v43 = vld [vmem:[%s16897_s3 + $0xfc4] ss:$36 sps:$4 sm:$0xff]  }
 0x3eb   : > { %9316 = vmatmul.mubr.bf16.vlgmr.msra.gmra.mrb[0].mxu0 %v15376_v33  ;;  %9531 = vmatmul.mubr.bf16.vlgmr.msra.gmra.mrb[0].mxu1 %v15376_v33 }
 0x3ec   : > { %9327 = vmatpush1.bf16.msra.mxu0 %v13122_v56  ;;  %9542 = vmatpush1.bf16.msra.mxu1 %v13125_v42  ;;  %v13175_v56 = vld [vmem:[%s16897_s3 + $0xfcc] ss:$36 sps:$4 sm:$0xff]   ;;  %v5005_v42 = vmul.f32 %v4987_v9, %v15447_v40  ;;  %v4951_v9 = vmul.f32 0.5, %v15447_v40 }
 0x3ed   : > { %9328 = vmatprep.subr.bf16.mxu0 %v13130_v60  ;;  %9543 = vmatprep.subr.bf16.mxu1 %v13133_v61  ;;  %v5014_v60 = vmul.f32 %v4996_v53, %v15449_v44  ;;  %v13170_v61 = vld [vmem:[%s16897_s3 + $0xfc0] ss:$36 sps:$4 sm:$0xff]   ;;  %v4960_v53 = vmul.f32 0.5, %v15449_v44 }
 0x3ee   : > { %9358 = vmatprep.mubr.bf16.mxu0 %v15409_v19  ;;  %9573 = vmatprep.mubr.bf16.mxu1 %v15409_v19  ;;  %v5023_v4 = vadd.f32 %v5005_v42, %v15447_v40  ;;  %v13217_v40 = vld [vmem:[%s16897_s3 + $0x11c4] ss:$36 sps:$4 sm:$0xff]  }
 0x3f0   : > { %9329 = vmatpush1.bf16.msra.mxu0 %v13128_v5  ;;  %9544 = vmatpush1.bf16.msra.mxu1 %v13131_v7  ;;  %v5032_v5 = vadd.f32 %v5014_v60, %v15449_v44  ;;  %v13179_v7 = vld [vmem:[%s16897_s3 + $0x1010] ss:$36 sps:$4 sm:$0xff]   ;;  %v13212_v60 = vld [vmem:[%s16897_s3 + $0x11b8] ss:$36 sps:$4 sm:$0xff]  }
 0x3f1   : > { %9330 = vmatprep.subr.bf16.mxu0 %v13136_v27  ;;  %9545 = vmatprep.subr.bf16.mxu1 %v13139_v13  ;;  %v13184_v27 = vld [vmem:[%s16897_s3 + $0x1054] ss:$36 sps:$4 sm:$0xff]   ;;  %v5041_v13 = vmul.f32 0.7978846, %v5023_v4  ;;  %v13223_v4 = vld [vmem:[%s16897_s3 + $0x120c] ss:$36 sps:$4 sm:$0xff]  }
 0x3f2   : > { %v5050_v15 = vmul.f32 0.7978846, %v5032_v5 }
 0x3f3   : > { %13798 = vtanh.f32 %v5041_v13  ;;  %v13226_v13 = vld [vmem:[%s16897_s3 + $0x124c] ss:$36 sps:$4 sm:$0xff]  }
 0x3f4   : > { %9331 = vmatpush1.bf16.msra.mxu0 %v13134_v22  ;;  %9546 = vmatpush1.bf16.msra.mxu1 %v13137_v18  ;;  %v13185_v22 = vld [vmem:[%s16897_s3 + $0x1058] ss:$36 sps:$4 sm:$0xff]   ;;  %13800 = vtanh.f32 %v5050_v15 }
 0x3f5   : > { %9332 = vmatprep.subr.bf16.mxu0 %v13142_v1  ;;  %9547 = vmatprep.subr.bf16.mxu1 %v13145_v3  ;;  %v13190_v18 = vld [vmem:[%s16897_s3 + $0x109c] ss:$36 sps:$4 sm:$0xff]   ;;  %v13193_v1 = vld [vmem:[%s16897_s3 + $0x10a4] ss:$36 sps:$4 sm:$0xff]   ;;  %v13229_v15 = vld [vmem:[%s16897_s3 + $0x1254] ss:$36 sps:$4 sm:$0xff]  }
 0x3f6   : > { %v13188_v3 = vld [vmem:[%s16897_s3 + $0x1098] ss:$36 sps:$4 sm:$0xff]  }
 0x3f8   : > { %9333 = vmatpush1.bf16.msra.mxu0 %v13140_v38  ;;  %9548 = vmatpush1.bf16.msra.mxu1 %v13143_v21  ;;  %v13191_v38 = vld [vmem:[%s16897_s3 + $0x10a0] ss:$36 sps:$4 sm:$0xff]  }
 0x3f9   : > { %9334 = vmatprep.subr.bf16.mxu0 %v13148_v24  ;;  %9549 = vmatprep.subr.bf16.mxu1 %v13151_v28  ;;  %v13196_v21 = vld [vmem:[%s16897_s3 + $0x10e4] ss:$36 sps:$4 sm:$0xff]   ;;  %v13199_v24 = vld [vmem:[%s16897_s3 + $0x10ec] ss:$36 sps:$4 sm:$0xff]  }
 0x3fa   : > { %v4868_v28 = vld [vmem:[#allocation2 + $0x40] sm:$0xff] }
 0x3fc   : > { %9335 = vmatpush1.bf16.msra.mxu0 %v13146_v31  ;;  %9550 = vmatpush1.bf16.msra.mxu1 %v13149_v37  ;;  %v13194_v31 = vld [vmem:[%s16897_s3 + $0x10e0] ss:$36 sps:$4 sm:$0xff]   ;;  %v13202_v37 = vld [vmem:[%s16897_s3 + $0x112c] ss:$36 sps:$4 sm:$0xff]  }
 0x3fd   : > { %9336 = vmatprep.subr.bf16.mxu0 %v13154_v39  ;;  %9551 = vmatprep.subr.bf16.mxu1 %v13157_v63  ;;  %v13205_v39 = vld [vmem:[%s16897_s3 + $0x1134] ss:$36 sps:$4 sm:$0xff]   ;;  %v15558_v63 = vadd.f32 %v10960_v29, %v4868_v28 }
 0x400   : > { %9337 = vmatpush1.bf16.msra.mxu0 %v13152_v45  ;;  %9552 = vmatpush1.bf16.msra.mxu1 %v13155_v46  ;;  %v15560_v45 = vadd.f32 %v10960_v29, %v4877_v32  ;;  %v13799_v46 = vpop.eup %13798  ;;  %v13230_v29 = vld [vmem:[%s16897_s3 + $0x1290] ss:$36 sps:$4 sm:$0xff]   ;;  %v13238_v32 = vld [vmem:[%s16897_s3 + $0x12dc] ss:$36 sps:$4 sm:$0xff]  }
 0x401   : > { %9338 = vmatprep.subr.bf16.mxu0 %v13160_v47  ;;  %9553 = vmatprep.subr.bf16.mxu1 %v13163_v48  ;;  %v13200_v47 = vld [vmem:[%s16897_s3 + $0x1128] ss:$36 sps:$4 sm:$0xff]   ;;  %v13801_v48 = vpop.eup %13800 }
 0x404   : > { %9339 = vmatpush1.bf16.msra.mxu0 %v13158_v50  ;;  %9554 = vmatpush1.bf16.msra.mxu1 %v13161_v51  ;;  %v13211_v50 = vld [vmem:[%s16897_s3 + $0x117c] ss:$36 sps:$4 sm:$0xff]   ;;  %v4971_v51 = vmul.f32 0.044715, %v15558_v63 }
 0x405   : > { %9340 = vmatprep.subr.bf16.mxu0 %v13166_v52  ;;  %9555 = vmatprep.subr.bf16.mxu1 %v13169_v8  ;;  %v13206_v52 = vld [vmem:[%s16897_s3 + $0x1170] ss:$36 sps:$4 sm:$0xff]   ;;  %v4980_v8 = vmul.f32 0.044715, %v15560_v45 }
 0x406   : > { %v4989_v44 = vmul.f32 %v4971_v51, %v15558_v63 }
 0x407   : > { %v4998_v42 = vmul.f32 %v4980_v8, %v15560_v45 }
 0x408   : > { %9341 = vmatpush1.bf16.msra.mxu0 %v13164_v54  ;;  %9556 = vmatpush1.bf16.msra.mxu1 %v13167_v59  ;;  %v5077_v54 = vadd.f32 1.0, %v13799_v46  ;;  %v5086_v59 = vadd.f32 1.0, %v13801_v48  ;;  %v5007_v5 = vmul.f32 %v4989_v44, %v15558_v63  ;;  %v13244_v46 = vld [vmem:[%s16897_s3 + $0x1324] ss:$36 sps:$4 sm:$0xff]   ;;  %v13254_v44 = vld [vmem:[%s16897_s3 + $0x13b0] ss:$36 sps:$4 sm:$0xff]  }
 0x409   : > { %9342 = vmatprep.subr.bf16.mxu0 %v13172_v43  ;;  %9557 = vmatprep.subr.bf16.mxu1 %v13175_v56  ;;  %v13209_v43 = vld [vmem:[%s16897_s3 + $0x1178] ss:$36 sps:$4 sm:$0xff]   ;;  %v13242_v48 = vld [vmem:[%s16897_s3 + $0x1320] ss:$36 sps:$4 sm:$0xff]  }
 0x40a   : > { %v13214_v56 = vld [vmem:[%s16897_s3 + $0x11bc] ss:$36 sps:$4 sm:$0xff]  }
 0x40c   : > { %9343 = vmatpush1.bf16.msra.mxu0 %v13170_v61  ;;  %9558 = vmatpush1.bf16.msra.mxu1 %v13173_v62  ;;  %v5095_v61 = vmul.f32 %v5077_v54, %v4951_v9  ;;  %v5104_v62 = vmul.f32 %v5086_v59, %v4960_v53  ;;  %v13251_v9 = vld [vmem:[%s16897_s3 + $0x1370] ss:$36 sps:$4 sm:$0xff]   ;;  %v13259_v54 = vld [vmem:[%s16897_s3 + $0x13bc] ss:$36 sps:$4 sm:$0xff]   ;;  %v4953_v59 = vmul.f32 0.5, %v15558_v63 }
 0x40d   : > { %9344 = vmatprep.subr.bf16.mxu0 %v13178_v0  ;;  %9559 = vmatprep.subr.bf16.mxu1 %v13181_v2  ;;  %v13215_v0 = vld [vmem:[%s16897_s3 + $0x11c0] ss:$36 sps:$4 sm:$0xff]   ;;  %v13256_v53 = vld [vmem:[%s16897_s3 + $0x13b4] ss:$36 sps:$4 sm:$0xff]  }
 0x40e   : > { %v13220_v2 = vld [vmem:[%s16897_s3 + $0x1204] ss:$36 sps:$4 sm:$0xff]  }
 0x410   : > { %9345 = vmatpush1.bf16.msra.mxu0 %v13176_v6  ;;  %9560 = vmatpush1.bf16.msra.mxu1 %v13179_v7  ;;  %v5016_v6 = vmul.f32 %v4998_v42, %v15560_v45  ;;  %v13218_v7 = vld [vmem:[%s16897_s3 + $0x1200] ss:$36 sps:$4 sm:$0xff]   ;;  %v13257_v42 = vld [vmem:[%s16897_s3 + $0x13b8] ss:$36 sps:$4 sm:$0xff]  }
 0x411   : > { %9346 = vmatprep.subr.bf16.mxu0 %v13184_v27  ;;  %9561 = vmatprep.subr.bf16.mxu1 %v13187_v10  ;;  %v15609_v27 = vpack.c.bf16 %v5104_v62, %v5095_v61  ;;  %v13221_v10 = vld [vmem:[%s16897_s3 + $0x1208] ss:$36 sps:$4 sm:$0xff]   ;;  %v13260_v62 = vld [vmem:[%s16897_s3 + $0x13f8] ss:$36 sps:$4 sm:$0xff]  }
 0x414   : > { %9347 = vmatpush1.bf16.msra.mxu0 %v13182_v16  ;;  %9562 = vmatpush1.bf16.msra.mxu1 %v13185_v22  ;;  %v5025_v16 = vadd.f32 %v5007_v5, %v15558_v63  ;;  %v5034_v22 = vadd.f32 %v5016_v6, %v15560_v45  ;;  %v13262_v63 = vld [vmem:[%s16897_s3 + $0x13fc] ss:$36 sps:$4 sm:$0xff]   ;;  %v13266_v6 = vld [vmem:[%s16897_s3 + $0x10] ss:$36 sps:$4 sm:$0xff]  }
 0x415   : > { %9348 = vmatprep.subr.bf16.mxu0 %v13190_v18  ;;  %9563 = vmatprep.subr.bf16.mxu1 %v13193_v1  ;;  %v13224_v18 = vld [vmem:[%s16897_s3 + $0x1248] ss:$36 sps:$4 sm:$0xff]   ;;  %v13227_v1 = vld [vmem:[%s16897_s3 + $0x1250] ss:$36 sps:$4 sm:$0xff]  }
 0x416   : > { %v5052_v28 = vmul.f32 0.7978846, %v5034_v22  ;;  %v13280_v22 = vld [vmem:[%s16897_s3 + $0xa4] ss:$36 sps:$4 sm:$0xff]  }
 0x418   : > { %9349 = vmatpush1.bf16.msra.mxu0 %v13188_v3  ;;  %9564 = vmatpush1.bf16.msra.mxu1 %v13191_v38  ;;  %v13232_v3 = vld [vmem:[%s16897_s3 + $0x1294] ss:$36 sps:$4 sm:$0xff]   ;;  %v13235_v38 = vld [vmem:[%s16897_s3 + $0x129c] ss:$36 sps:$4 sm:$0xff]  }
 0x419   : > { %9350 = vmatprep.subr.bf16.mxu0 %v13196_v21  ;;  %9565 = vmatprep.subr.bf16.mxu1 %v13199_v24  ;;  %v5043_v21 = vmul.f32 0.7978846, %v5025_v16  ;;  %v13878_v24 = vmov 0   ;;  %v13275_v16 = vld [vmem:[%s16897_s3 + $0x60] ss:$36 sps:$4 sm:$0xff]  }
 0x41b   : > { %13802 = vtanh.f32 %v5043_v21  ;;  %v13289_v21 = vld [vmem:[%s16897_s3 + $0xf4] ss:$36 sps:$4 sm:$0xff]  }
 0x41c   : > { %9351 = vmatpush1.bf16.msra.mxu0 %v13194_v31  ;;  %9566 = vmatpush1.bf16.msra.mxu1 %v13197_v36  ;;  %v13233_v31 = vld [vmem:[%s16897_s3 + $0x1298] ss:$36 sps:$4 sm:$0xff]   ;;  %v13241_v36 = vld [vmem:[%s16897_s3 + $0x12e4] ss:$36 sps:$4 sm:$0xff]   ;;  %13804 = vtanh.f32 %v5052_v28 }
 0x41d   : > { %9352 = vmatprep.subr.bf16.mxu0 %v13202_v37  ;;  %9567 = vmatprep.subr.bf16.mxu1 %v13205_v39  ;;  %v13236_v37 = vld [vmem:[%s16897_s3 + $0x12d8] ss:$36 sps:$4 sm:$0xff]   ;;  %v13239_v39 = vld [vmem:[%s16897_s3 + $0x12e0] ss:$36 sps:$4 sm:$0xff]   ;;  %v13284_v28 = vld [vmem:[%s16897_s3 + $0xe8] ss:$36 sps:$4 sm:$0xff]  }
 0x420   : > { %9353 = vmatpush1.bf16.msra.mxu0 %v13200_v47  ;;  %9568 = vmatpush1.bf16.msra.mxu1 %v13203_v34  ;;  %v13247_v47 = vld [vmem:[%s16897_s3 + $0x132c] ss:$36 sps:$4 sm:$0xff]  }
 0x421   : > { %9354 = vmatprep.subr.bf16.mxu0 %v13208_v35  ;;  %9569 = vmatprep.subr.bf16.mxu1 %v13211_v50  ;;  %v13245_v34 = vld [vmem:[%s16897_s3 + $0x1328] ss:$36 sps:$4 sm:$0xff]   ;;  %v13253_v50 = vld [vmem:[%s16897_s3 + $0x1374] ss:$36 sps:$4 sm:$0xff]  }
 0x422   : > { %v13250_v35 = vld [vmem:[%s16897_s3 + $0x136c] ss:$36 sps:$4 sm:$0xff]  }
 0x424   : > { %9355 = vmatpush1.bf16.msra.mxu0 %v13206_v52  ;;  %9570 = vmatpush1.bf16.msra.mxu1 %v13209_v43  ;;  %v13248_v52 = vld [vmem:[%s16897_s3 + $0x1368] ss:$36 sps:$4 sm:$0xff]   ;;  %v4962_v43 = vmul.f32 0.5, %v15560_v45 }
 0x425   : > { %9356 = vmatprep.subr.bf16.mxu0 %v13214_v56  ;;  %9571 = vmatprep.subr.bf16.mxu1 %v13217_v40  ;;  %v13803_v51 = vpop.eup %13802  ;;  %v13265_v45 = vld [vmem:[%s16897_s3 + $0x1404] ss:$36 sps:$4 sm:$0xff]  }
 0x426   : > { %v13805_v8 = vpop.eup %13804  ;;  %v5079_v56 = vadd.f32 1.0, %v13803_v51  ;;  %v13305_v51 = vld [vmem:[%s16897_s3 + $0x1c8] ss:$36 sps:$4 sm:$0xff]  }
 0x427   : > { %v5088_v40 = vadd.f32 1.0, %v13805_v8  ;;  %v13313_v8 = vld [vmem:[%s16897_s3 + $0x214] ss:$36 sps:$4 sm:$0xff]  }
 0x428   : > { %9357 = vmatpush1.bf16.msra.mxu0 %v13212_v60  ;;  %9572 = vmatpush1.bf16.msra.mxu1 %v13215_v0  ;;  %v5097_v60 = vmul.f32 %v5079_v56, %v4953_v59  ;;  %v13263_v0 = vld [vmem:[%s16897_s3 + $0x1400] ss:$36 sps:$4 sm:$0xff]   ;;  %v13317_v56 = vld [vmem:[%s16897_s3 + $0x258] ss:$36 sps:$4 sm:$0xff]  }
 0x429   : > { %9369 = vmatprep.subr.bf16.mxu0 %v13220_v2  ;;  %9584 = vmatprep.subr.bf16.mxu1 %v13223_v4  ;;  %v5106_v61 = vmul.f32 %v5088_v40, %v4962_v43  ;;  %v13268_v2 = vld [vmem:[%s16897_s3 + $0x14] ss:$36 sps:$4 sm:$0xff]   ;;  %v13271_v4 = vld [vmem:[%s16897_s3 + $0x1c] ss:$36 sps:$4 sm:$0xff]  }
 0x42a   : > { %v13319_v59 = vld [vmem:[%s16897_s3 + $0x25c] ss:$36 sps:$4 sm:$0xff]   ;;  %v13314_v43 = vld [vmem:[%s16897_s3 + $0x250] ss:$36 sps:$4 sm:$0xff]  }
 0x42b   : > { %9359 = vmatmul.mubr.bf16.vlgmr.msra.gmra.mrb[0].mxu0 %v15609_v27  ;;  %9574 = vmatmul.mubr.bf16.vlgmr.msra.gmra.mrb[0].mxu1 %v15609_v27  ;;  %v15712_v5 = vpack.c.bf16 %v5106_v61, %v5097_v60  ;;  %v13322_v40 = vld [vmem:[%s16897_s3 + $0x29c] ss:$36 sps:$4 sm:$0xff]   ;;  %v13331_v60 = vld [vmem:[%s16897_s3 + $0x2ec] ss:$36 sps:$4 sm:$0xff]  }
 0x42c   : > { %9370 = vmatpush1.bf16.msra.mxu0 %v13218_v7  ;;  %9585 = vmatpush1.bf16.msra.mxu1 %v13221_v10  ;;  %v13269_v7 = vld [vmem:[%s16897_s3 + $0x18] ss:$36 sps:$4 sm:$0xff]   ;;  %v13326_v61 = vld [vmem:[%s16897_s3 + $0x2e0] ss:$36 sps:$4 sm:$0xff]  }
 0x42d   : > { %9371 = vmatprep.subr.bf16.mxu0 %v13226_v13  ;;  %9586 = vmatprep.subr.bf16.mxu1 %v13229_v15  ;;  %v13274_v10 = vld [vmem:[%s16897_s3 + $0x5c] ss:$36 sps:$4 sm:$0xff]   ;;  %v13277_v13 = vld [vmem:[%s16897_s3 + $0x64] ss:$36 sps:$4 sm:$0xff]  }
 0x42e   : > { %9401 = vmatprep.mubr.bf16.mxu0 %v13878_v24  ;;  %9616 = vmatprep.mubr.bf16.mxu1 %v13878_v24  ;;  %v13272_v15 = vld [vmem:[%s16897_s3 + $0x58] ss:$36 sps:$4 sm:$0xff]  }
 0x430   : > { %9372 = vmatpush1.bf16.msra.mxu0 %v13224_v18  ;;  %9587 = vmatpush1.bf16.msra.mxu1 %v13227_v1  ;;  %v13283_v18 = vld [vmem:[%s16897_s3 + $0xac] ss:$36 sps:$4 sm:$0xff]   ;;  %v13278_v1 = vld [vmem:[%s16897_s3 + $0xa0] ss:$36 sps:$4 sm:$0xff]  }
 0x431   : > { %9373 = vmatprep.subr.bf16.mxu0 %v13232_v3  ;;  %9588 = vmatprep.subr.bf16.mxu1 %v13235_v38  ;;  %v13281_v3 = vld [vmem:[%s16897_s3 + $0xa8] ss:$36 sps:$4 sm:$0xff]  }
 0x432   : > { %v13286_v38 = vld [vmem:[%s16897_s3 + $0xec] ss:$36 sps:$4 sm:$0xff]  }
 0x434   : > { %9374 = vmatpush1.bf16.msra.mxu0 %v13230_v29  ;;  %9589 = vmatpush1.bf16.msra.mxu1 %v13233_v31  ;;  %v13287_v29 = vld [vmem:[%s16897_s3 + $0xf0] ss:$36 sps:$4 sm:$0xff]  }
 0x435   : > { %9375 = vmatprep.subr.bf16.mxu0 %v13238_v32  ;;  %9590 = vmatprep.subr.bf16.mxu1 %v13241_v36  ;;  %v13292_v31 = vld [vmem:[%s16897_s3 + $0x134] ss:$36 sps:$4 sm:$0xff]   ;;  %v13295_v32 = vld [vmem:[%s16897_s3 + $0x13c] ss:$36 sps:$4 sm:$0xff]  }
 0x436   : > { %v13290_v36 = vld [vmem:[%s16897_s3 + $0x130] ss:$36 sps:$4 sm:$0xff]  }
 0x438   : > { %9376 = vmatpush1.bf16.msra.mxu0 %v13236_v37  ;;  %9591 = vmatpush1.bf16.msra.mxu1 %v13239_v39  ;;  %v13293_v37 = vld [vmem:[%s16897_s3 + $0x138] ss:$36 sps:$4 sm:$0xff]  }
 0x439   : > { %9377 = vmatprep.subr.bf16.mxu0 %v13244_v46  ;;  %9592 = vmatprep.subr.bf16.mxu1 %v13247_v47  ;;  %v13298_v39 = vld [vmem:[%s16897_s3 + $0x17c] ss:$36 sps:$4 sm:$0xff]   ;;  %v13301_v46 = vld [vmem:[%s16897_s3 + $0x184] ss:$36 sps:$4 sm:$0xff]  }
 0x43a   : > { %v13296_v47 = vld [vmem:[%s16897_s3 + $0x178] ss:$36 sps:$4 sm:$0xff]  }
 0x43c   : > { %9378 = vmatpush1.bf16.msra.mxu0 %v13242_v48  ;;  %9593 = vmatpush1.bf16.msra.mxu1 %v13245_v34  ;;  %v13299_v48 = vld [vmem:[%s16897_s3 + $0x180] ss:$36 sps:$4 sm:$0xff]  }
 0x43d   : > { %9379 = vmatprep.subr.bf16.mxu0 %v13250_v35  ;;  %9594 = vmatprep.subr.bf16.mxu1 %v13253_v50  ;;  %v13304_v34 = vld [vmem:[%s16897_s3 + $0x1c4] ss:$36 sps:$4 sm:$0xff]   ;;  %v13307_v35 = vld [vmem:[%s16897_s3 + $0x1cc] ss:$36 sps:$4 sm:$0xff]  }
 0x43e   : > { %v13302_v50 = vld [vmem:[%s16897_s3 + $0x1c0] ss:$36 sps:$4 sm:$0xff]  }
 0x440   : > { %9380 = vmatpush1.bf16.msra.mxu0 %v13248_v52  ;;  %9595 = vmatpush1.bf16.msra.mxu1 %v13251_v9  ;;  %v13310_v52 = vld [vmem:[%s16897_s3 + $0x20c] ss:$36 sps:$4 sm:$0xff]  }
 0x441   : > { %9381 = vmatprep.subr.bf16.mxu0 %v13256_v53  ;;  %9596 = vmatprep.subr.bf16.mxu1 %v13259_v54  ;;  %v13308_v9 = vld [vmem:[%s16897_s3 + $0x208] ss:$36 sps:$4 sm:$0xff]   ;;  %v13311_v53 = vld [vmem:[%s16897_s3 + $0x210] ss:$36 sps:$4 sm:$0xff]  }
 0x442   : > { %v13316_v54 = vld [vmem:[%s16897_s3 + $0x254] ss:$36 sps:$4 sm:$0xff]  }
 0x444   : > { %9382 = vmatpush1.bf16.msra.mxu0 %v13254_v44  ;;  %9597 = vmatpush1.bf16.msra.mxu1 %v13257_v42  ;;  %v13325_v44 = vld [vmem:[%s16897_s3 + $0x2a4] ss:$36 sps:$4 sm:$0xff]   ;;  %v13320_v42 = vld [vmem:[%s16897_s3 + $0x298] ss:$36 sps:$4 sm:$0xff]  }
 0x445   : > { %9383 = vmatprep.subr.bf16.mxu0 %v13262_v63  ;;  %9598 = vmatprep.subr.bf16.mxu1 %v13265_v45  ;;  %v13323_v63 = vld [vmem:[%s16897_s3 + $0x2a0] ss:$36 sps:$4 sm:$0xff]  }
 0x446   : > { %v13328_v45 = vld [vmem:[%s16897_s3 + $0x2e4] ss:$36 sps:$4 sm:$0xff]  }
 0x448   : > { %9384 = vmatpush1.bf16.msra.mxu0 %v13260_v62  ;;  %9599 = vmatpush1.bf16.msra.mxu1 %v13263_v0  ;;  %v13329_v62 = vld [vmem:[%s16897_s3 + $0x2e8] ss:$36 sps:$4 sm:$0xff]  }
 0x449   : > { %9627 = vmatprep.subr.bf16.mxu0 %v13268_v2  ;;  %9842 = vmatprep.subr.bf16.mxu1 %v13271_v4  ;;  %v13334_v0 = vld [vmem:[%s16897_s3 + $0x32c] ss:$36 sps:$4 sm:$0xff]   ;;  %v13337_v2 = vld [vmem:[%s16897_s3 + $0x334] ss:$36 sps:$4 sm:$0xff]  }
 0x44a   : > { %v13332_v4 = vld [vmem:[%s16897_s3 + $0x328] ss:$36 sps:$4 sm:$0xff]  }
 0x44b   : > { %9402 = vmatmul.mubr.bf16.vlgmr.msra.gmra.mrb[0].mxu0 %v15712_v5  ;;  %9617 = vmatmul.mubr.bf16.vlgmr.msra.gmra.mrb[0].mxu1 %v15712_v5 }
 0x44c   : > { %9628 = vmatpush1.bf16.msra.mxu0 %v13266_v6  ;;  %9843 = vmatpush1.bf16.msra.mxu1 %v13269_v7  ;;  %v13335_v6 = vld [vmem:[%s16897_s3 + $0x330] ss:$36 sps:$4 sm:$0xff]  }
 0x44d   : > { %9629 = vmatprep.subr.bf16.mxu0 %v13274_v10  ;;  %9844 = vmatprep.subr.bf16.mxu1 %v13277_v13  ;;  %v13340_v7 = vld [vmem:[%s16897_s3 + $0x374] ss:$36 sps:$4 sm:$0xff]   ;;  %v13343_v10 = vld [vmem:[%s16897_s3 + $0x37c] ss:$36 sps:$4 sm:$0xff]  }
 0x44e   : > { %9659 = vmatprep.mubr.bf16.mxu0 %v14876_v23  ;;  %9874 = vmatprep.mubr.bf16.mxu1 %v14876_v23  ;;  %v13338_v13 = vld [vmem:[%s16897_s3 + $0x370] ss:$36 sps:$4 sm:$0xff]  }
 0x450   : > { %9630 = vmatpush1.bf16.msra.mxu0 %v13272_v15  ;;  %9845 = vmatpush1.bf16.msra.mxu1 %v13275_v16  ;;  %v13341_v15 = vld [vmem:[%s16897_s3 + $0x378] ss:$36 sps:$4 sm:$0xff]  }
 0x451   : > { %9631 = vmatprep.subr.bf16.mxu0 %v13280_v22  ;;  %9846 = vmatprep.subr.bf16.mxu1 %v13283_v18  ;;  %v13346_v16 = vld [vmem:[%s16897_s3 + $0x3bc] ss:$36 sps:$4 sm:$0xff]   ;;  %v13349_v22 = vld [vmem:[%s16897_s3 + $0x3c4] ss:$36 sps:$4 sm:$0xff]  }
 0x452   : > { %v13344_v18 = vld [vmem:[%s16897_s3 + $0x3b8] ss:$36 sps:$4 sm:$0xff]  }
 0x454   : > { %9632 = vmatpush1.bf16.msra.mxu0 %v13278_v1  ;;  %9847 = vmatpush1.bf16.msra.mxu1 %v13281_v3  ;;  %v13347_v1 = vld [vmem:[%s16897_s3 + $0x3c0] ss:$36 sps:$4 sm:$0xff]  }
 0x455   : > { %9633 = vmatprep.subr.bf16.mxu0 %v13286_v38  ;;  %9848 = vmatprep.subr.bf16.mxu1 %v13289_v21  ;;  %v13352_v3 = vld [vmem:[%s16897_s3 + $0x404] ss:$36 sps:$4 sm:$0xff]   ;;  %v13355_v38 = vld [vmem:[%s16897_s3 + $0x40c] ss:$36 sps:$4 sm:$0xff]  }
 0x456   : > { %v13350_v21 = vld [vmem:[%s16897_s3 + $0x400] ss:$36 sps:$4 sm:$0xff]  }
 0x458   : > { %9634 = vmatpush1.bf16.msra.mxu0 %v13284_v28  ;;  %9849 = vmatpush1.bf16.msra.mxu1 %v13287_v29  ;;  %v13353_v28 = vld [vmem:[%s16897_s3 + $0x408] ss:$36 sps:$4 sm:$0xff]  }
 0x459   : > { %9635 = vmatprep.subr.bf16.mxu0 %v13292_v31  ;;  %9850 = vmatprep.subr.bf16.mxu1 %v13295_v32  ;;  %v13358_v29 = vld [vmem:[%s16897_s3 + $0x44c] ss:$36 sps:$4 sm:$0xff]   ;;  %v13361_v31 = vld [vmem:[%s16897_s3 + $0x454] ss:$36 sps:$4 sm:$0xff]  }
 0x45a   : > { %v13356_v32 = vld [vmem:[%s16897_s3 + $0x448] ss:$36 sps:$4 sm:$0xff]  }
 0x45c   : > { %9636 = vmatpush1.bf16.msra.mxu0 %v13290_v36  ;;  %9851 = vmatpush1.bf16.msra.mxu1 %v13293_v37  ;;  %v13359_v36 = vld [vmem:[%s16897_s3 + $0x450] ss:$36 sps:$4 sm:$0xff]  }
 0x45d   : > { %9637 = vmatprep.subr.bf16.mxu0 %v13298_v39  ;;  %9852 = vmatprep.subr.bf16.mxu1 %v13301_v46  ;;  %v13364_v37 = vld [vmem:[%s16897_s3 + $0x494] ss:$36 sps:$4 sm:$0xff]   ;;  %v13367_v39 = vld [vmem:[%s16897_s3 + $0x49c] ss:$36 sps:$4 sm:$0xff]  }
 0x45e   : > { %v13362_v46 = vld [vmem:[%s16897_s3 + $0x490] ss:$36 sps:$4 sm:$0xff]  }
 0x460   : > { %9638 = vmatpush1.bf16.msra.mxu0 %v13296_v47  ;;  %9853 = vmatpush1.bf16.msra.mxu1 %v13299_v48  ;;  %v13365_v47 = vld [vmem:[%s16897_s3 + $0x498] ss:$36 sps:$4 sm:$0xff]  }
 0x461   : > { %9639 = vmatprep.subr.bf16.mxu0 %v13304_v34  ;;  %9854 = vmatprep.subr.bf16.mxu1 %v13307_v35  ;;  %v13370_v48 = vld [vmem:[%s16897_s3 + $0x4dc] ss:$36 sps:$4 sm:$0xff]   ;;  %v13373_v34 = vld [vmem:[%s16897_s3 + $0x4e4] ss:$36 sps:$4 sm:$0xff]  }
 0x462   : > { %v13368_v35 = vld [vmem:[%s16897_s3 + $0x4d8] ss:$36 sps:$4 sm:$0xff]  }
 0x464   : > { %9640 = vmatpush1.bf16.msra.mxu0 %v13302_v50  ;;  %9855 = vmatpush1.bf16.msra.mxu1 %v13305_v51  ;;  %v13371_v50 = vld [vmem:[%s16897_s3 + $0x4e0] ss:$36 sps:$4 sm:$0xff]  }
 0x465   : > { %9641 = vmatprep.subr.bf16.mxu0 %v13310_v52  ;;  %9856 = vmatprep.subr.bf16.mxu1 %v13313_v8  ;;  %v13376_v51 = vld [vmem:[%s16897_s3 + $0x524] ss:$36 sps:$4 sm:$0xff]   ;;  %v13379_v52 = vld [vmem:[%s16897_s3 + $0x52c] ss:$36 sps:$4 sm:$0xff]  }
 0x466   : > { %v13374_v8 = vld [vmem:[%s16897_s3 + $0x520] ss:$36 sps:$4 sm:$0xff]  }
 0x468   : > { %9642 = vmatpush1.bf16.msra.mxu0 %v13308_v9  ;;  %9857 = vmatpush1.bf16.msra.mxu1 %v13311_v53  ;;  %v13377_v9 = vld [vmem:[%s16897_s3 + $0x528] ss:$36 sps:$4 sm:$0xff]  }
 0x469   : > { %9643 = vmatprep.subr.bf16.mxu0 %v13316_v54  ;;  %9858 = vmatprep.subr.bf16.mxu1 %v13319_v59  ;;  %v13382_v53 = vld [vmem:[%s16897_s3 + $0x56c] ss:$36 sps:$4 sm:$0xff]   ;;  %v13385_v54 = vld [vmem:[%s16897_s3 + $0x574] ss:$36 sps:$4 sm:$0xff]  }
 0x46a   : > { %v13380_v59 = vld [vmem:[%s16897_s3 + $0x568] ss:$36 sps:$4 sm:$0xff]  }
 0x46c   : > { %9644 = vmatpush1.bf16.msra.mxu0 %v13314_v43  ;;  %9859 = vmatpush1.bf16.msra.mxu1 %v13317_v56  ;;  %v13383_v43 = vld [vmem:[%s16897_s3 + $0x570] ss:$36 sps:$4 sm:$0xff]  }
 0x46d   : > { %9645 = vmatprep.subr.bf16.mxu0 %v13322_v40  ;;  %9860 = vmatprep.subr.bf16.mxu1 %v13325_v44  ;;  %v13388_v56 = vld [vmem:[%s16897_s3 + $0x5b4] ss:$36 sps:$4 sm:$0xff]   ;;  %v13391_v40 = vld [vmem:[%s16897_s3 + $0x5bc] ss:$36 sps:$4 sm:$0xff]  }
 0x46e   : > { %v13386_v44 = vld [vmem:[%s16897_s3 + $0x5b0] ss:$36 sps:$4 sm:$0xff]  }
 0x470   : > { %9646 = vmatpush1.bf16.msra.mxu0 %v13320_v42  ;;  %9861 = vmatpush1.bf16.msra.mxu1 %v13323_v63  ;;  %v13389_v42 = vld [vmem:[%s16897_s3 + $0x5b8] ss:$36 sps:$4 sm:$0xff]  }
 0x471   : > { %9647 = vmatprep.subr.bf16.mxu0 %v13328_v45  ;;  %9862 = vmatprep.subr.bf16.mxu1 %v13331_v60  ;;  %v13394_v63 = vld [vmem:[%s16897_s3 + $0x5fc] ss:$36 sps:$4 sm:$0xff]   ;;  %v13397_v45 = vld [vmem:[%s16897_s3 + $0x604] ss:$36 sps:$4 sm:$0xff]  }
 0x472   : > { %v13392_v60 = vld [vmem:[%s16897_s3 + $0x5f8] ss:$36 sps:$4 sm:$0xff]  }
 0x474   : > { %9648 = vmatpush1.bf16.msra.mxu0 %v13326_v61  ;;  %9863 = vmatpush1.bf16.msra.mxu1 %v13329_v62  ;;  %v13395_v61 = vld [vmem:[%s16897_s3 + $0x600] ss:$36 sps:$4 sm:$0xff]  }
 0x475   : > { %9649 = vmatprep.subr.bf16.mxu0 %v13334_v0  ;;  %9864 = vmatprep.subr.bf16.mxu1 %v13337_v2  ;;  %v13400_v62 = vld [vmem:[%s16897_s3 + $0x644] ss:$36 sps:$4 sm:$0xff]   ;;  %v13403_v0 = vld [vmem:[%s16897_s3 + $0x64c] ss:$36 sps:$4 sm:$0xff]  }
 0x476   : > { %v13398_v2 = vld [vmem:[%s16897_s3 + $0x640] ss:$36 sps:$4 sm:$0xff]  }
 0x478   : > { %9650 = vmatpush1.bf16.msra.mxu0 %v13332_v4  ;;  %9865 = vmatpush1.bf16.msra.mxu1 %v13335_v6  ;;  %v13401_v4 = vld [vmem:[%s16897_s3 + $0x648] ss:$36 sps:$4 sm:$0xff]  }
 0x479   : > { %9651 = vmatprep.subr.bf16.mxu0 %v13340_v7  ;;  %9866 = vmatprep.subr.bf16.mxu1 %v13343_v10  ;;  %v13406_v6 = vld [vmem:[%s16897_s3 + $0x68c] ss:$36 sps:$4 sm:$0xff]   ;;  %v13409_v7 = vld [vmem:[%s16897_s3 + $0x694] ss:$36 sps:$4 sm:$0xff]  }
 0x47a   : > { %v13404_v10 = vld [vmem:[%s16897_s3 + $0x688] ss:$36 sps:$4 sm:$0xff]  }
 0x47c   : > { %9652 = vmatpush1.bf16.msra.mxu0 %v13338_v13  ;;  %9867 = vmatpush1.bf16.msra.mxu1 %v13341_v15  ;;  %v13407_v13 = vld [vmem:[%s16897_s3 + $0x690] ss:$36 sps:$4 sm:$0xff]  }
 0x47d   : > { %9653 = vmatprep.subr.bf16.mxu0 %v13346_v16  ;;  %9868 = vmatprep.subr.bf16.mxu1 %v13349_v22  ;;  %v13412_v15 = vld [vmem:[%s16897_s3 + $0x6d4] ss:$36 sps:$4 sm:$0xff]   ;;  %v13415_v16 = vld [vmem:[%s16897_s3 + $0x6dc] ss:$36 sps:$4 sm:$0xff]  }
 0x47e   : > { %v13410_v22 = vld [vmem:[%s16897_s3 + $0x6d0] ss:$36 sps:$4 sm:$0xff]  }
 0x480   : > { %9654 = vmatpush1.bf16.msra.mxu0 %v13344_v18  ;;  %9869 = vmatpush1.bf16.msra.mxu1 %v13347_v1  ;;  %v13413_v18 = vld [vmem:[%s16897_s3 + $0x6d8] ss:$36 sps:$4 sm:$0xff]  }
 0x481   : > { %9655 = vmatprep.subr.bf16.mxu0 %v13352_v3  ;;  %9870 = vmatprep.subr.bf16.mxu1 %v13355_v38  ;;  %v13418_v1 = vld [vmem:[%s16897_s3 + $0x71c] ss:$36 sps:$4 sm:$0xff]   ;;  %v13421_v3 = vld [vmem:[%s16897_s3 + $0x724] ss:$36 sps:$4 sm:$0xff]  }
 0x482   : > { %v13416_v38 = vld [vmem:[%s16897_s3 + $0x718] ss:$36 sps:$4 sm:$0xff]  }
 0x484   : > { %9656 = vmatpush1.bf16.msra.mxu0 %v13350_v21  ;;  %9871 = vmatpush1.bf16.msra.mxu1 %v13353_v28  ;;  %v13419_v21 = vld [vmem:[%s16897_s3 + $0x720] ss:$36 sps:$4 sm:$0xff]  }
 0x485   : > { %9657 = vmatprep.subr.bf16.mxu0 %v13358_v29  ;;  %9872 = vmatprep.subr.bf16.mxu1 %v13361_v31  ;;  %v13424_v28 = vld [vmem:[%s16897_s3 + $0x764] ss:$36 sps:$4 sm:$0xff]   ;;  %v13427_v29 = vld [vmem:[%s16897_s3 + $0x76c] ss:$36 sps:$4 sm:$0xff]  }
 0x486   : > { %v13422_v31 = vld [vmem:[%s16897_s3 + $0x760] ss:$36 sps:$4 sm:$0xff]  }
 0x488   : > { %9658 = vmatpush1.bf16.msra.mxu0 %v13356_v32  ;;  %9873 = vmatpush1.bf16.msra.mxu1 %v13359_v36  ;;  %v13425_v32 = vld [vmem:[%s16897_s3 + $0x768] ss:$36 sps:$4 sm:$0xff]  }
 0x489   : > { %9670 = vmatprep.subr.bf16.mxu0 %v13364_v37  ;;  %9885 = vmatprep.subr.bf16.mxu1 %v13367_v39  ;;  %v13430_v36 = vld [vmem:[%s16897_s3 + $0x7ac] ss:$36 sps:$4 sm:$0xff]   ;;  %v13433_v37 = vld [vmem:[%s16897_s3 + $0x7b4] ss:$36 sps:$4 sm:$0xff]  }
 0x48a   : > { %v13428_v39 = vld [vmem:[%s16897_s3 + $0x7a8] ss:$36 sps:$4 sm:$0xff]  }
 0x48b   : > { %9660 = vmatmul.mubr.bf16.vlgmr.msra.gmra.mrb[4].mxu0 %v14886_v30  ;;  %9875 = vmatmul.mubr.bf16.vlgmr.msra.gmra.mrb[4].mxu1 %v14886_v30 }
 0x48c   : > { %9671 = vmatpush1.bf16.msra.mxu0 %v13362_v46  ;;  %9886 = vmatpush1.bf16.msra.mxu1 %v13365_v47  ;;  %v13431_v46 = vld [vmem:[%s16897_s3 + $0x7b0] ss:$36 sps:$4 sm:$0xff]  }
 0x48d   : > { %9672 = vmatprep.subr.bf16.mxu0 %v13370_v48  ;;  %9887 = vmatprep.subr.bf16.mxu1 %v13373_v34  ;;  %v13436_v47 = vld [vmem:[%s16897_s3 + $0x7f4] ss:$36 sps:$4 sm:$0xff]   ;;  %v13439_v48 = vld [vmem:[%s16897_s3 + $0x7fc] ss:$36 sps:$4 sm:$0xff]  }
 0x48e   : > { %9702 = vmatprep.mubr.bf16.mxu0 %v15059_v58  ;;  %9917 = vmatprep.mubr.bf16.mxu1 %v15059_v58  ;;  %v13434_v34 = vld [vmem:[%s16897_s3 + $0x7f0] ss:$36 sps:$4 sm:$0xff]  }
 0x490   : > { %9673 = vmatpush1.bf16.msra.mxu0 %v13368_v35  ;;  %9888 = vmatpush1.bf16.msra.mxu1 %v13371_v50  ;;  %v13437_v35 = vld [vmem:[%s16897_s3 + $0x7f8] ss:$36 sps:$4 sm:$0xff]  }
 0x491   : > { %9674 = vmatprep.subr.bf16.mxu0 %v13376_v51  ;;  %9889 = vmatprep.subr.bf16.mxu1 %v13379_v52  ;;  %v13442_v50 = vld [vmem:[%s16897_s3 + $0x83c] ss:$36 sps:$4 sm:$0xff]   ;;  %v13445_v51 = vld [vmem:[%s16897_s3 + $0x844] ss:$36 sps:$4 sm:$0xff]  }
 0x492   : > { %v13440_v52 = vld [vmem:[%s16897_s3 + $0x838] ss:$36 sps:$4 sm:$0xff]  }
 0x494   : > { %9675 = vmatpush1.bf16.msra.mxu0 %v13374_v8  ;;  %9890 = vmatpush1.bf16.msra.mxu1 %v13377_v9  ;;  %v13443_v8 = vld [vmem:[%s16897_s3 + $0x840] ss:$36 sps:$4 sm:$0xff]  }
 0x495   : > { %9676 = vmatprep.subr.bf16.mxu0 %v13382_v53  ;;  %9891 = vmatprep.subr.bf16.mxu1 %v13385_v54  ;;  %v13448_v9 = vld [vmem:[%s16897_s3 + $0x884] ss:$36 sps:$4 sm:$0xff]   ;;  %v13451_v53 = vld [vmem:[%s16897_s3 + $0x88c] ss:$36 sps:$4 sm:$0xff]  }
 0x496   : > { %v13446_v54 = vld [vmem:[%s16897_s3 + $0x880] ss:$36 sps:$4 sm:$0xff]  }
 0x498   : > { %9677 = vmatpush1.bf16.msra.mxu0 %v13380_v59  ;;  %9892 = vmatpush1.bf16.msra.mxu1 %v13383_v43  ;;  %v13449_v59 = vld [vmem:[%s16897_s3 + $0x888] ss:$36 sps:$4 sm:$0xff]  }
 0x499   : > { %9678 = vmatprep.subr.bf16.mxu0 %v13388_v56  ;;  %9893 = vmatprep.subr.bf16.mxu1 %v13391_v40  ;;  %v13454_v43 = vld [vmem:[%s16897_s3 + $0x8cc] ss:$36 sps:$4 sm:$0xff]   ;;  %v13457_v56 = vld [vmem:[%s16897_s3 + $0x8d4] ss:$36 sps:$4 sm:$0xff]  }
 0x49a   : > { %v13452_v40 = vld [vmem:[%s16897_s3 + $0x8c8] ss:$36 sps:$4 sm:$0xff]  }
 0x49c   : > { %9679 = vmatpush1.bf16.msra.mxu0 %v13386_v44  ;;  %9894 = vmatpush1.bf16.msra.mxu1 %v13389_v42  ;;  %v13455_v44 = vld [vmem:[%s16897_s3 + $0x8d0] ss:$36 sps:$4 sm:$0xff]  }
 0x49d   : > { %9680 = vmatprep.subr.bf16.mxu0 %v13394_v63  ;;  %9895 = vmatprep.subr.bf16.mxu1 %v13397_v45  ;;  %v13460_v42 = vld [vmem:[%s16897_s3 + $0x914] ss:$36 sps:$4 sm:$0xff]   ;;  %v13463_v63 = vld [vmem:[%s16897_s3 + $0x91c] ss:$36 sps:$4 sm:$0xff]  }
 0x49e   : > { %v13458_v45 = vld [vmem:[%s16897_s3 + $0x910] ss:$36 sps:$4 sm:$0xff]  }
 0x4a0   : > { %9681 = vmatpush1.bf16.msra.mxu0 %v13392_v60  ;;  %9896 = vmatpush1.bf16.msra.mxu1 %v13395_v61  ;;  %v13461_v60 = vld [vmem:[%s16897_s3 + $0x918] ss:$36 sps:$4 sm:$0xff]  }
 0x4a1   : > { %9682 = vmatprep.subr.bf16.mxu0 %v13400_v62  ;;  %9897 = vmatprep.subr.bf16.mxu1 %v13403_v0  ;;  %v13466_v61 = vld [vmem:[%s16897_s3 + $0x95c] ss:$36 sps:$4 sm:$0xff]   ;;  %v13469_v62 = vld [vmem:[%s16897_s3 + $0x964] ss:$36 sps:$4 sm:$0xff]  }
 0x4a2   : > { %v13464_v0 = vld [vmem:[%s16897_s3 + $0x958] ss:$36 sps:$4 sm:$0xff]  }
 0x4a4   : > { %9683 = vmatpush1.bf16.msra.mxu0 %v13398_v2  ;;  %9898 = vmatpush1.bf16.msra.mxu1 %v13401_v4  ;;  %v13467_v2 = vld [vmem:[%s16897_s3 + $0x960] ss:$36 sps:$4 sm:$0xff]  }
 0x4a5   : > { %9684 = vmatprep.subr.bf16.mxu0 %v13406_v6  ;;  %9899 = vmatprep.subr.bf16.mxu1 %v13409_v7  ;;  %v13472_v4 = vld [vmem:[%s16897_s3 + $0x9a4] ss:$36 sps:$4 sm:$0xff]   ;;  %v13475_v6 = vld [vmem:[%s16897_s3 + $0x9ac] ss:$36 sps:$4 sm:$0xff]  }
 0x4a6   : > { %v13470_v7 = vld [vmem:[%s16897_s3 + $0x9a0] ss:$36 sps:$4 sm:$0xff]  }
 0x4a8   : > { %9685 = vmatpush1.bf16.msra.mxu0 %v13404_v10  ;;  %9900 = vmatpush1.bf16.msra.mxu1 %v13407_v13  ;;  %v13473_v10 = vld [vmem:[%s16897_s3 + $0x9a8] ss:$36 sps:$4 sm:$0xff]  }
 0x4a9   : > { %9686 = vmatprep.subr.bf16.mxu0 %v13412_v15  ;;  %9901 = vmatprep.subr.bf16.mxu1 %v13415_v16  ;;  %v13478_v13 = vld [vmem:[%s16897_s3 + $0x9ec] ss:$36 sps:$4 sm:$0xff]   ;;  %v13481_v15 = vld [vmem:[%s16897_s3 + $0x9f4] ss:$36 sps:$4 sm:$0xff]  }
 0x4aa   : > { %v13476_v16 = vld [vmem:[%s16897_s3 + $0x9e8] ss:$36 sps:$4 sm:$0xff]  }
 0x4ac   : > { %9687 = vmatpush1.bf16.msra.mxu0 %v13410_v22  ;;  %9902 = vmatpush1.bf16.msra.mxu1 %v13413_v18  ;;  %v13479_v22 = vld [vmem:[%s16897_s3 + $0x9f0] ss:$36 sps:$4 sm:$0xff]  }
 0x4ad   : > { %9688 = vmatprep.subr.bf16.mxu0 %v13418_v1  ;;  %9903 = vmatprep.subr.bf16.mxu1 %v13421_v3  ;;  %v13484_v18 = vld [vmem:[%s16897_s3 + $0xa34] ss:$36 sps:$4 sm:$0xff]   ;;  %v13487_v1 = vld [vmem:[%s16897_s3 + $0xa3c] ss:$36 sps:$4 sm:$0xff]  }
 0x4ae   : > { %v13482_v3 = vld [vmem:[%s16897_s3 + $0xa30] ss:$36 sps:$4 sm:$0xff]  }
 0x4b0   : > { %9689 = vmatpush1.bf16.msra.mxu0 %v13416_v38  ;;  %9904 = vmatpush1.bf16.msra.mxu1 %v13419_v21  ;;  %v13485_v38 = vld [vmem:[%s16897_s3 + $0xa38] ss:$36 sps:$4 sm:$0xff]  }
 0x4b1   : > { %9690 = vmatprep.subr.bf16.mxu0 %v13424_v28  ;;  %9905 = vmatprep.subr.bf16.mxu1 %v13427_v29  ;;  %v13490_v21 = vld [vmem:[%s16897_s3 + $0xa7c] ss:$36 sps:$4 sm:$0xff]   ;;  %v13493_v28 = vld [vmem:[%s16897_s3 + $0xa84] ss:$36 sps:$4 sm:$0xff]  }
 0x4b2   : > { %v13488_v29 = vld [vmem:[%s16897_s3 + $0xa78] ss:$36 sps:$4 sm:$0xff]  }
 0x4b4   : > { %9691 = vmatpush1.bf16.msra.mxu0 %v13422_v31  ;;  %9906 = vmatpush1.bf16.msra.mxu1 %v13425_v32  ;;  %v13491_v31 = vld [vmem:[%s16897_s3 + $0xa80] ss:$36 sps:$4 sm:$0xff]  }
 0x4b5   : > { %9692 = vmatprep.subr.bf16.mxu0 %v13430_v36  ;;  %9907 = vmatprep.subr.bf16.mxu1 %v13433_v37  ;;  %v13496_v32 = vld [vmem:[%s16897_s3 + $0xac4] ss:$36 sps:$4 sm:$0xff]   ;;  %v13499_v36 = vld [vmem:[%s16897_s3 + $0xacc] ss:$36 sps:$4 sm:$0xff]  }
 0x4b6   : > { %v13494_v37 = vld [vmem:[%s16897_s3 + $0xac0] ss:$36 sps:$4 sm:$0xff]  }
 0x4b8   : > { %9693 = vmatpush1.bf16.msra.mxu0 %v13428_v39  ;;  %9908 = vmatpush1.bf16.msra.mxu1 %v13431_v46  ;;  %v13497_v39 = vld [vmem:[%s16897_s3 + $0xac8] ss:$36 sps:$4 sm:$0xff]  }
 0x4b9   : > { %9694 = vmatprep.subr.bf16.mxu0 %v13436_v47  ;;  %9909 = vmatprep.subr.bf16.mxu1 %v13439_v48  ;;  %v13502_v46 = vld [vmem:[%s16897_s3 + $0xb0c] ss:$36 sps:$4 sm:$0xff]   ;;  %v13505_v47 = vld [vmem:[%s16897_s3 + $0xb14] ss:$36 sps:$4 sm:$0xff]  }
 0x4ba   : > { %v13500_v48 = vld [vmem:[%s16897_s3 + $0xb08] ss:$36 sps:$4 sm:$0xff]  }
 0x4bc   : > { %9695 = vmatpush1.bf16.msra.mxu0 %v13434_v34  ;;  %9910 = vmatpush1.bf16.msra.mxu1 %v13437_v35  ;;  %v13503_v34 = vld [vmem:[%s16897_s3 + $0xb10] ss:$36 sps:$4 sm:$0xff]  }
 0x4bd   : > { %9696 = vmatprep.subr.bf16.mxu0 %v13442_v50  ;;  %9911 = vmatprep.subr.bf16.mxu1 %v13445_v51  ;;  %v13508_v35 = vld [vmem:[%s16897_s3 + $0xb54] ss:$36 sps:$4 sm:$0xff]   ;;  %v13511_v50 = vld [vmem:[%s16897_s3 + $0xb5c] ss:$36 sps:$4 sm:$0xff]  }
 0x4be   : > { %v13506_v51 = vld [vmem:[%s16897_s3 + $0xb50] ss:$36 sps:$4 sm:$0xff]  }
 0x4c0   : > { %9697 = vmatpush1.bf16.msra.mxu0 %v13440_v52  ;;  %9912 = vmatpush1.bf16.msra.mxu1 %v13443_v8  ;;  %v13509_v52 = vld [vmem:[%s16897_s3 + $0xb58] ss:$36 sps:$4 sm:$0xff]  }
 0x4c1   : > { %9698 = vmatprep.subr.bf16.mxu0 %v13448_v9  ;;  %9913 = vmatprep.subr.bf16.mxu1 %v13451_v53  ;;  %v13514_v8 = vld [vmem:[%s16897_s3 + $0xb9c] ss:$36 sps:$4 sm:$0xff]   ;;  %v13517_v9 = vld [vmem:[%s16897_s3 + $0xba4] ss:$36 sps:$4 sm:$0xff]  }
 0x4c2   : > { %v13512_v53 = vld [vmem:[%s16897_s3 + $0xb98] ss:$36 sps:$4 sm:$0xff]  }
 0x4c4   : > { %9699 = vmatpush1.bf16.msra.mxu0 %v13446_v54  ;;  %9914 = vmatpush1.bf16.msra.mxu1 %v13449_v59  ;;  %v13515_v54 = vld [vmem:[%s16897_s3 + $0xba0] ss:$36 sps:$4 sm:$0xff]  }
 0x4c5   : > { %9700 = vmatprep.subr.bf16.mxu0 %v13454_v43  ;;  %9915 = vmatprep.subr.bf16.mxu1 %v13457_v56  ;;  %v13520_v59 = vld [vmem:[%s16897_s3 + $0xbe4] ss:$36 sps:$4 sm:$0xff]   ;;  %v13523_v43 = vld [vmem:[%s16897_s3 + $0xbec] ss:$36 sps:$4 sm:$0xff]  }
 0x4c6   : > { %v13518_v56 = vld [vmem:[%s16897_s3 + $0xbe0] ss:$36 sps:$4 sm:$0xff]  }
 0x4c8   : > { %9701 = vmatpush1.bf16.msra.mxu0 %v13452_v40  ;;  %9916 = vmatpush1.bf16.msra.mxu1 %v13455_v44  ;;  %v13521_v40 = vld [vmem:[%s16897_s3 + $0xbe8] ss:$36 sps:$4 sm:$0xff]  }
 0x4c9   : > { %9713 = vmatprep.subr.bf16.mxu0 %v13460_v42  ;;  %9928 = vmatprep.subr.bf16.mxu1 %v13463_v63  ;;  %v13526_v44 = vld [vmem:[%s16897_s3 + $0xc2c] ss:$36 sps:$4 sm:$0xff]   ;;  %v13529_v42 = vld [vmem:[%s16897_s3 + $0xc34] ss:$36 sps:$4 sm:$0xff]  }
 0x4ca   : > { %v13524_v63 = vld [vmem:[%s16897_s3 + $0xc28] ss:$36 sps:$4 sm:$0xff]  }
 0x4cb   : > { %9703 = vmatmul.mubr.bf16.vlgmr.msra.gmra.mrb[4].mxu0 %v15127_v25  ;;  %9918 = vmatmul.mubr.bf16.vlgmr.msra.gmra.mrb[4].mxu1 %v15127_v25 }
 0x4cc   : > { %9714 = vmatpush1.bf16.msra.mxu0 %v13458_v45  ;;  %9929 = vmatpush1.bf16.msra.mxu1 %v13461_v60  ;;  %v13527_v45 = vld [vmem:[%s16897_s3 + $0xc30] ss:$36 sps:$4 sm:$0xff]  }
 0x4cd   : > { %9715 = vmatprep.subr.bf16.mxu0 %v13466_v61  ;;  %9930 = vmatprep.subr.bf16.mxu1 %v13469_v62  ;;  %v13532_v60 = vld [vmem:[%s16897_s3 + $0xc74] ss:$36 sps:$4 sm:$0xff]   ;;  %v13535_v61 = vld [vmem:[%s16897_s3 + $0xc7c] ss:$36 sps:$4 sm:$0xff]  }
 0x4ce   : > { %9745 = vmatprep.mubr.bf16.mxu0 %v15233_v26  ;;  %9960 = vmatprep.mubr.bf16.mxu1 %v15233_v26  ;;  %v13530_v62 = vld [vmem:[%s16897_s3 + $0xc70] ss:$36 sps:$4 sm:$0xff]  }
 0x4d0   : > { %9716 = vmatpush1.bf16.msra.mxu0 %v13464_v0  ;;  %9931 = vmatpush1.bf16.msra.mxu1 %v13467_v2  ;;  %v13533_v0 = vld [vmem:[%s16897_s3 + $0xc78] ss:$36 sps:$4 sm:$0xff]  }
 0x4d1   : > { %9717 = vmatprep.subr.bf16.mxu0 %v13472_v4  ;;  %9932 = vmatprep.subr.bf16.mxu1 %v13475_v6  ;;  %v13538_v2 = vld [vmem:[%s16897_s3 + $0xcbc] ss:$36 sps:$4 sm:$0xff]   ;;  %v13541_v4 = vld [vmem:[%s16897_s3 + $0xcc4] ss:$36 sps:$4 sm:$0xff]  }
 0x4d2   : > { %v13536_v6 = vld [vmem:[%s16897_s3 + $0xcb8] ss:$36 sps:$4 sm:$0xff]  }
 0x4d4   : > { %9718 = vmatpush1.bf16.msra.mxu0 %v13470_v7  ;;  %9933 = vmatpush1.bf16.msra.mxu1 %v13473_v10  ;;  %v13539_v7 = vld [vmem:[%s16897_s3 + $0xcc0] ss:$36 sps:$4 sm:$0xff]  }
 0x4d5   : > { %9719 = vmatprep.subr.bf16.mxu0 %v13478_v13  ;;  %9934 = vmatprep.subr.bf16.mxu1 %v13481_v15  ;;  %v13544_v10 = vld [vmem:[%s16897_s3 + $0xd04] ss:$36 sps:$4 sm:$0xff]   ;;  %v13547_v13 = vld [vmem:[%s16897_s3 + $0xd0c] ss:$36 sps:$4 sm:$0xff]  }
 0x4d6   : > { %v13542_v15 = vld [vmem:[%s16897_s3 + $0xd00] ss:$36 sps:$4 sm:$0xff]  }
 0x4d8   : > { %9720 = vmatpush1.bf16.msra.mxu0 %v13476_v16  ;;  %9935 = vmatpush1.bf16.msra.mxu1 %v13479_v22  ;;  %v13545_v16 = vld [vmem:[%s16897_s3 + $0xd08] ss:$36 sps:$4 sm:$0xff]  }
 0x4d9   : > { %9721 = vmatprep.subr.bf16.mxu0 %v13484_v18  ;;  %9936 = vmatprep.subr.bf16.mxu1 %v13487_v1  ;;  %v13550_v22 = vld [vmem:[%s16897_s3 + $0xd4c] ss:$36 sps:$4 sm:$0xff]   ;;  %v13553_v18 = vld [vmem:[%s16897_s3 + $0xd54] ss:$36 sps:$4 sm:$0xff]  }
 0x4da   : > { %v13548_v1 = vld [vmem:[%s16897_s3 + $0xd48] ss:$36 sps:$4 sm:$0xff]  }
 0x4dc   : > { %9722 = vmatpush1.bf16.msra.mxu0 %v13482_v3  ;;  %9937 = vmatpush1.bf16.msra.mxu1 %v13485_v38  ;;  %v13551_v3 = vld [vmem:[%s16897_s3 + $0xd50] ss:$36 sps:$4 sm:$0xff]  }
 0x4dd   : > { %9723 = vmatprep.subr.bf16.mxu0 %v13490_v21  ;;  %9938 = vmatprep.subr.bf16.mxu1 %v13493_v28  ;;  %v13556_v38 = vld [vmem:[%s16897_s3 + $0xd94] ss:$36 sps:$4 sm:$0xff]   ;;  %v13559_v21 = vld [vmem:[%s16897_s3 + $0xd9c] ss:$36 sps:$4 sm:$0xff]  }
 0x4de   : > { %v13554_v28 = vld [vmem:[%s16897_s3 + $0xd90] ss:$36 sps:$4 sm:$0xff]  }
 0x4e0   : > { %9724 = vmatpush1.bf16.msra.mxu0 %v13488_v29  ;;  %9939 = vmatpush1.bf16.msra.mxu1 %v13491_v31  ;;  %v13557_v29 = vld [vmem:[%s16897_s3 + $0xd98] ss:$36 sps:$4 sm:$0xff]  }
 0x4e1   : > { %9725 = vmatprep.subr.bf16.mxu0 %v13496_v32  ;;  %9940 = vmatprep.subr.bf16.mxu1 %v13499_v36  ;;  %v13562_v31 = vld [vmem:[%s16897_s3 + $0xddc] ss:$36 sps:$4 sm:$0xff]   ;;  %v13565_v32 = vld [vmem:[%s16897_s3 + $0xde4] ss:$36 sps:$4 sm:$0xff]  }
 0x4e2   : > { %v13560_v36 = vld [vmem:[%s16897_s3 + $0xdd8] ss:$36 sps:$4 sm:$0xff]  }
 0x4e4   : > { %9726 = vmatpush1.bf16.msra.mxu0 %v13494_v37  ;;  %9941 = vmatpush1.bf16.msra.mxu1 %v13497_v39  ;;  %v13563_v37 = vld [vmem:[%s16897_s3 + $0xde0] ss:$36 sps:$4 sm:$0xff]  }
 0x4e5   : > { %9727 = vmatprep.subr.bf16.mxu0 %v13502_v46  ;;  %9942 = vmatprep.subr.bf16.mxu1 %v13505_v47  ;;  %v13568_v39 = vld [vmem:[%s16897_s3 + $0xe24] ss:$36 sps:$4 sm:$0xff]   ;;  %v13571_v46 = vld [vmem:[%s16897_s3 + $0xe2c] ss:$36 sps:$4 sm:$0xff]  }
 0x4e6   : > { %v13566_v47 = vld [vmem:[%s16897_s3 + $0xe20] ss:$36 sps:$4 sm:$0xff]  }
 0x4e8   : > { %9728 = vmatpush1.bf16.msra.mxu0 %v13500_v48  ;;  %9943 = vmatpush1.bf16.msra.mxu1 %v13503_v34  ;;  %v13569_v48 = vld [vmem:[%s16897_s3 + $0xe28] ss:$36 sps:$4 sm:$0xff]  }
 0x4e9   : > { %9729 = vmatprep.subr.bf16.mxu0 %v13508_v35  ;;  %9944 = vmatprep.subr.bf16.mxu1 %v13511_v50  ;;  %v13574_v34 = vld [vmem:[%s16897_s3 + $0xe6c] ss:$36 sps:$4 sm:$0xff]   ;;  %v13577_v35 = vld [vmem:[%s16897_s3 + $0xe74] ss:$36 sps:$4 sm:$0xff]  }
 0x4ea   : > { %v13572_v50 = vld [vmem:[%s16897_s3 + $0xe68] ss:$36 sps:$4 sm:$0xff]  }
 0x4ec   : > { %9730 = vmatpush1.bf16.msra.mxu0 %v13506_v51  ;;  %9945 = vmatpush1.bf16.msra.mxu1 %v13509_v52  ;;  %v13575_v51 = vld [vmem:[%s16897_s3 + $0xe70] ss:$36 sps:$4 sm:$0xff]  }
 0x4ed   : > { %9731 = vmatprep.subr.bf16.mxu0 %v13514_v8  ;;  %9946 = vmatprep.subr.bf16.mxu1 %v13517_v9  ;;  %v13580_v52 = vld [vmem:[%s16897_s3 + $0xeb4] ss:$36 sps:$4 sm:$0xff]   ;;  %v13583_v8 = vld [vmem:[%s16897_s3 + $0xebc] ss:$36 sps:$4 sm:$0xff]  }
 0x4ee   : > { %v13578_v9 = vld [vmem:[%s16897_s3 + $0xeb0] ss:$36 sps:$4 sm:$0xff]  }
 0x4f0   : > { %9732 = vmatpush1.bf16.msra.mxu0 %v13512_v53  ;;  %9947 = vmatpush1.bf16.msra.mxu1 %v13515_v54  ;;  %v13581_v53 = vld [vmem:[%s16897_s3 + $0xeb8] ss:$36 sps:$4 sm:$0xff]   ;;  %v16363_v54 = vld [vmem:[%s16898_s4] sm:$0xff] }
 0x4f1   : > { %9733 = vmatprep.subr.bf16.mxu0 %v13520_v59  ;;  %9948 = vmatprep.subr.bf16.mxu1 %v13523_v43  ;;  %v13586_v59 = vld [vmem:[%s16897_s3 + $0xefc] ss:$36 sps:$4 sm:$0xff]   ;;  %v13589_v43 = vld [vmem:[%s16897_s3 + $0xf04] ss:$36 sps:$4 sm:$0xff]  }
 0x4f4   : > { %9734 = vmatpush1.bf16.msra.mxu0 %v13518_v56  ;;  %9949 = vmatpush1.bf16.msra.mxu1 %v13521_v40  ;;  %v5843_v56 = vrot.slane %v16363_v54, %v4884_v14  ;;  %v5851_v40 = vrot.slane %v16363_v54, %v4892_v49  ;;  %v13587_v14 = vld [vmem:[%s16897_s3 + $0xf00] ss:$36 sps:$4 sm:$0xff]  }
 0x4f5   : > { %9735 = vmatprep.subr.bf16.mxu0 %v13526_v44  ;;  %9950 = vmatprep.subr.bf16.mxu1 %v13529_v42  ;;  %v5847_v44 = vrot.slane %v16363_v54, %v4888_v17  ;;  %v5855_v42 = vrot.slane %v16363_v54, %v4896_v41  ;;  %v13592_v49 = vld [vmem:[%s16897_s3 + $0xf44] ss:$36 sps:$4 sm:$0xff]   ;;  %v13595_v17 = vld [vmem:[%s16897_s3 + $0xf4c] ss:$36 sps:$4 sm:$0xff]  }
 0x4f8   : > { %9736 = vmatpush1.bf16.msra.mxu0 %v13524_v63  ;;  %9951 = vmatpush1.bf16.msra.mxu1 %v13527_v45  ;;  %v13584_v63 = vld [vmem:[%s16897_s3 + $0xef8] ss:$36 sps:$4 sm:$0xff]  }
 0x4f9   : > { %9737 = vmatprep.subr.bf16.mxu0 %v13532_v60  ;;  %9952 = vmatprep.subr.bf16.mxu1 %v13535_v61 }
 0x4fc   : > { %9738 = vmatpush1.bf16.msra.mxu0 %v13530_v62  ;;  %9953 = vmatpush1.bf16.msra.mxu1 %v13533_v0 }
 0x4fd   : > { %9739 = vmatprep.subr.bf16.mxu0 %v13538_v2  ;;  %9954 = vmatprep.subr.bf16.mxu1 %v13541_v4 }
 0x500   : > { %9740 = vmatpush1.bf16.msra.mxu0 %v13536_v6  ;;  %9955 = vmatpush1.bf16.msra.mxu1 %v13539_v7 }
 0x501   : > { %9741 = vmatprep.subr.bf16.mxu0 %v13544_v10  ;;  %9956 = vmatprep.subr.bf16.mxu1 %v13547_v13  ;;  %v13590_v10 = vld [vmem:[%s16897_s3 + $0xf40] ss:$36 sps:$4 sm:$0xff]   ;;  %v13593_v13 = vld [vmem:[%s16897_s3 + $0xf48] ss:$36 sps:$4 sm:$0xff]  }
 0x504   : > { %9742 = vmatpush1.bf16.msra.mxu0 %v13542_v15  ;;  %9957 = vmatpush1.bf16.msra.mxu1 %v13545_v16 }
 0x505   : > { %9743 = vmatprep.subr.bf16.mxu0 %v13550_v22  ;;  %9958 = vmatprep.subr.bf16.mxu1 %v13553_v18 }
 0x508   : > { %9744 = vmatpush1.bf16.msra.mxu0 %v13548_v1  ;;  %9959 = vmatpush1.bf16.msra.mxu1 %v13551_v3  ;;  %v13598_v1 = vld [vmem:[%s16897_s3 + $0xf8c] ss:$36 sps:$4 sm:$0xff]   ;;  %v13601_v3 = vld [vmem:[%s16897_s3 + $0xf94] ss:$36 sps:$4 sm:$0xff]  }
 0x509   : > { %9756 = vmatprep.subr.bf16.mxu0 %v13556_v38  ;;  %9971 = vmatprep.subr.bf16.mxu1 %v13559_v21 }
 0x50b   : > { %9746 = vmatmul.mubr.bf16.vlgmr.msra.gmra.mrb[4].mxu0 %v15376_v33  ;;  %9961 = vmatmul.mubr.bf16.vlgmr.msra.gmra.mrb[4].mxu1 %v15376_v33 }
 0x50c   : > { %9757 = vmatpush1.bf16.msra.mxu0 %v13554_v28  ;;  %9972 = vmatpush1.bf16.msra.mxu1 %v13557_v29  ;;  %v13596_v28 = vld [vmem:[%s16897_s3 + $0xf88] ss:$36 sps:$4 sm:$0xff]   ;;  %v13599_v29 = vld [vmem:[%s16897_s3 + $0xf90] ss:$36 sps:$4 sm:$0xff]  }
 0x50d   : > { %9758 = vmatprep.subr.bf16.mxu0 %v13562_v31  ;;  %9973 = vmatprep.subr.bf16.mxu1 %v13565_v32  ;;  %v13604_v31 = vld [vmem:[%s16897_s3 + $0xfd4] ss:$36 sps:$4 sm:$0xff]   ;;  %v13607_v32 = vld [vmem:[%s16897_s3 + $0xfdc] ss:$36 sps:$4 sm:$0xff]  }
 0x50e   : > { %9788 = vmatprep.mubr.bf16.mxu0 %v15409_v19  ;;  %10003 = vmatprep.mubr.bf16.mxu1 %v15409_v19 }
 0x510   : > { %9759 = vmatpush1.bf16.msra.mxu0 %v13560_v36  ;;  %9974 = vmatpush1.bf16.msra.mxu1 %v13563_v37  ;;  %v13602_v36 = vld [vmem:[%s16897_s3 + $0xfd0] ss:$36 sps:$4 sm:$0xff]   ;;  %v13605_v37 = vld [vmem:[%s16897_s3 + $0xfd8] ss:$36 sps:$4 sm:$0xff]  }
 0x511   : > { %9760 = vmatprep.subr.bf16.mxu0 %v13568_v39  ;;  %9975 = vmatprep.subr.bf16.mxu1 %v13571_v46  ;;  %v13610_v39 = vld [vmem:[%s16897_s3 + $0x101c] ss:$36 sps:$4 sm:$0xff]   ;;  %v13613_v46 = vld [vmem:[%s16897_s3 + $0x1024] ss:$36 sps:$4 sm:$0xff]  }
 0x514   : > { %9761 = vmatpush1.bf16.msra.mxu0 %v13566_v47  ;;  %9976 = vmatpush1.bf16.msra.mxu1 %v13569_v48  ;;  %v13608_v47 = vld [vmem:[%s16897_s3 + $0x1018] ss:$36 sps:$4 sm:$0xff]   ;;  %v13611_v48 = vld [vmem:[%s16897_s3 + $0x1020] ss:$36 sps:$4 sm:$0xff]  }
 0x515   : > { %9762 = vmatprep.subr.bf16.mxu0 %v13574_v34  ;;  %9977 = vmatprep.subr.bf16.mxu1 %v13577_v35  ;;  %v13616_v34 = vld [vmem:[%s16897_s3 + $0x1064] ss:$36 sps:$4 sm:$0xff]   ;;  %v13619_v35 = vld [vmem:[%s16897_s3 + $0x106c] ss:$36 sps:$4 sm:$0xff]  }
 0x518   : > { %9763 = vmatpush1.bf16.msra.mxu0 %v13572_v50  ;;  %9978 = vmatpush1.bf16.msra.mxu1 %v13575_v51  ;;  %v13614_v50 = vld [vmem:[%s16897_s3 + $0x1060] ss:$36 sps:$4 sm:$0xff]   ;;  %v13617_v51 = vld [vmem:[%s16897_s3 + $0x1068] ss:$36 sps:$4 sm:$0xff]  }
 0x519   : > { %9764 = vmatprep.subr.bf16.mxu0 %v13580_v52  ;;  %9979 = vmatprep.subr.bf16.mxu1 %v13583_v8  ;;  %v13622_v52 = vld [vmem:[%s16897_s3 + $0x10ac] ss:$36 sps:$4 sm:$0xff]   ;;  %v13625_v8 = vld [vmem:[%s16897_s3 + $0x10b4] ss:$36 sps:$4 sm:$0xff]  }
 0x51c   : > { %9765 = vmatpush1.bf16.msra.mxu0 %v13578_v9  ;;  %9980 = vmatpush1.bf16.msra.mxu1 %v13581_v53  ;;  %v13620_v9 = vld [vmem:[%s16897_s3 + $0x10a8] ss:$36 sps:$4 sm:$0xff]   ;;  %v13623_v53 = vld [vmem:[%s16897_s3 + $0x10b0] ss:$36 sps:$4 sm:$0xff]  }
 0x51d   : > { %9766 = vmatprep.subr.bf16.mxu0 %v13586_v59  ;;  %9981 = vmatprep.subr.bf16.mxu1 %v13589_v43  ;;  %v13628_v59 = vld [vmem:[%s16897_s3 + $0x10f4] ss:$36 sps:$4 sm:$0xff]   ;;  %v13631_v43 = vld [vmem:[%s16897_s3 + $0x10fc] ss:$36 sps:$4 sm:$0xff]  }
 0x51e   : > { %v9403_v45 = vpop.f32.mrb[0].mxu0  ;;  %v9618_v41 = vpop.f32.mrb[0].mxu1 }
 0x51f   : > { %v11868_v60 = vadd.f32 %v9403_v45, %v5843_v56  ;;  %v11872_v61 = vadd.f32 %v9618_v41, %v5851_v40  ;;  %v9405_v62 = vpop.f32.mrb[1].mxu0  ;;  %v9620_v0 = vpop.f32.mrb[1].mxu1  ;;  %v13638_v45 = vld [vmem:[%s16897_s3 + $0x1180] ss:$36 sps:$4 sm:$0xff]   ;;  %v13641_v41 = vld [vmem:[%s16897_s3 + $0x1188] ss:$36 sps:$4 sm:$0xff]  }
 0x520   : > { %v11869_v2 = vadd.f32 %v9405_v62, %v5847_v44  ;;  %v11873_v4 = vadd.f32 %v9620_v0, %v5855_v42  ;;  %v9407_v6 = vpop.f32.mrb[2].mxu0  ;;  %v9622_v7 = vpop.f32.mrb[2].mxu1  ;;  %9767 = vmatpush1.bf16.msra.mxu0 %v13584_v63  ;;  %9982 = vmatpush1.bf16.msra.mxu1 %v13587_v14  ;;  %v13632_v63 = vld [vmem:[%s16897_s3 + $0x1138] ss:$36 sps:$4 sm:$0xff]   ;;  %v13635_v14 = vld [vmem:[%s16897_s3 + $0x1140] ss:$36 sps:$4 sm:$0xff]  }
 0x521   : > { %10262 = vst [vmem:[#allocation4] sm:$0xff] %v11868_v60  ;;  %10264 = vst [vmem:[#allocation4 + $0x10] sm:$0xff] %v11872_v61  ;;  %v11870_v15 = vadd.f32 %v9407_v6, %v5843_v56  ;;  %v11874_v16 = vadd.f32 %v9622_v7, %v5851_v40  ;;  %v9409_v22 = vpop.f32.mrb[3].mxu0  ;;  %v9624_v18 = vpop.f32.mrb[3].mxu1  ;;  %9768 = vmatprep.subr.bf16.mxu0 %v13592_v49  ;;  %9983 = vmatprep.subr.bf16.mxu1 %v13595_v17  ;;  %v13626_v56 = vld [vmem:[%s16897_s3 + $0x10f0] ss:$36 sps:$4 sm:$0xff]  }
 0x522   : > { %10263 = vst [vmem:[#allocation4 + $0x8] sm:$0xff] %v11869_v2  ;;  %10265 = vst [vmem:[#allocation4 + $0x18] sm:$0xff] %v11873_v4  ;;  %v11871_v38 = vadd.f32 %v9409_v22, %v5847_v44  ;;  %v11875_v21 = vadd.f32 %v9624_v18, %v5855_v42  ;;  %v13629_v40 = vld [vmem:[%s16897_s3 + $0x10f8] ss:$36 sps:$4 sm:$0xff]   ;;  %v13637_v42 = vld [vmem:[%s16897_s3 + $0x1144] ss:$36 sps:$4 sm:$0xff]  }
 0x523   : > { %10271 = vst [vmem:[#allocation4 + $0x48] sm:$0xff] %v11870_v15  ;;  %10273 = vst [vmem:[#allocation4 + $0x58] sm:$0xff] %v11874_v16  ;;  %v13634_v44 = vld [vmem:[%s16897_s3 + $0x113c] ss:$36 sps:$4 sm:$0xff]   ;;  %v13640_v49 = vld [vmem:[%s16897_s3 + $0x1184] ss:$36 sps:$4 sm:$0xff]  }
 0x524   : > { %10272 = vst [vmem:[#allocation4 + $0x50] sm:$0xff] %v11871_v38  ;;  %10274 = vst [vmem:[#allocation4 + $0x60] sm:$0xff] %v11875_v21  ;;  %9769 = vmatpush1.bf16.msra.mxu0 %v13590_v10  ;;  %9984 = vmatpush1.bf16.msra.mxu1 %v13593_v13  ;;  %v13643_v17 = vld [vmem:[%s16897_s3 + $0x118c] ss:$36 sps:$4 sm:$0xff]   ;;  %v13649_v61 = vld [vmem:[%s16897_s3 + $0x11d4] ss:$36 sps:$4 sm:$0xff]  }
 0x525   : > { %9770 = vmatprep.subr.bf16.mxu0 %v13598_v1  ;;  %9985 = vmatprep.subr.bf16.mxu1 %v13601_v3  ;;  %v13646_v60 = vld [vmem:[%s16897_s3 + $0x11cc] ss:$36 sps:$4 sm:$0xff]   ;;  %v13652_v2 = vld [vmem:[%s16897_s3 + $0x1214] ss:$36 sps:$4 sm:$0xff]   ;;  %v13655_v4 = vld [vmem:[%s16897_s3 + $0x121c] ss:$36 sps:$4 sm:$0xff]  }
 0x526   : > { %v13644_v62 = vld [vmem:[%s16897_s3 + $0x11c8] ss:$36 sps:$4 sm:$0xff]   ;;  %v13647_v0 = vld [vmem:[%s16897_s3 + $0x11d0] ss:$36 sps:$4 sm:$0xff]   ;;  %v13653_v7 = vld [vmem:[%s16897_s3 + $0x1218] ss:$36 sps:$4 sm:$0xff]  }
 0x527   : > { %v13650_v6 = vld [vmem:[%s16897_s3 + $0x1210] ss:$36 sps:$4 sm:$0xff]   ;;  %v13658_v10 = vld [vmem:[%s16897_s3 + $0x125c] ss:$36 sps:$4 sm:$0xff]   ;;  %v13661_v13 = vld [vmem:[%s16897_s3 + $0x1264] ss:$36 sps:$4 sm:$0xff]  }
 0x528   : > { %9771 = vmatpush1.bf16.msra.mxu0 %v13596_v28  ;;  %9986 = vmatpush1.bf16.msra.mxu1 %v13599_v29  ;;  %v13656_v15 = vld [vmem:[%s16897_s3 + $0x1258] ss:$36 sps:$4 sm:$0xff]   ;;  %v13659_v16 = vld [vmem:[%s16897_s3 + $0x1260] ss:$36 sps:$4 sm:$0xff]   ;;  %v13667_v18 = vld [vmem:[%s16897_s3 + $0x12ac] ss:$36 sps:$4 sm:$0xff]  }
 0x529   : > { %9772 = vmatprep.subr.bf16.mxu0 %v13604_v31  ;;  %9987 = vmatprep.subr.bf16.mxu1 %v13607_v32  ;;  %v13664_v22 = vld [vmem:[%s16897_s3 + $0x12a4] ss:$36 sps:$4 sm:$0xff]   ;;  %v13670_v38 = vld [vmem:[%s16897_s3 + $0x12ec] ss:$36 sps:$4 sm:$0xff]   ;;  %v13676_v29 = vld [vmem:[%s16897_s3 + $0x1334] ss:$36 sps:$4 sm:$0xff]  }
 0x52a   : > { %v13662_v1 = vld [vmem:[%s16897_s3 + $0x12a0] ss:$36 sps:$4 sm:$0xff]   ;;  %v13665_v3 = vld [vmem:[%s16897_s3 + $0x12a8] ss:$36 sps:$4 sm:$0xff]   ;;  %v13671_v28 = vld [vmem:[%s16897_s3 + $0x12f0] ss:$36 sps:$4 sm:$0xff]  }
 0x52b   : > { %v13668_v21 = vld [vmem:[%s16897_s3 + $0x12e8] ss:$36 sps:$4 sm:$0xff]   ;;  %v13679_v31 = vld [vmem:[%s16897_s3 + $0x133c] ss:$36 sps:$4 sm:$0xff]   ;;  %v13674_v32 = vld [vmem:[%s16897_s3 + $0x1330] ss:$36 sps:$4 sm:$0xff]  }
 0x52c   : > { %9773 = vmatpush1.bf16.msra.mxu0 %v13602_v36  ;;  %9988 = vmatpush1.bf16.msra.mxu1 %v13605_v37  ;;  %v13677_v36 = vld [vmem:[%s16897_s3 + $0x1338] ss:$36 sps:$4 sm:$0xff]  }
 0x52d   : > { %9774 = vmatprep.subr.bf16.mxu0 %v13610_v39  ;;  %9989 = vmatprep.subr.bf16.mxu1 %v13613_v46  ;;  %v13682_v37 = vld [vmem:[%s16897_s3 + $0x137c] ss:$36 sps:$4 sm:$0xff]   ;;  %v13685_v39 = vld [vmem:[%s16897_s3 + $0x1384] ss:$36 sps:$4 sm:$0xff]  }
 0x52e   : > { %v13680_v46 = vld [vmem:[%s16897_s3 + $0x1378] ss:$36 sps:$4 sm:$0xff]  }
 0x530   : > { %9775 = vmatpush1.bf16.msra.mxu0 %v13608_v47  ;;  %9990 = vmatpush1.bf16.msra.mxu1 %v13611_v48  ;;  %v13683_v47 = vld [vmem:[%s16897_s3 + $0x1380] ss:$36 sps:$4 sm:$0xff]  }
 0x531   : > { %9776 = vmatprep.subr.bf16.mxu0 %v13616_v34  ;;  %9991 = vmatprep.subr.bf16.mxu1 %v13619_v35  ;;  %v13688_v48 = vld [vmem:[%s16897_s3 + $0x13c4] ss:$36 sps:$4 sm:$0xff]   ;;  %v13691_v34 = vld [vmem:[%s16897_s3 + $0x13cc] ss:$36 sps:$4 sm:$0xff]  }
 0x532   : > { %v13686_v35 = vld [vmem:[%s16897_s3 + $0x13c0] ss:$36 sps:$4 sm:$0xff]  }
 0x534   : > { %9777 = vmatpush1.bf16.msra.mxu0 %v13614_v50  ;;  %9992 = vmatpush1.bf16.msra.mxu1 %v13617_v51  ;;  %v13689_v50 = vld [vmem:[%s16897_s3 + $0x13c8] ss:$36 sps:$4 sm:$0xff]  }
 0x535   : > { %9778 = vmatprep.subr.bf16.mxu0 %v13622_v52  ;;  %9993 = vmatprep.subr.bf16.mxu1 %v13625_v8  ;;  %v13694_v51 = vld [vmem:[%s16897_s3 + $0x140c] ss:$36 sps:$4 sm:$0xff]   ;;  %v13697_v52 = vld [vmem:[%s16897_s3 + $0x1414] ss:$36 sps:$4 sm:$0xff]  }
 0x536   : > { %v13692_v8 = vld [vmem:[%s16897_s3 + $0x1408] ss:$36 sps:$4 sm:$0xff]  }
 0x538   : > { %9779 = vmatpush1.bf16.msra.mxu0 %v13620_v9  ;;  %9994 = vmatpush1.bf16.msra.mxu1 %v13623_v53  ;;  %v13695_v9 = vld [vmem:[%s16897_s3 + $0x1410] ss:$36 sps:$4 sm:$0xff]   ;;  %v13698_v53 = vld [vmem:[%s16897_s3 + $0x260] ss:$36 sps:$4 sm:$0xff]  }
 0x539   : > { %9780 = vmatprep.subr.bf16.mxu0 %v13628_v59  ;;  %9995 = vmatprep.subr.bf16.mxu1 %v13631_v43  ;;  %v13700_v59 = vld [vmem:[%s16897_s3 + $0x6e0] ss:$36 sps:$4 sm:$0xff]  }
 0x53a   : > { %v13699_v43 = vld [vmem:[%s16897_s3 + $0x20] ss:$36 sps:$4 sm:$0xff]  }
 0x53c   : > { %9781 = vmatpush1.bf16.msra.mxu0 %v13626_v56  ;;  %9996 = vmatpush1.bf16.msra.mxu1 %v13629_v40  ;;  %v13701_v56 = vld [vmem:[%s16897_s3 + $0x4a0] ss:$36 sps:$4 sm:$0xff]   ;;  %v13702_v40 = vld [vmem:[%s16897_s3 + $0x2a8] ss:$36 sps:$4 sm:$0xff]  }
 0x53d   : > { %9782 = vmatprep.subr.bf16.mxu0 %v13634_v44  ;;  %9997 = vmatprep.subr.bf16.mxu1 %v13637_v42  ;;  %v13704_v44 = vld [vmem:[%s16897_s3 + $0x728] ss:$36 sps:$4 sm:$0xff]  }
 0x53e   : > { %v13703_v42 = vld [vmem:[%s16897_s3 + $0x68] ss:$36 sps:$4 sm:$0xff]  }
 0x540   : > { %9783 = vmatpush1.bf16.msra.mxu0 %v13632_v63  ;;  %9998 = vmatpush1.bf16.msra.mxu1 %v13635_v14  ;;  %v13705_v63 = vld [vmem:[%s16897_s3 + $0x4e8] ss:$36 sps:$4 sm:$0xff]   ;;  %v13706_v14 = vld [vmem:[%s16897_s3 + $0x2f0] ss:$36 sps:$4 sm:$0xff]  }
 0x541   : > { %9784 = vmatprep.subr.bf16.mxu0 %v13640_v49  ;;  %9999 = vmatprep.subr.bf16.mxu1 %v13643_v17  ;;  %v13708_v49 = vld [vmem:[%s16897_s3 + $0x770] ss:$36 sps:$4 sm:$0xff]  }
 0x542   : > { %v13707_v17 = vld [vmem:[%s16897_s3 + $0xb0] ss:$36 sps:$4 sm:$0xff]  }
 0x544   : > { %9785 = vmatpush1.bf16.msra.mxu0 %v13638_v45  ;;  %10000 = vmatpush1.bf16.msra.mxu1 %v13641_v41  ;;  %v13709_v45 = vld [vmem:[%s16897_s3 + $0x530] ss:$36 sps:$4 sm:$0xff]   ;;  %v13710_v41 = vld [vmem:[%s16897_s3 + $0x338] ss:$36 sps:$4 sm:$0xff]  }
 0x545   : > { %9786 = vmatprep.subr.bf16.mxu0 %v13646_v60  ;;  %10001 = vmatprep.subr.bf16.mxu1 %v13649_v61  ;;  %v13713_v60 = vld [vmem:[%s16897_s3 + $0x578] ss:$36 sps:$4 sm:$0xff]   ;;  %v13714_v61 = vld [vmem:[%s16897_s3 + $0x380] ss:$36 sps:$4 sm:$0xff]  }
 0x548   : > { %9787 = vmatpush1.bf16.msra.mxu0 %v13644_v62  ;;  %10002 = vmatpush1.bf16.msra.mxu1 %v13647_v0  ;;  %v13716_v62 = vld [vmem:[%s16897_s3 + $0x800] ss:$36 sps:$4 sm:$0xff]  }
 0x549   : > { %9799 = vmatprep.subr.bf16.mxu0 %v13652_v2  ;;  %10014 = vmatprep.subr.bf16.mxu1 %v13655_v4  ;;  %v13715_v0 = vld [vmem:[%s16897_s3 + $0x140] ss:$36 sps:$4 sm:$0xff]   ;;  %v13718_v4 = vld [vmem:[%s16897_s3 + $0x3c8] ss:$36 sps:$4 sm:$0xff]  }
 0x54a   : > { %v13717_v2 = vld [vmem:[%s16897_s3 + $0x5c0] ss:$36 sps:$4 sm:$0xff]  }
 0x54b   : > { %9789 = vmatmul.mubr.bf16.vlgmr.msra.gmra.mrb[4].mxu0 %v15609_v27  ;;  %10004 = vmatmul.mubr.bf16.vlgmr.msra.gmra.mrb[4].mxu1 %v15609_v27 }
 0x54c   : > { %9800 = vmatpush1.bf16.msra.mxu0 %v13650_v6  ;;  %10015 = vmatpush1.bf16.msra.mxu1 %v13653_v7  ;;  %v13720_v6 = vld [vmem:[%s16897_s3 + $0x848] ss:$36 sps:$4 sm:$0xff]  }
 0x54d   : > { %9801 = vmatprep.subr.bf16.mxu0 %v13658_v10  ;;  %10016 = vmatprep.subr.bf16.mxu1 %v13661_v13  ;;  %v13719_v7 = vld [vmem:[%s16897_s3 + $0x188] ss:$36 sps:$4 sm:$0xff]   ;;  %v13722_v13 = vld [vmem:[%s16897_s3 + $0x410] ss:$36 sps:$4 sm:$0xff]  }
 0x54e   : > { %9831 = vmatprep.mubr.bf16.mxu0 %v13878_v24  ;;  %10046 = vmatprep.mubr.bf16.mxu1 %v13878_v24  ;;  %v13673_v24 = vld [vmem:[%s16897_s3 + $0x12f4] ss:$36 sps:$4 sm:$0xff]   ;;  %v13721_v10 = vld [vmem:[%s16897_s3 + $0x608] ss:$36 sps:$4 sm:$0xff]  }
 0x550   : > { %9802 = vmatpush1.bf16.msra.mxu0 %v13656_v15  ;;  %10017 = vmatpush1.bf16.msra.mxu1 %v13659_v16  ;;  %v13724_v15 = vld [vmem:[%s16897_s3 + $0x890] ss:$36 sps:$4 sm:$0xff]  }
 0x551   : > { %9803 = vmatprep.subr.bf16.mxu0 %v13664_v22  ;;  %10018 = vmatprep.subr.bf16.mxu1 %v13667_v18  ;;  %v13723_v16 = vld [vmem:[%s16897_s3 + $0x1d0] ss:$36 sps:$4 sm:$0xff]   ;;  %v13726_v18 = vld [vmem:[%s16897_s3 + $0x458] ss:$36 sps:$4 sm:$0xff]  }
 0x552   : > { %v13725_v22 = vld [vmem:[%s16897_s3 + $0x650] ss:$36 sps:$4 sm:$0xff]  }
 0x554   : > { %9804 = vmatpush1.bf16.msra.mxu0 %v13662_v1  ;;  %10019 = vmatpush1.bf16.msra.mxu1 %v13665_v3  ;;  %v13728_v1 = vld [vmem:[%s16897_s3 + $0x8d8] ss:$36 sps:$4 sm:$0xff]  }
 0x555   : > { %9805 = vmatprep.subr.bf16.mxu0 %v13670_v38  ;;  %10020 = vmatprep.subr.bf16.mxu1 %v13673_v24  ;;  %v13727_v3 = vld [vmem:[%s16897_s3 + $0x218] ss:$36 sps:$4 sm:$0xff]   ;;  %v13730_v24 = vld [vmem:[%s16897_s3 + $0xb60] ss:$36 sps:$4 sm:$0xff]  }
 0x556   : > { %v13729_v38 = vld [vmem:[%s16897_s3 + $0x698] ss:$36 sps:$4 sm:$0xff]  }
 0x558   : > { %9806 = vmatpush1.bf16.msra.mxu0 %v13668_v21  ;;  %10021 = vmatpush1.bf16.msra.mxu1 %v13671_v28  ;;  %v13732_v21 = vld [vmem:[%s16897_s3 + $0xfe0] ss:$36 sps:$4 sm:$0xff]  }
 0x559   : > { %9807 = vmatprep.subr.bf16.mxu0 %v13676_v29  ;;  %10022 = vmatprep.subr.bf16.mxu1 %v13679_v31  ;;  %v13731_v28 = vld [vmem:[%s16897_s3 + $0x920] ss:$36 sps:$4 sm:$0xff]   ;;  %v13734_v31 = vld [vmem:[%s16897_s3 + $0xba8] ss:$36 sps:$4 sm:$0xff]  }
 0x55a   : > { %v13733_v29 = vld [vmem:[%s16897_s3 + $0xda0] ss:$36 sps:$4 sm:$0xff]  }
 0x55c   : > { %9808 = vmatpush1.bf16.msra.mxu0 %v13674_v32  ;;  %10023 = vmatpush1.bf16.msra.mxu1 %v13677_v36  ;;  %v13736_v32 = vld [vmem:[%s16897_s3 + $0x1028] ss:$36 sps:$4 sm:$0xff]  }
 0x55d   : > { %9809 = vmatprep.subr.bf16.mxu0 %v13682_v37  ;;  %10024 = vmatprep.subr.bf16.mxu1 %v13685_v39  ;;  %v13735_v36 = vld [vmem:[%s16897_s3 + $0x968] ss:$36 sps:$4 sm:$0xff]   ;;  %v13738_v39 = vld [vmem:[%s16897_s3 + $0xbf0] ss:$36 sps:$4 sm:$0xff]  }
 0x55e   : > { %v13737_v37 = vld [vmem:[%s16897_s3 + $0xde8] ss:$36 sps:$4 sm:$0xff]  }
 0x560   : > { %9810 = vmatpush1.bf16.msra.mxu0 %v13680_v46  ;;  %10025 = vmatpush1.bf16.msra.mxu1 %v13683_v47  ;;  %v13741_v46 = vld [vmem:[%s16897_s3 + $0xe30] ss:$36 sps:$4 sm:$0xff]   ;;  %v13742_v47 = vld [vmem:[%s16897_s3 + $0xc38] ss:$36 sps:$4 sm:$0xff]  }
 0x561   : > { %9811 = vmatprep.subr.bf16.mxu0 %v13688_v48  ;;  %10026 = vmatprep.subr.bf16.mxu1 %v13691_v34  ;;  %v13745_v48 = vld [vmem:[%s16897_s3 + $0xe78] ss:$36 sps:$4 sm:$0xff]   ;;  %v13746_v34 = vld [vmem:[%s16897_s3 + $0xc80] ss:$36 sps:$4 sm:$0xff]  }
 0x564   : > { %9812 = vmatpush1.bf16.msra.mxu0 %v13686_v35  ;;  %10027 = vmatpush1.bf16.msra.mxu1 %v13689_v50  ;;  %v13748_v35 = vld [vmem:[%s16897_s3 + $0x1100] ss:$36 sps:$4 sm:$0xff]  }
 0x565   : > { %9813 = vmatprep.subr.bf16.mxu0 %v13694_v51  ;;  %10028 = vmatprep.subr.bf16.mxu1 %v13697_v52  ;;  %v13747_v50 = vld [vmem:[%s16897_s3 + $0xa40] ss:$36 sps:$4 sm:$0xff]   ;;  %v13750_v52 = vld [vmem:[%s16897_s3 + $0xcc8] ss:$36 sps:$4 sm:$0xff]  }
 0x566   : > { %v13749_v51 = vld [vmem:[%s16897_s3 + $0xec0] ss:$36 sps:$4 sm:$0xff]  }
 0x568   : > { %9814 = vmatpush1.bf16.msra.mxu0 %v13692_v8  ;;  %10029 = vmatpush1.bf16.msra.mxu1 %v13695_v9  ;;  %v13752_v8 = vld [vmem:[%s16897_s3 + $0x1148] ss:$36 sps:$4 sm:$0xff]  }
 0x569   : > { %11703 = vmatprep.subr.bf16.mxu0 %v13698_v53  ;;  %11725 = vmatprep.subr.bf16.mxu1 %v13700_v59  ;;  %v13751_v9 = vld [vmem:[%s16897_s3 + $0xa88] ss:$36 sps:$4 sm:$0xff]   ;;  %v13754_v59 = vld [vmem:[%s16897_s3 + $0xd10] ss:$36 sps:$4 sm:$0xff]  }
 0x56a   : > { %v13753_v53 = vld [vmem:[%s16897_s3 + $0xf08] ss:$36 sps:$4 sm:$0xff]  }
 0x56b   : > { %9832 = vmatmul.mubr.bf16.vlgmr.msra.gmra.mrb[4].mxu0 %v15712_v5  ;;  %10047 = vmatmul.mubr.bf16.vlgmr.msra.gmra.mrb[4].mxu1 %v15712_v5 }
 0x56c   : > { %11704 = vmatpush3.bf16.msra.mxu0 %v13699_v43  ;;  %11726 = vmatpush3.bf16.msra.mxu1 %v13701_v56  ;;  %v13756_v43 = vld [vmem:[%s16897_s3 + $0x1190] ss:$36 sps:$4 sm:$0xff]  }
 0x56d   : > { %11705 = vmatprep.subr.bf16.mxu0 %v13702_v40  ;;  %11727 = vmatprep.subr.bf16.mxu1 %v13704_v44  ;;  %v13755_v56 = vld [vmem:[%s16897_s3 + $0xad0] ss:$36 sps:$4 sm:$0xff]   ;;  %v13758_v44 = vld [vmem:[%s16897_s3 + $0xd58] ss:$36 sps:$4 sm:$0xff]  }
 0x56e   : > { %10089 = vmatprep.mubr.bf16.mxu0 %v14876_v23  ;;  %10130 = vmatprep.mubr.bf16.mxu1 %v15059_v58  ;;  %v13712_v23 = vld [vmem:[%s16897_s3 + $0x7b8] ss:$36 sps:$4 sm:$0xff]   ;;  %v13757_v40 = vld [vmem:[%s16897_s3 + $0xf50] ss:$36 sps:$4 sm:$0xff]  }
 0x56f   : > { %v13711_v58 = vld [vmem:[%s16897_s3 + $0xf8] ss:$36 sps:$4 sm:$0xff]  }
 0x570   : > { %11706 = vmatpush3.bf16.msra.mxu0 %v13703_v42  ;;  %11728 = vmatpush3.bf16.msra.mxu1 %v13705_v63  ;;  %v13760_v42 = vld [vmem:[%s16897_s3 + $0x11d8] ss:$36 sps:$4 sm:$0xff]  }
 0x571   : > { %11707 = vmatprep.subr.bf16.mxu0 %v13706_v14  ;;  %11729 = vmatprep.subr.bf16.mxu1 %v13708_v49  ;;  %v13759_v63 = vld [vmem:[%s16897_s3 + $0xb18] ss:$36 sps:$4 sm:$0xff]   ;;  %v13762_v49 = vld [vmem:[%s16897_s3 + $0x1220] ss:$36 sps:$4 sm:$0xff]  }
 0x572   : > { %v13761_v14 = vld [vmem:[%s16897_s3 + $0xf98] ss:$36 sps:$4 sm:$0xff]  }
 0x574   : > { %11708 = vmatpush3.bf16.msra.mxu0 %v13707_v17  ;;  %11730 = vmatpush3.bf16.msra.mxu1 %v13709_v45  ;;  %v13879_v17 = vmov 0.0   ;;  %v13763_v45 = vld [vmem:[%s16897_s3 + $0x1268] ss:$36 sps:$4 sm:$0xff]  }
 0x575   : > { %11709 = vmatprep.subr.bf16.mxu0 %v13710_v41  ;;  %11731 = vmatprep.subr.bf16.mxu1 %v13712_v23  ;;  %v13764_v41 = vld [vmem:[%s16897_s3 + $0x12b0] ss:$36 sps:$4 sm:$0xff]   ;;  %v13767_v23 = vld [vmem:[%s16897_s3 + $0x1388] ss:$36 sps:$4 sm:$0xff]  }
 0x578   : > { %11710 = vmatpush3.bf16.msra.mxu0 %v13711_v58  ;;  %11732 = vmatpush3.bf16.msra.mxu1 %v13713_v60  ;;  %v13768_v58 = vld [vmem:[%s16897_s3 + $0x13d0] ss:$36 sps:$4 sm:$0xff]   ;;  %v13769_v60 = vld [vmem:[%s16897_s3 + $0x1418] ss:$36 sps:$4 sm:$0xff]  }
 0x579   : > { %11711 = vmatprep.subr.bf16.mxu0 %v13714_v61  ;;  %11733 = vmatprep.subr.bf16.mxu1 %v13716_v62  ;;  %v5859_v61 = vrot.slane %v16363_v54, %v4900_v57  ;;  %v5867_v62 = vrot.slane %v16363_v54, %v4908_v20 }
 0x57c   : > { %11712 = vmatpush3.bf16.msra.mxu0 %v13715_v0  ;;  %11734 = vmatpush3.bf16.msra.mxu1 %v13717_v2  ;;  %v5863_v0 = vrot.slane %v16363_v54, %v4904_v12  ;;  %v5871_v2 = vrot.slane %v16363_v54, %v4912_v55 }
 0x57d   : > { %11713 = vmatprep.subr.bf16.mxu0 %v13718_v4  ;;  %11735 = vmatprep.subr.bf16.mxu1 %v13720_v6 }
 0x580   : > { %11714 = vmatpush3.bf16.msra.mxu0 %v13719_v7  ;;  %11736 = vmatpush3.bf16.msra.mxu1 %v13721_v10 }
 0x581   : > { %11715 = vmatprep.subr.bf16.mxu0 %v13722_v13  ;;  %11737 = vmatprep.subr.bf16.mxu1 %v13724_v15 }
 0x584   : > { %11716 = vmatpush3.bf16.msra.mxu0 %v13723_v16  ;;  %11738 = vmatpush3.bf16.msra.mxu1 %v13725_v22 }
 0x585   : > { %11717 = vmatprep.subr.bf16.mxu0 %v13726_v18  ;;  %11739 = vmatprep.subr.bf16.mxu1 %v13728_v1 }
 0x588   : > { %11718 = vmatpush3.bf16.msra.mxu0 %v13727_v3  ;;  %11740 = vmatpush3.bf16.msra.mxu1 %v13729_v38  ;;  %v10961_v38 = vld [vmem:[%s16898_s4 + $0x8] ss:$0 sm:$0xff] }
 0x589   : > { %11747 = vmatprep.subr.bf16.mxu0 %v13730_v24  ;;  %11769 = vmatprep.subr.bf16.mxu1 %v13732_v21 }
 0x58b   : > { %10090 = vmatmul.mubr.bf16.vlgmr.msra.gmra.mrb[8].mxu0 %v14886_v30  ;;  %10131 = vmatmul.mubr.bf16.vlgmr.msra.gmra.mrb[8].mxu1 %v15127_v25  ;;  %v13740_v30 = vld [vmem:[%s16897_s3 + $0x1070] ss:$36 sps:$4 sm:$0xff]  }
 0x58c   : > { %11748 = vmatpush3.bf16.msra.mxu0 %v13731_v28  ;;  %11770 = vmatpush3.bf16.msra.mxu1 %v13733_v29  ;;  %v13739_v25 = vld [vmem:[%s16897_s3 + $0x9b0] ss:$36 sps:$4 sm:$0xff]  }
 0x58d   : > { %11749 = vmatprep.subr.bf16.mxu0 %v13734_v31  ;;  %11771 = vmatprep.subr.bf16.mxu1 %v13736_v32 }
 0x58e   : > { %10171 = vmatprep.mubr.bf16.mxu0 %v15233_v26  ;;  %10212 = vmatprep.mubr.bf16.mxu1 %v15409_v19  ;;  %v13744_v26 = vld [vmem:[%s16897_s3 + $0x10b8] ss:$36 sps:$4 sm:$0xff]  }
 0x58f   : > { %v13743_v19 = vld [vmem:[%s16897_s3 + $0x9f8] ss:$36 sps:$4 sm:$0xff]  }
 0x590   : > { %11750 = vmatpush3.bf16.msra.mxu0 %v13735_v36  ;;  %11772 = vmatpush3.bf16.msra.mxu1 %v13737_v37 }
 0x591   : > { %11751 = vmatprep.subr.bf16.mxu0 %v13738_v39  ;;  %11773 = vmatprep.subr.bf16.mxu1 %v13740_v30 }
 0x594   : > { %11752 = vmatpush3.bf16.msra.mxu0 %v13739_v25  ;;  %11774 = vmatpush3.bf16.msra.mxu1 %v13741_v46 }
 0x595   : > { %11753 = vmatprep.subr.bf16.mxu0 %v13742_v47  ;;  %11775 = vmatprep.subr.bf16.mxu1 %v13744_v26 }
 0x598   : > { %11754 = vmatpush3.bf16.msra.mxu0 %v13743_v19  ;;  %11776 = vmatpush3.bf16.msra.mxu1 %v13745_v48 }
 0x599   : > { %11755 = vmatprep.subr.bf16.mxu0 %v13746_v34  ;;  %11777 = vmatprep.subr.bf16.mxu1 %v13748_v35 }
 0x59c   : > { %11756 = vmatpush3.bf16.msra.mxu0 %v13747_v50  ;;  %11778 = vmatpush3.bf16.msra.mxu1 %v13749_v51 }
 0x59d   : > { %11757 = vmatprep.subr.bf16.mxu0 %v13750_v52  ;;  %11779 = vmatprep.subr.bf16.mxu1 %v13752_v8 }
 0x5a0   : > { %11758 = vmatpush3.bf16.msra.mxu0 %v13751_v9  ;;  %11780 = vmatpush3.bf16.msra.mxu1 %v13753_v53 }
 0x5a1   : > { %11759 = vmatprep.subr.bf16.mxu0 %v13754_v59  ;;  %11781 = vmatprep.subr.bf16.mxu1 %v13756_v43 }
 0x5a4   : > { %11760 = vmatpush3.bf16.msra.mxu0 %v13755_v56  ;;  %11782 = vmatpush3.bf16.msra.mxu1 %v13757_v40 }
 0x5a5   : > { %11761 = vmatprep.subr.bf16.mxu0 %v13758_v44  ;;  %11783 = vmatprep.subr.bf16.mxu1 %v13760_v42 }
 0x5a8   : > { %11762 = vmatpush3.bf16.msra.mxu0 %v13759_v63  ;;  %11784 = vmatpush3.bf16.msra.mxu1 %v13761_v14 }
 0x5a9   : > { %11800 = vmatprep.subr.bf16.mxu0 %v13879_v17 }
 0x5ab   : > { %10172 = vmatmul.mubr.bf16.vlgmr.msra.gmra.mrb[12].mxu0 %v15376_v33  ;;  %10213 = vmatmul.mubr.bf16.vlgmr.msra.gmra.mrb[12].mxu1 %v15609_v27  ;;  %v13765_v33 = vld [vmem:[%s16897_s3 + $0x12f8] ss:$36 sps:$4 sm:$0xff]   ;;  %v13766_v27 = vld [vmem:[%s16897_s3 + $0x1340] ss:$36 sps:$4 sm:$0xff]  }
 0x5ac   : > { %11801 = vmatpush3.bf16.msra.mxu0 %v13762_v49  ;;  %11816 = vmatprep.mubr.msk.bf16.mxu0 %vm13880_vm0, %v13879_v17 }
 0x5ad   : > { %11802 = vmatprep.subr.bf16.mxu0 %v13879_v17 }
 0x5b0   : > { %11803 = vmatpush3.bf16.msra.mxu0 %v13763_v45 }
 0x5b1   : > { %11804 = vmatprep.subr.bf16.mxu0 %v13879_v17 }
 0x5b4   : > { %11805 = vmatpush3.bf16.msra.mxu0 %v13764_v41 }
 0x5b5   : > { %11806 = vmatprep.subr.bf16.mxu0 %v13879_v17 }
 0x5b8   : > { %11807 = vmatpush3.bf16.msra.mxu0 %v13765_v33 }
 0x5b9   : > { %11808 = vmatprep.subr.bf16.mxu0 %v13879_v17 }
 0x5bc   : > { %11809 = vmatpush3.bf16.msra.mxu0 %v13766_v27 }
 0x5bd   : > { %11810 = vmatprep.subr.bf16.mxu0 %v13879_v17 }
 0x5c0   : > { %11811 = vmatpush3.bf16.msra.mxu0 %v13767_v23 }
 0x5c1   : > { %11812 = vmatprep.subr.bf16.mxu0 %v13879_v17 }
 0x5c4   : > { %11813 = vmatpush3.bf16.msra.mxu0 %v13768_v58 }
 0x5c5   : > { %11814 = vmatprep.subr.bf16.mxu0 %v13879_v17 }
 0x5c8   : > { %11815 = vmatpush3.bf16.msra.mxu0 %v13769_v60 }
 0x5cb   : > { %11817 = vmatmul.mubr.bf16.vlgmr.msra.gmra.mrb[16].mxu0 %v15712_v5 }
 0x63e   : > { %v9833_v4 = vpop.f32.mrb[4].mxu0  ;;  %v10048_v6 = vpop.f32.mrb[4].mxu1 }
 0x63f   : > { %v11876_v7 = vadd.f32 %v9833_v4, %v5859_v61  ;;  %v11880_v5 = vadd.f32 %v10048_v6, %v5867_v62  ;;  %v9835_v10 = vpop.f32.mrb[5].mxu0  ;;  %v10050_v13 = vpop.f32.mrb[5].mxu1 }
 0x640   : > { %v11877_v15 = vadd.f32 %v9835_v10, %v5863_v0  ;;  %v11881_v57 = vadd.f32 %v10050_v13, %v5871_v2  ;;  %v9837_v16 = vpop.f32.mrb[6].mxu0  ;;  %v10052_v22 = vpop.f32.mrb[6].mxu1 }
 0x641   : > { %10266 = vst [vmem:[#allocation4 + $0x20] sm:$0xff] %v11876_v7  ;;  %10268 = vst [vmem:[#allocation4 + $0x30] sm:$0xff] %v11880_v5  ;;  %v11878_v20 = vadd.f32 %v9837_v16, %v5859_v61  ;;  %v11882_v18 = vadd.f32 %v10052_v22, %v5867_v62  ;;  %v9839_v1 = vpop.f32.mrb[7].mxu0  ;;  %v10054_v12 = vpop.f32.mrb[7].mxu1 }
 0x642   : > { %10267 = vst [vmem:[#allocation4 + $0x28] sm:$0xff] %v11877_v15  ;;  %10269 = vst [vmem:[#allocation4 + $0x38] sm:$0xff] %v11881_v57  ;;  %v11879_v11 = vadd.f32 %v9839_v1, %v5863_v0  ;;  %v11883_v55 = vadd.f32 %v10054_v12, %v5871_v2 }
 0x643   : > { %10275 = vst [vmem:[#allocation4 + $0x68] sm:$0xff] %v11878_v20  ;;  %10277 = vst [vmem:[#allocation4 + $0x78] sm:$0xff] %v11882_v18 }
 0x644   : > { %10276 = vst [vmem:[#allocation4 + $0x70] sm:$0xff] %v11879_v11  ;;  %10278 = vst [vmem:[#allocation4 + $0x80] sm:$0xff] %v11883_v55 }
 0x65e   : > { %v11719_v54 = vpop.f32.mrb[8].mxu0  ;;  %v11741_v3 = vpop.f32.mrb[8].mxu1 }
 0x65f   : > { %v11720_v24 = vpop.f32.mrb[9].mxu0  ;;  %v11742_v21 = vpop.f32.mrb[9].mxu1 }
 0x660   : > { %v11721_v28 = vadd.f32 %v11720_v24, %v11719_v54  ;;  %v11722_v29 = vpop.f32.mrb[10].mxu0  ;;  %v11743_v31 = vadd.f32 %v11742_v21, %v11741_v3  ;;  %v11744_v32 = vpop.f32.mrb[10].mxu1 }
 0x661   : > { %v11723_v36 = vpop.f32.mrb[11].mxu0  ;;  %v11745_v37 = vpop.f32.mrb[11].mxu1 }
 0x662   : > { %v10092_v39 = vadd.f32 %v11721_v28, %v10961_v38  ;;  %v11724_v30 = vadd.f32 %v11723_v36, %v11722_v29  ;;  %v11746_v25 = vadd.f32 %v11745_v37, %v11744_v32 }
 0x664   : > { %v10095_v46 = vadd.f32 %v11724_v30, %v10961_v38  ;;  %v10133_v47 = vadd.f32 %v11743_v31, %v10092_v39 }
 0x666   : > { %v10136_v26 = vadd.f32 %v11746_v25, %v10095_v46 }
 0x67e   : > { %v11763_v19 = vpop.f32.mrb[12].mxu0  ;;  %v11785_v48 = vpop.f32.mrb[12].mxu1 }
 0x67f   : > { %v11764_v34 = vpop.f32.mrb[13].mxu0  ;;  %v11786_v35 = vpop.f32.mrb[13].mxu1 }
 0x680   : > { %v11765_v50 = vadd.f32 %v11764_v34, %v11763_v19  ;;  %v11766_v51 = vpop.f32.mrb[14].mxu0  ;;  %v11787_v52 = vadd.f32 %v11786_v35, %v11785_v48  ;;  %v11788_v8 = vpop.f32.mrb[14].mxu1 }
 0x681   : > { %v11767_v9 = vpop.f32.mrb[15].mxu0  ;;  %v11789_v53 = vpop.f32.mrb[15].mxu1 }
 0x682   : > { %v10174_v59 = vadd.f32 %v11765_v50, %v10133_v47  ;;  %v11768_v43 = vadd.f32 %v11767_v9, %v11766_v51  ;;  %v11790_v56 = vadd.f32 %v11789_v53, %v11788_v8 }
 0x684   : > { %v10177_v40 = vadd.f32 %v11768_v43, %v10136_v26  ;;  %v10215_v44 = vadd.f32 %v11787_v52, %v10174_v59 }
 0x686   : > { %v10218_v42 = vadd.f32 %v11790_v56, %v10177_v40 }
 0x69e   : > { %v10255_v63 = vpop.f32.mrb[16].mxu0 }
 0x69f   : > { %v10256_v14 = vadd.f32 %v10255_v63, %v10215_v44  ;;  %v11818_v49 = vpop.f32.mrb[17].mxu0 }
 0x6a0   : > { %v10258_v17 = vpop.f32.mrb[18].mxu0 }
 0x6a1   : > { %10270 = vst [vmem:[#allocation4 + $0x40] sm:$0xff] %v10256_v14  ;;  %v10259_v45 = vadd.f32 %v10258_v17, %v10218_v42  ;;  %v11819_v41 = vpop.f32.mrb[19].mxu0 }
 0x6a3   : > { %10279 = vst [vmem:[#allocation4 + $0x88] sm:$0xff] %v10259_v45 }
 0x6a4 PF: > { %p16853_p12 = scmp.eq.s32.totalorder %s10364_s23, 3  ;;  %s13881_s14 = smov [#allocation4]  }
 0x6a5   : > { %s10290_s15 = sshll.u32 %s13881_s14, 4  ;;  %s10291_s15 = int_to_ptr.vmem [resolvable:$true] %s10290_s15 }
 0x6a6   : > { %s13807_s16 = scalar_lea.vmem %s10291_s15, 2304  ;;  %p13814_p2 = scmp.lt.s32.totalorder %s10291_s15, %s10291_s15 }
 0x6a7   : > { %p13808_p13 = scmp.ne.s32.totalorder %s10291_s15, %s13807_s16  ;;  %p13815_p3 = scmp.lt.s32.totalorder %s13807_s16, %s13807_s16 }
 0x6a9   : > { %p13809_p0 = pnand %p13808_p13, %p16853_p12  ;;  %p13816_p4 = por %p13815_p3, %p13814_p2 }
 0x6ab   : > { %p13810_p1 = pneg %p13809_p0 }
 0x6ad   : > { %p13817_p5 = pnand %p13816_p4, %p13810_p1 }
 0x6af   : > { %13820 = shalt.err (!%p13817_p5)
}
 0x6b0   : > { %s13821_s23 = scalar_lea.hbm %s16899_s5, 2304 }
 0x6b1   : > { %p13822_p6 = scmp.ne.s32.totalorder %s16899_s5, %s13821_s23  ;;  %p13827_p9 = scmp.lt.u32.totalorder %s13821_s23, %s16899_s5 }
 0x6b3   : > { %p13823_p7 = pnand %p13822_p6, %p16853_p12 }
 0x6b5   : > { %p13824_p8 = pneg %p13823_p7 }
 0x6b7   : > { %p13829_p10 = pnand %p13827_p9, %p13824_p8 }
 0x6b9   : > { %13832 = shalt.err (!%p13829_p10)
}
 0x6ba   : > { %s13882_s30 = smov 1152   ;;  %s13883_s6 = smov 72  }
 0x6bb   : > { %11950 = dma.vmem_to_hbm [thread:$0]  (%p16853_p12), %s10291_s15, 2304, %s16899_s5, [#allocation5], %s13882_s30, %s13882_s30, %s13883_s6  }
 0x6bc   : > { %13854 = dma.done.wait (%p16853_p12), [#allocation5], 2304  }
 0x6bd   : > { %13856 = vsyncadd (%p16853_p12), [#allocation5], 4294964992 }
 0x6be PF: > { %s16_s22 = sadd.s32 1, %s13875_s22   ;;  %s16901_s18 = smov %s13863_s19 }
 0x6bf   : > { %p13_p11 = scmp.ge.s32.totalorder %s16_s22, 6   ;;  %s16902_s19 = smov %s13950_s27 }
 0x6c0   : > { %s16903_s20 = smov %s13871_s21  ;;  %s16904_s21 = smov %s16906_s24 }
 0x6c1   :  { %15 = sbr.rel (!%p13_p11) target bundleno = 3 (0x3), region = 107 }
 0x6c8   :  { %10306 = vsyncpa [#allocation5], 1 }
 0x6c9   :  { %10308 = vsyncpa [#allocation5 + $0x1], 1 }

</bundles_post_ra>
